<compile_context>
chip_gen: v7x
topology: tpu7x:2x2x1
jax: 0.10.0
libtpu: 0.0.40
codegen_flags: <defaults>
</compile_context>

<pallas_src>
import jax
import jax.numpy as jnp
from jax import lax
from jax.experimental import pallas as pl
from jax.experimental.pallas import tpu as pltpu

# ---- static hyperparameters (mirroring LSTMPointerNet's __init__ shapes) ----
N_SENTS = 8      # num_sents per article
D_IN    = 32     # input_dim == LSTM-cell input size == sentence repr dim
N_HID   = 32     # n_hidden of the pointer net
N_LAYER = 1      # n_layer of the pointer LSTM (kept to 1 here)
N_HOP   = 1      # n_hop glimpses
N_STEP  = 4      # n_abs: number of extraction / scoring steps
BATCH   = 8      # articles per call (grid axis, "parallel")
NEG_INF = -1e18

G4   = 4 * N_HID                       # 128 (LSTM gate width)
CATW = 2 * G4 + 4 * N_HID + 1          # packed-projection width = 385


# ----------------------------- in-kernel helpers -----------------------------
def _attn_score(feat, query, v_row, wq):
    """Unnormalized pointer score. feat:[N,H] query:[1,H] v_row:[1,H] -> [N,1]."""
    s = jnp.tanh(feat + jnp.dot(query, wq, preferred_element_type=jnp.float32))
    return jnp.sum(s * v_row, axis=1, keepdims=True)


def _softmax_col(x):
    """Softmax over the sentence axis of a column vector [N,1]."""
    m = jnp.max(x, axis=0, keepdims=True)
    e = jnp.exp(x - m)
    return e / jnp.sum(e, axis=0, keepdims=True)


def _lstm_from_gates(gates, c_prev):
    """PyTorch LSTMCell nonlinearity given precomputed gates [1,4H]."""
    i = jax.nn.sigmoid(gates[:, 0 * N_HID:1 * N_HID])
    f = jax.nn.sigmoid(gates[:, 1 * N_HID:2 * N_HID])
    g = jnp.tanh(gates[:, 2 * N_HID:3 * N_HID])
    o = jax.nn.sigmoid(gates[:, 3 * N_HID:4 * N_HID])
    c_new = f * c_prev + i * g
    h_new = o * jnp.tanh(c_new)
    return h_new, c_new


# ------------------------- fused actor + critic kernel ------------------------
def actor_critic_kernel(
        enc_ref, w_cat_ref,
        a_attn_wq_ref, a_attn_v_ref, a_hop_wq_ref, a_hop_v_ref,
        a_whh_ref, a_b_ref, a_gx0_ref, a_h0_ref, a_c0_ref,
        c_attn_wq_ref, c_attn_v_ref, c_hop_wq_ref, c_hop_v_ref,
        c_hg_ref, c_gx0_ref, c_c0_ref, b_sl_ref,
        idx_out_ref, score_out_ref):
    # One fused input projection: [N, D] @ [D, CATW] -> everything derived from
    # attn_mem that does not depend on the recurrence.
    proj = jnp.dot(enc_ref[0], w_cat_ref[...],
                   preferred_element_type=jnp.float32)            # [N, CATW]
    gates_mem_a = proj[:, 0:G4]                                   # attn_mem @ w_ih (actor)
    gates_mem_c = proj[:, G4:2 * G4]                              # attn_mem @ w_ih (critic)
    attn_feat_a = proj[:, 2 * G4 + 0 * N_HID:2 * G4 + 1 * N_HID]  # [N, H]
    hop_feat_a  = proj[:, 2 * G4 + 1 * N_HID:2 * G4 + 2 * N_HID]
    attn_feat_c = proj[:, 2 * G4 + 2 * N_HID:2 * G4 + 3 * N_HID]
    hop_feat_c  = proj[:, 2 * G4 + 3 * N_HID:2 * G4 + 4 * N_HID]
    score_mem   = proj[:, 2 * G4 + 4 * N_HID:2 * G4 + 4 * N_HID + 1]  # [N,1] = attn_mem @ w_sl^T

    row_iota  = lax.broadcasted_iota(jnp.int32, (N_SENTS, 1), 0)
    step_iota = lax.broadcasted_iota(jnp.int32, (1, N_STEP), 1)

    # ------------------ actor: PtrExtractorRL (eval path) -------------------
    a_attn_wq = a_attn_wq_ref[...]
    a_attn_v  = a_attn_v_ref[...]
    a_hop_wq  = a_hop_wq_ref[...]
    a_hop_v   = a_hop_v_ref[...]
    w_hh_a    = a_whh_ref[...]
    b_a       = a_b_ref[...]
    h = a_h0_ref[...]                         # [1, H]
    c = a_c0_ref[...]                         # [1, H]
    gate_x = a_gx0_ref[...]                   # init_i @ w_ih (precomputed)
    selected = jnp.zeros((N_SENTS, 1), jnp.float32)
    idx_acc = jnp.zeros((1, N_STEP), jnp.int32)

    for t in range(N_STEP):                   # static unroll over n_abs steps
        gates = gate_x + jnp.dot(h, w_hh_a,
                                 preferred_element_type=jnp.float32) + b_a
        h, c = _lstm_from_gates(gates, c)     # lstm_states carried (actor)
        query = h                             # h[:, -1, :] with n_layer == 1
        for _ in range(N_HOP):                # glimpse hops
            p = _softmax_col(_attn_score(hop_feat_a, query, a_hop_v, a_hop_wq))
            query = jnp.sum(p * hop_feat_a, axis=0, keepdims=True)    # [1, H]
        score = _attn_score(attn_feat_a, query, a_attn_v, a_attn_wq)  # [N, 1]
        # eval path: previously picked sentences get score = -1e18
        score = jnp.where(selected > 0.0, NEG_INF, score)
        maxv = jnp.max(score, axis=0, keepdims=True)                  # [1,1]
        idx = jnp.min(jnp.where(score >= maxv, row_iota, N_SENTS),
                      axis=0, keepdims=True)                          # [1,1] first argmax
        onehot = row_iota == idx                                      # [N,1]
        idx_acc = jnp.where(step_iota == t, idx, idx_acc)
        selected = jnp.where(onehot, 1.0, selected)
        # lstm_in = attn_mem[idx]; only its (hoisted) gate contribution is needed
        gate_x = jnp.sum(jnp.where(onehot, gates_mem_a, 0.0),
                         axis=0, keepdims=True)                       # [1, 4H]
    idx_out_ref[0] = idx_acc                  # single store after the loop

    # -------------------------- critic: PtrScorer ----------------------------
    c_attn_wq = c_attn_wq_ref[...]
    c_attn_v  = c_attn_v_ref[...]
    c_hop_wq  = c_hop_wq_ref[...]
    c_hop_v   = c_hop_v_ref[...]
    hg_c   = c_hg_ref[...]                    # init_h @ w_hh + b (constant: states never update)
    c0_c   = c_c0_ref[...]                    # init_c
    gate_x_c = c_gx0_ref[...]                 # init_i @ w_ih (precomputed)
    b_sl   = b_sl_ref[...]                    # [1,1]
    score_acc = jnp.zeros((1, N_STEP), jnp.float32)

    for t in range(N_STEP):
        gates = gate_x_c + hg_c
        hh, _ = _lstm_from_gates(gates, c0_c)
        query = hh
        for _ in range(N_HOP):
            # PtrScorer.attention(hop_feat, hop_feat, query, hop_v, hop_wq)
            p = _softmax_col(_attn_score(hop_feat_c, query, c_hop_v, c_hop_wq))
            query = jnp.sum(p * hop_feat_c, axis=0, keepdims=True)    # [1, H]
        # PtrScorer.attention(attn_mem, attn_feat, query, attn_v, attn_wq)
        p = _softmax_col(_attn_score(attn_feat_c, query, c_attn_v, c_attn_wq))
        # score_linear(p @ attn_mem) == p . (attn_mem @ w_sl^T) + b_sl
        s_t = jnp.sum(p * score_mem, axis=0, keepdims=True) + b_sl    # [1,1]
        score_acc = jnp.where(step_iota == t, s_t, score_acc)
        # lstm_in = output = p @ attn_mem; hoisted gate contribution = p @ gates_mem
        gate_x_c = jnp.sum(p * gates_mem_c, axis=0, keepdims=True)    # [1, 4H]
    score_out_ref[0] = score_acc              # single store after the loop


# --------------------------------- wrapper ------------------------------------
_PACKED_KEYS = ("w_cat",
                "a_attn_wq", "a_attn_v", "a_hop_wq", "a_hop_v",
                "a_whh", "a_b", "a_gx0", "a_h0", "a_c0",
                "c_attn_wq", "c_attn_v", "c_hop_wq", "c_hop_v",
                "c_hg", "c_gx0", "c_c0", "b_sl")


def _const_spec(shape):
    zeros = (0,) * len(shape)
    return pl.BlockSpec(shape, lambda b, _z=zeros: _z)   # broadcast across batch


@jax.jit
def actor_critic_forward(enc_art, packed):
    """Fused ActorCritic forward on already-encoded articles.

    enc_art: [B, num_sents, input_dim]. Returns (extract indices [B, n_abs],
    critic baseline scores [B, n_abs]).
    """
    B = enc_art.shape[0]
    weight_args = tuple(packed[k] for k in _PACKED_KEYS)
    in_specs = [pl.BlockSpec((1, N_SENTS, D_IN), lambda b: (b, 0, 0))]
    in_specs += [_const_spec(w.shape) for w in weight_args]
    out_specs = (
        pl.BlockSpec((1, 1, N_STEP), lambda b: (b, 0, 0)),
        pl.BlockSpec((1, 1, N_STEP), lambda b: (b, 0, 0)),
    )
    idxs, scores = pl.pallas_call(
        actor_critic_kernel,
        grid=(B,),
        in_specs=in_specs,
        out_specs=out_specs,
        out_shape=(
            jax.ShapeDtypeStruct((B, 1, N_STEP), jnp.int32),
            jax.ShapeDtypeStruct((B, 1, N_STEP), jnp.float32),
        ),
        compiler_params=pltpu.CompilerParams(
            dimension_semantics=("parallel",)),
    )(enc_art, *weight_args)
    return idxs.reshape(B, N_STEP), scores.reshape(B, N_STEP)


# ------------------------- deterministic parameter init ------------------------
def init_ptr_net_params(key):
    ks = jax.random.split(key, 12)
    u = lambda k, shape, s=0.1: jax.random.uniform(k, shape, jnp.float32, -s, s)
    return dict(
        attn_wm=u(ks[0], (D_IN, N_HID)),
        attn_wq=u(ks[1], (N_HID, N_HID)),
        attn_v=u(ks[2], (1, N_HID)),          # _attn_v as a row vector
        hop_wm=u(ks[3], (D_IN, N_HID)),
        hop_wq=u(ks[4], (N_HID, N_HID)),
        hop_v=u(ks[5], (1, N_HID)),
        w_ih=u(ks[6], (D_IN, 4 * N_HID)),     # LSTMCell weight_ih, pre-transposed
        w_hh=u(ks[7], (N_HID, 4 * N_HID)),    # LSTMCell weight_hh, pre-transposed
        b=u(ks[8], (1, 4 * N_HID)),           # b_ih + b_hh folded into one bias
        init_h=u(ks[9], (N_LAYER, N_HID)),
        init_c=u(ks[10], (N_LAYER, N_HID)),
        init_i=u(ks[11], (1, D_IN)),
    )


def init_actor_critic_params(key):
    """PtrExtractorRLStop and PtrScorer clone the SAME pointer net's weights at
    construction -> separate (but initially identical) parameter sets."""
    k_ptr, k1, k2 = jax.random.split(key, 3)
    base = init_ptr_net_params(k_ptr)
    actor = dict(base)
    critic = dict(base)
    critic["w_sl"] = jax.random.uniform(k1, (1, D_IN), jnp.float32, -0.1, 0.1)
    critic["b_sl"] = jax.random.uniform(k2, (1, 1), jnp.float32, -0.1, 0.1)
    return actor, critic


def pack_params(actor, critic):
    """Host-side packing: fuse all input-side projections into one weight and
    precompute everything that is constant along the recurrence."""
    w_cat = jnp.concatenate([
        actor["w_ih"], critic["w_ih"],            # gate projections (hoisted x@w_ih)
        actor["attn_wm"], actor["hop_wm"],
        critic["attn_wm"], critic["hop_wm"],
        critic["w_sl"].T,                         # critic score projection
    ], axis=1)                                    # [D_IN, CATW]
    assert w_cat.shape == (D_IN, CATW)
    return dict(
        w_cat=w_cat,
        a_attn_wq=actor["attn_wq"], a_attn_v=actor["attn_v"],
        a_hop_wq=actor["hop_wq"], a_hop_v=actor["hop_v"],
        a_whh=actor["w_hh"], a_b=actor["b"],
        a_gx0=actor["init_i"] @ actor["w_ih"],                    # [1,4H]
        a_h0=actor["init_h"], a_c0=actor["init_c"],
        c_attn_wq=critic["attn_wq"], c_attn_v=critic["attn_v"],
        c_hop_wq=critic["hop_wq"], c_hop_v=critic["hop_v"],
        c_hg=critic["init_h"] @ critic["w_hh"] + critic["b"],     # [1,4H] constant
        c_gx0=critic["init_i"] @ critic["w_ih"],                  # [1,4H]
        c_c0=critic["init_c"],
        b_sl=critic["b_sl"],
    )


if __name__ == "__main__":
    assert N_LAYER == 1
    key = jax.random.PRNGKey(0)
    k_param, k_data = jax.random.split(key)
    actor_p, critic_p = init_actor_critic_params(k_param)
    packed = pack_params(actor_p, critic_p)
    # enc_art: output of the shared sentence+article encoder, batched articles.
    enc_art = jax.random.normal(k_data, (BATCH, N_SENTS, D_IN), jnp.float32)

    idxs, scores = actor_critic_forward(enc_art, packed)
    jax.block_until_ready((idxs, scores))
    print("KERNEL_OK")
</pallas_src>

<mosaic_0001>
module attributes {stable_mosaic.version = 11 : i64} {
  func.func @actor_critic_kernel(%arg0: i32, %arg1: memref<1x8x32xf32, #tpu.memory_space<vmem>>, %arg2: memref<32x385xf32, #tpu.memory_space<vmem>>, %arg3: memref<32x32xf32, #tpu.memory_space<vmem>>, %arg4: memref<1x32xf32, #tpu.memory_space<vmem>>, %arg5: memref<32x32xf32, #tpu.memory_space<vmem>>, %arg6: memref<1x32xf32, #tpu.memory_space<vmem>>, %arg7: memref<32x128xf32, #tpu.memory_space<vmem>>, %arg8: memref<1x128xf32, #tpu.memory_space<vmem>>, %arg9: memref<1x128xf32, #tpu.memory_space<vmem>>, %arg10: memref<1x32xf32, #tpu.memory_space<vmem>>, %arg11: memref<1x32xf32, #tpu.memory_space<vmem>>, %arg12: memref<32x32xf32, #tpu.memory_space<vmem>>, %arg13: memref<1x32xf32, #tpu.memory_space<vmem>>, %arg14: memref<32x32xf32, #tpu.memory_space<vmem>>, %arg15: memref<1x32xf32, #tpu.memory_space<vmem>>, %arg16: memref<1x128xf32, #tpu.memory_space<vmem>>, %arg17: memref<1x128xf32, #tpu.memory_space<vmem>>, %arg18: memref<1x32xf32, #tpu.memory_space<vmem>>, %arg19: memref<1x1xf32, #tpu.memory_space<vmem>>, %arg20: memref<1x1x4xi32, #tpu.memory_space<vmem>>, %arg21: memref<1x1x4xf32, #tpu.memory_space<vmem>>) attributes {dimension_semantics = [#tpu.dimension_semantics<parallel>], iteration_bounds = array<i64: 8>, scalar_prefetch = 0 : i64, scratch_operands = 0 : i64, tpu.core_type = #tpu.core_type<tc>, window_params = [{transform_indices = @transform_0, window_bounds = array<i64: 1, 8, 32>}, {pipeline_mode = #tpu.pipeline_mode<synchronous>, transform_indices = @transform_1, window_bounds = array<i64: 32, 385>}, {pipeline_mode = #tpu.pipeline_mode<synchronous>, transform_indices = @transform_2, window_bounds = array<i64: 32, 32>}, {pipeline_mode = #tpu.pipeline_mode<synchronous>, transform_indices = @transform_3, window_bounds = array<i64: 1, 32>}, {pipeline_mode = #tpu.pipeline_mode<synchronous>, transform_indices = @transform_4, window_bounds = array<i64: 32, 32>}, {pipeline_mode = #tpu.pipeline_mode<synchronous>, transform_indices = @transform_5, window_bounds = array<i64: 1, 32>}, {pipeline_mode = #tpu.pipeline_mode<synchronous>, transform_indices = @transform_6, window_bounds = array<i64: 32, 128>}, {pipeline_mode = #tpu.pipeline_mode<synchronous>, transform_indices = @transform_7, window_bounds = array<i64: 1, 128>}, {pipeline_mode = #tpu.pipeline_mode<synchronous>, transform_indices = @transform_8, window_bounds = array<i64: 1, 128>}, {pipeline_mode = #tpu.pipeline_mode<synchronous>, transform_indices = @transform_9, window_bounds = array<i64: 1, 32>}, {pipeline_mode = #tpu.pipeline_mode<synchronous>, transform_indices = @transform_10, window_bounds = array<i64: 1, 32>}, {pipeline_mode = #tpu.pipeline_mode<synchronous>, transform_indices = @transform_11, window_bounds = array<i64: 32, 32>}, {pipeline_mode = #tpu.pipeline_mode<synchronous>, transform_indices = @transform_12, window_bounds = array<i64: 1, 32>}, {pipeline_mode = #tpu.pipeline_mode<synchronous>, transform_indices = @transform_13, window_bounds = array<i64: 32, 32>}, {pipeline_mode = #tpu.pipeline_mode<synchronous>, transform_indices = @transform_14, window_bounds = array<i64: 1, 32>}, {pipeline_mode = #tpu.pipeline_mode<synchronous>, transform_indices = @transform_15, window_bounds = array<i64: 1, 128>}, {pipeline_mode = #tpu.pipeline_mode<synchronous>, transform_indices = @transform_16, window_bounds = array<i64: 1, 128>}, {pipeline_mode = #tpu.pipeline_mode<synchronous>, transform_indices = @transform_17, window_bounds = array<i64: 1, 32>}, {pipeline_mode = #tpu.pipeline_mode<synchronous>, transform_indices = @transform_18, window_bounds = array<i64: 1, 1>}, {transform_indices = @transform_19, window_bounds = array<i64: 1, 1, 4>}, {transform_indices = @transform_20, window_bounds = array<i64: 1, 1, 4>}]} {
    %c0 = arith.constant 0 : index
    %c0_0 = arith.constant 0 : index
    %c0_1 = arith.constant 0 : index
    %0 = vector.load %arg1[%c0, %c0_0, %c0_1] : memref<1x8x32xf32, #tpu.memory_space<vmem>>, vector<1x8x32xf32>
    %1 = vector.shape_cast %0 : vector<1x8x32xf32> to vector<8x32xf32>
    %c0_2 = arith.constant 0 : index
    %c0_3 = arith.constant 0 : index
    %2 = vector.load %arg2[%c0_2, %c0_3] : memref<32x385xf32, #tpu.memory_space<vmem>>, vector<32x385xf32>
    %cst = arith.constant dense<0.000000e+00> : vector<8x385xf32>
    %3 = tpu.matmul %1, %2, %cst {dimension_numbers = #tpu.dot_dimension_numbers<[1], [0], [0], [1], [0, 0, 1, 1], [], []>} : vector<8x32xf32>, vector<32x385xf32>, vector<8x385xf32> -> vector<8x385xf32>
    %4 = vector.extract_strided_slice %3 {offsets = [0, 0], sizes = [8, 128], strides = [1, 1]} : vector<8x385xf32> to vector<8x128xf32>
    %5 = vector.extract_strided_slice %3 {offsets = [0, 128], sizes = [8, 128], strides = [1, 1]} : vector<8x385xf32> to vector<8x128xf32>
    %6 = vector.extract_strided_slice %3 {offsets = [0, 256], sizes = [8, 32], strides = [1, 1]} : vector<8x385xf32> to vector<8x32xf32>
    %7 = vector.extract_strided_slice %3 {offsets = [0, 288], sizes = [8, 32], strides = [1, 1]} : vector<8x385xf32> to vector<8x32xf32>
    %8 = vector.extract_strided_slice %3 {offsets = [0, 320], sizes = [8, 32], strides = [1, 1]} : vector<8x385xf32> to vector<8x32xf32>
    %9 = vector.extract_strided_slice %3 {offsets = [0, 352], sizes = [8, 32], strides = [1, 1]} : vector<8x385xf32> to vector<8x32xf32>
    %10 = vector.extract_strided_slice %3 {offsets = [0, 384], sizes = [8, 1], strides = [1, 1]} : vector<8x385xf32> to vector<8x1xf32>
    %11 = tpu.iota {dimensions = array<i32: 0>} : vector<8x1xi32>
    %12 = tpu.iota {dimensions = array<i32: 1>} : vector<1x4xi32>
    %c0_4 = arith.constant 0 : index
    %c0_5 = arith.constant 0 : index
    %13 = vector.load %arg3[%c0_4, %c0_5] : memref<32x32xf32, #tpu.memory_space<vmem>>, vector<32x32xf32>
    %c0_6 = arith.constant 0 : index
    %c0_7 = arith.constant 0 : index
    %14 = vector.load %arg4[%c0_6, %c0_7] : memref<1x32xf32, #tpu.memory_space<vmem>>, vector<1x32xf32>
    %c0_8 = arith.constant 0 : index
    %c0_9 = arith.constant 0 : index
    %15 = vector.load %arg5[%c0_8, %c0_9] : memref<32x32xf32, #tpu.memory_space<vmem>>, vector<32x32xf32>
    %c0_10 = arith.constant 0 : index
    %c0_11 = arith.constant 0 : index
    %16 = vector.load %arg6[%c0_10, %c0_11] : memref<1x32xf32, #tpu.memory_space<vmem>>, vector<1x32xf32>
    %c0_12 = arith.constant 0 : index
    %c0_13 = arith.constant 0 : index
    %17 = vector.load %arg7[%c0_12, %c0_13] : memref<32x128xf32, #tpu.memory_space<vmem>>, vector<32x128xf32>
    %c0_14 = arith.constant 0 : index
    %c0_15 = arith.constant 0 : index
    %18 = vector.load %arg8[%c0_14, %c0_15] : memref<1x128xf32, #tpu.memory_space<vmem>>, vector<1x128xf32>
    %c0_16 = arith.constant 0 : index
    %c0_17 = arith.constant 0 : index
    %19 = vector.load %arg10[%c0_16, %c0_17] : memref<1x32xf32, #tpu.memory_space<vmem>>, vector<1x32xf32>
    %c0_18 = arith.constant 0 : index
    %c0_19 = arith.constant 0 : index
    %20 = vector.load %arg11[%c0_18, %c0_19] : memref<1x32xf32, #tpu.memory_space<vmem>>, vector<1x32xf32>
    %c0_20 = arith.constant 0 : index
    %c0_21 = arith.constant 0 : index
    %21 = vector.load %arg9[%c0_20, %c0_21] : memref<1x128xf32, #tpu.memory_space<vmem>>, vector<1x128xf32>
    %cst_22 = arith.constant 0.000000e+00 : f32
    %22 = vector.broadcast %cst_22 : f32 to vector<8x1xf32>
    %c0_i32 = arith.constant 0 : i32
    %23 = vector.broadcast %c0_i32 : i32 to vector<1x4xi32>
    %cst_23 = arith.constant dense<0.000000e+00> : vector<1x128xf32>
    %24 = tpu.matmul %19, %17, %cst_23 {dimension_numbers = #tpu.dot_dimension_numbers<[1], [0], [0], [1], [0, 0, 1, 1], [], []>} : vector<1x32xf32>, vector<32x128xf32>, vector<1x128xf32> -> vector<1x128xf32>
    %25 = arith.addf %21, %24 : vector<1x128xf32>
    %26 = arith.addf %25, %18 : vector<1x128xf32>
    %27 = vector.extract_strided_slice %26 {offsets = [0, 0], sizes = [1, 32], strides = [1, 1]} : vector<1x128xf32> to vector<1x32xf32>
    %28 = arith.negf %27 : vector<1x32xf32>
    %29 = math.exp %28 : vector<1x32xf32>
    %cst_24 = arith.constant 1.000000e+00 : f32
    %30 = vector.broadcast %cst_24 : f32 to vector<1x32xf32>
    %31 = arith.addf %30, %29 : vector<1x32xf32>
    %32 = arith.divf %30, %31 : vector<1x32xf32>
    %33 = vector.extract_strided_slice %26 {offsets = [0, 32], sizes = [1, 32], strides = [1, 1]} : vector<1x128xf32> to vector<1x32xf32>
    %34 = arith.negf %33 : vector<1x32xf32>
    %35 = math.exp %34 : vector<1x32xf32>
    %cst_25 = arith.constant 1.000000e+00 : f32
    %36 = vector.broadcast %cst_25 : f32 to vector<1x32xf32>
    %37 = arith.addf %36, %35 : vector<1x32xf32>
    %38 = arith.divf %36, %37 : vector<1x32xf32>
    %39 = vector.extract_strided_slice %26 {offsets = [0, 64], sizes = [1, 32], strides = [1, 1]} : vector<1x128xf32> to vector<1x32xf32>
    %40 = math.tanh %39 : vector<1x32xf32>
    %41 = vector.extract_strided_slice %26 {offsets = [0, 96], sizes = [1, 32], strides = [1, 1]} : vector<1x128xf32> to vector<1x32xf32>
    %42 = arith.negf %41 : vector<1x32xf32>
    %43 = math.exp %42 : vector<1x32xf32>
    %cst_26 = arith.constant 1.000000e+00 : f32
    %44 = vector.broadcast %cst_26 : f32 to vector<1x32xf32>
    %45 = arith.addf %44, %43 : vector<1x32xf32>
    %46 = arith.divf %44, %45 : vector<1x32xf32>
    %47 = arith.mulf %38, %20 : vector<1x32xf32>
    %48 = arith.mulf %32, %40 : vector<1x32xf32>
    %49 = arith.addf %47, %48 : vector<1x32xf32>
    %50 = math.tanh %49 : vector<1x32xf32>
    %51 = arith.mulf %46, %50 : vector<1x32xf32>
    %cst_27 = arith.constant dense<0.000000e+00> : vector<1x32xf32>
    %52 = tpu.matmul %51, %15, %cst_27 {dimension_numbers = #tpu.dot_dimension_numbers<[1], [0], [0], [1], [0, 0, 1, 1], [], []>} : vector<1x32xf32>, vector<32x32xf32>, vector<1x32xf32> -> vector<1x32xf32>
    %53 = vector.broadcast %52 : vector<1x32xf32> to vector<8x32xf32>
    %54 = arith.addf %7, %53 : vector<8x32xf32>
    %55 = math.tanh %54 : vector<8x32xf32>
    %56 = vector.broadcast %16 : vector<1x32xf32> to vector<8x32xf32>
    %57 = arith.mulf %55, %56 : vector<8x32xf32>
    %cst_28 = arith.constant dense<0.000000e+00> : vector<8xf32>
    %58 = vector.multi_reduction <add>, %57, %cst_28 [1] : vector<8x32xf32> to vector<8xf32>
    %59 = vector.shape_cast %58 : vector<8xf32> to vector<8x1xf32>
    %cst_29 = arith.constant dense<0xFF800000> : vector<1xf32>
    %60 = vector.multi_reduction <maximumf>, %59, %cst_29 [0] : vector<8x1xf32> to vector<1xf32>
    %61 = vector.shape_cast %60 : vector<1xf32> to vector<1x1xf32>
    %62 = vector.broadcast %61 : vector<1x1xf32> to vector<8x1xf32>
    %63 = arith.subf %59, %62 : vector<8x1xf32>
    %64 = math.exp %63 : vector<8x1xf32>
    %cst_30 = arith.constant dense<0.000000e+00> : vector<1xf32>
    %65 = vector.multi_reduction <add>, %64, %cst_30 [0] : vector<8x1xf32> to vector<1xf32>
    %66 = vector.shape_cast %65 : vector<1xf32> to vector<1x1xf32>
    %67 = vector.broadcast %66 : vector<1x1xf32> to vector<8x1xf32>
    %68 = arith.divf %64, %67 : vector<8x1xf32>
    %69 = vector.broadcast %68 : vector<8x1xf32> to vector<8x32xf32>
    %70 = arith.mulf %69, %7 : vector<8x32xf32>
    %cst_31 = arith.constant dense<0.000000e+00> : vector<32xf32>
    %71 = vector.multi_reduction <add>, %70, %cst_31 [0] : vector<8x32xf32> to vector<32xf32>
    %72 = vector.shape_cast %71 : vector<32xf32> to vector<1x32xf32>
    %cst_32 = arith.constant dense<0.000000e+00> : vector<1x32xf32>
    %73 = tpu.matmul %72, %13, %cst_32 {dimension_numbers = #tpu.dot_dimension_numbers<[1], [0], [0], [1], [0, 0, 1, 1], [], []>} : vector<1x32xf32>, vector<32x32xf32>, vector<1x32xf32> -> vector<1x32xf32>
    %74 = vector.broadcast %73 : vector<1x32xf32> to vector<8x32xf32>
    %75 = arith.addf %6, %74 : vector<8x32xf32>
    %76 = math.tanh %75 : vector<8x32xf32>
    %77 = vector.broadcast %14 : vector<1x32xf32> to vector<8x32xf32>
    %78 = arith.mulf %76, %77 : vector<8x32xf32>
    %cst_33 = arith.constant dense<0.000000e+00> : vector<8xf32>
    %79 = vector.multi_reduction <add>, %78, %cst_33 [1] : vector<8x32xf32> to vector<8xf32>
    %80 = vector.shape_cast %79 : vector<8xf32> to vector<8x1xf32>
    %cst_34 = arith.constant 0.000000e+00 : f32
    %81 = vector.broadcast %cst_34 : f32 to vector<8x1xf32>
    %82 = arith.cmpf ogt, %22, %81 : vector<8x1xf32>
    %cst_35 = arith.constant -9.99999984E+17 : f32
    %83 = vector.broadcast %cst_35 : f32 to vector<8x1xf32>
    %84 = arith.select %82, %83, %80 : vector<8x1xi1>, vector<8x1xf32>
    %cst_36 = arith.constant dense<0xFF800000> : vector<1xf32>
    %85 = vector.multi_reduction <maximumf>, %84, %cst_36 [0] : vector<8x1xf32> to vector<1xf32>
    %86 = vector.shape_cast %85 : vector<1xf32> to vector<1x1xf32>
    %87 = vector.broadcast %86 : vector<1x1xf32> to vector<8x1xf32>
    %88 = arith.cmpf oge, %84, %87 : vector<8x1xf32>
    %c8_i32 = arith.constant 8 : i32
    %89 = vector.broadcast %c8_i32 : i32 to vector<8x1xi32>
    %90 = arith.select %88, %11, %89 : vector<8x1xi1>, vector<8x1xi32>
    %cst_37 = arith.constant dense<2147483647> : vector<1xi32>
    %91 = vector.multi_reduction <minsi>, %90, %cst_37 [0] : vector<8x1xi32> to vector<1xi32>
    %92 = vector.shape_cast %91 : vector<1xi32> to vector<1x1xi32>
    %93 = vector.broadcast %92 : vector<1x1xi32> to vector<8x1xi32>
    %94 = arith.cmpi eq, %11, %93 : vector<8x1xi32>
    %c0_i32_38 = arith.constant 0 : i32
    %95 = vector.broadcast %c0_i32_38 : i32 to vector<1x4xi32>
    %96 = arith.cmpi eq, %12, %95 : vector<1x4xi32>
    %97 = vector.shape_cast %92 : vector<1x1xi32> to vector<1x1xi32>
    %98 = vector.broadcast %97 : vector<1x1xi32> to vector<1x4xi32>
    %99 = arith.select %96, %98, %23 : vector<1x4xi1>, vector<1x4xi32>
    %cst_39 = arith.constant 1.000000e+00 : f32
    %100 = vector.broadcast %cst_39 : f32 to vector<8x1xf32>
    %101 = arith.select %94, %100, %22 : vector<8x1xi1>, vector<8x1xf32>
    %cst_40 = arith.constant 0.000000e+00 : f32
    %102 = vector.shape_cast %94 : vector<8x1xi1> to vector<8x1xi1>
    %103 = vector.broadcast %102 : vector<8x1xi1> to vector<8x128xi1>
    %104 = vector.broadcast %cst_40 : f32 to vector<8x128xf32>
    %105 = arith.select %103, %4, %104 : vector<8x128xi1>, vector<8x128xf32>
    %cst_41 = arith.constant dense<0.000000e+00> : vector<128xf32>
    %106 = vector.multi_reduction <add>, %105, %cst_41 [0] : vector<8x128xf32> to vector<128xf32>
    %107 = vector.shape_cast %106 : vector<128xf32> to vector<1x128xf32>
    %cst_42 = arith.constant dense<0.000000e+00> : vector<1x128xf32>
    %108 = tpu.matmul %51, %17, %cst_42 {dimension_numbers = #tpu.dot_dimension_numbers<[1], [0], [0], [1], [0, 0, 1, 1], [], []>} : vector<1x32xf32>, vector<32x128xf32>, vector<1x128xf32> -> vector<1x128xf32>
    %109 = arith.addf %107, %108 : vector<1x128xf32>
    %110 = arith.addf %109, %18 : vector<1x128xf32>
    %111 = vector.extract_strided_slice %110 {offsets = [0, 0], sizes = [1, 32], strides = [1, 1]} : vector<1x128xf32> to vector<1x32xf32>
    %112 = arith.negf %111 : vector<1x32xf32>
    %113 = math.exp %112 : vector<1x32xf32>
    %cst_43 = arith.constant 1.000000e+00 : f32
    %114 = vector.broadcast %cst_43 : f32 to vector<1x32xf32>
    %115 = arith.addf %114, %113 : vector<1x32xf32>
    %116 = arith.divf %114, %115 : vector<1x32xf32>
    %117 = vector.extract_strided_slice %110 {offsets = [0, 32], sizes = [1, 32], strides = [1, 1]} : vector<1x128xf32> to vector<1x32xf32>
    %118 = arith.negf %117 : vector<1x32xf32>
    %119 = math.exp %118 : vector<1x32xf32>
    %cst_44 = arith.constant 1.000000e+00 : f32
    %120 = vector.broadcast %cst_44 : f32 to vector<1x32xf32>
    %121 = arith.addf %120, %119 : vector<1x32xf32>
    %122 = arith.divf %120, %121 : vector<1x32xf32>
    %123 = vector.extract_strided_slice %110 {offsets = [0, 64], sizes = [1, 32], strides = [1, 1]} : vector<1x128xf32> to vector<1x32xf32>
    %124 = math.tanh %123 : vector<1x32xf32>
    %125 = vector.extract_strided_slice %110 {offsets = [0, 96], sizes = [1, 32], strides = [1, 1]} : vector<1x128xf32> to vector<1x32xf32>
    %126 = arith.negf %125 : vector<1x32xf32>
    %127 = math.exp %126 : vector<1x32xf32>
    %cst_45 = arith.constant 1.000000e+00 : f32
    %128 = vector.broadcast %cst_45 : f32 to vector<1x32xf32>
    %129 = arith.addf %128, %127 : vector<1x32xf32>
    %130 = arith.divf %128, %129 : vector<1x32xf32>
    %131 = arith.mulf %122, %49 : vector<1x32xf32>
    %132 = arith.mulf %116, %124 : vector<1x32xf32>
    %133 = arith.addf %131, %132 : vector<1x32xf32>
    %134 = math.tanh %133 : vector<1x32xf32>
    %135 = arith.mulf %130, %134 : vector<1x32xf32>
    %cst_46 = arith.constant dense<0.000000e+00> : vector<1x32xf32>
    %136 = tpu.matmul %135, %15, %cst_46 {dimension_numbers = #tpu.dot_dimension_numbers<[1], [0], [0], [1], [0, 0, 1, 1], [], []>} : vector<1x32xf32>, vector<32x32xf32>, vector<1x32xf32> -> vector<1x32xf32>
    %137 = vector.broadcast %136 : vector<1x32xf32> to vector<8x32xf32>
    %138 = arith.addf %7, %137 : vector<8x32xf32>
    %139 = math.tanh %138 : vector<8x32xf32>
    %140 = vector.broadcast %16 : vector<1x32xf32> to vector<8x32xf32>
    %141 = arith.mulf %139, %140 : vector<8x32xf32>
    %cst_47 = arith.constant dense<0.000000e+00> : vector<8xf32>
    %142 = vector.multi_reduction <add>, %141, %cst_47 [1] : vector<8x32xf32> to vector<8xf32>
    %143 = vector.shape_cast %142 : vector<8xf32> to vector<8x1xf32>
    %cst_48 = arith.constant dense<0xFF800000> : vector<1xf32>
    %144 = vector.multi_reduction <maximumf>, %143, %cst_48 [0] : vector<8x1xf32> to vector<1xf32>
    %145 = vector.shape_cast %144 : vector<1xf32> to vector<1x1xf32>
    %146 = vector.broadcast %145 : vector<1x1xf32> to vector<8x1xf32>
    %147 = arith.subf %143, %146 : vector<8x1xf32>
    %148 = math.exp %147 : vector<8x1xf32>
    %cst_49 = arith.constant dense<0.000000e+00> : vector<1xf32>
    %149 = vector.multi_reduction <add>, %148, %cst_49 [0] : vector<8x1xf32> to vector<1xf32>
    %150 = vector.shape_cast %149 : vector<1xf32> to vector<1x1xf32>
    %151 = vector.broadcast %150 : vector<1x1xf32> to vector<8x1xf32>
    %152 = arith.divf %148, %151 : vector<8x1xf32>
    %153 = vector.broadcast %152 : vector<8x1xf32> to vector<8x32xf32>
    %154 = arith.mulf %153, %7 : vector<8x32xf32>
    %cst_50 = arith.constant dense<0.000000e+00> : vector<32xf32>
    %155 = vector.multi_reduction <add>, %154, %cst_50 [0] : vector<8x32xf32> to vector<32xf32>
    %156 = vector.shape_cast %155 : vector<32xf32> to vector<1x32xf32>
    %cst_51 = arith.constant dense<0.000000e+00> : vector<1x32xf32>
    %157 = tpu.matmul %156, %13, %cst_51 {dimension_numbers = #tpu.dot_dimension_numbers<[1], [0], [0], [1], [0, 0, 1, 1], [], []>} : vector<1x32xf32>, vector<32x32xf32>, vector<1x32xf32> -> vector<1x32xf32>
    %158 = vector.broadcast %157 : vector<1x32xf32> to vector<8x32xf32>
    %159 = arith.addf %6, %158 : vector<8x32xf32>
    %160 = math.tanh %159 : vector<8x32xf32>
    %161 = vector.broadcast %14 : vector<1x32xf32> to vector<8x32xf32>
    %162 = arith.mulf %160, %161 : vector<8x32xf32>
    %cst_52 = arith.constant dense<0.000000e+00> : vector<8xf32>
    %163 = vector.multi_reduction <add>, %162, %cst_52 [1] : vector<8x32xf32> to vector<8xf32>
    %164 = vector.shape_cast %163 : vector<8xf32> to vector<8x1xf32>
    %cst_53 = arith.constant 0.000000e+00 : f32
    %165 = vector.broadcast %cst_53 : f32 to vector<8x1xf32>
    %166 = arith.cmpf ogt, %101, %165 : vector<8x1xf32>
    %cst_54 = arith.constant -9.99999984E+17 : f32
    %167 = vector.broadcast %cst_54 : f32 to vector<8x1xf32>
    %168 = arith.select %166, %167, %164 : vector<8x1xi1>, vector<8x1xf32>
    %cst_55 = arith.constant dense<0xFF800000> : vector<1xf32>
    %169 = vector.multi_reduction <maximumf>, %168, %cst_55 [0] : vector<8x1xf32> to vector<1xf32>
    %170 = vector.shape_cast %169 : vector<1xf32> to vector<1x1xf32>
    %171 = vector.broadcast %170 : vector<1x1xf32> to vector<8x1xf32>
    %172 = arith.cmpf oge, %168, %171 : vector<8x1xf32>
    %c8_i32_56 = arith.constant 8 : i32
    %173 = vector.broadcast %c8_i32_56 : i32 to vector<8x1xi32>
    %174 = arith.select %172, %11, %173 : vector<8x1xi1>, vector<8x1xi32>
    %cst_57 = arith.constant dense<2147483647> : vector<1xi32>
    %175 = vector.multi_reduction <minsi>, %174, %cst_57 [0] : vector<8x1xi32> to vector<1xi32>
    %176 = vector.shape_cast %175 : vector<1xi32> to vector<1x1xi32>
    %177 = vector.broadcast %176 : vector<1x1xi32> to vector<8x1xi32>
    %178 = arith.cmpi eq, %11, %177 : vector<8x1xi32>
    %c1_i32 = arith.constant 1 : i32
    %179 = vector.broadcast %c1_i32 : i32 to vector<1x4xi32>
    %180 = arith.cmpi eq, %12, %179 : vector<1x4xi32>
    %181 = vector.shape_cast %176 : vector<1x1xi32> to vector<1x1xi32>
    %182 = vector.broadcast %181 : vector<1x1xi32> to vector<1x4xi32>
    %183 = arith.select %180, %182, %99 : vector<1x4xi1>, vector<1x4xi32>
    %cst_58 = arith.constant 1.000000e+00 : f32
    %184 = vector.broadcast %cst_58 : f32 to vector<8x1xf32>
    %185 = arith.select %178, %184, %101 : vector<8x1xi1>, vector<8x1xf32>
    %cst_59 = arith.constant 0.000000e+00 : f32
    %186 = vector.shape_cast %178 : vector<8x1xi1> to vector<8x1xi1>
    %187 = vector.broadcast %186 : vector<8x1xi1> to vector<8x128xi1>
    %188 = vector.broadcast %cst_59 : f32 to vector<8x128xf32>
    %189 = arith.select %187, %4, %188 : vector<8x128xi1>, vector<8x128xf32>
    %cst_60 = arith.constant dense<0.000000e+00> : vector<128xf32>
    %190 = vector.multi_reduction <add>, %189, %cst_60 [0] : vector<8x128xf32> to vector<128xf32>
    %191 = vector.shape_cast %190 : vector<128xf32> to vector<1x128xf32>
    %cst_61 = arith.constant dense<0.000000e+00> : vector<1x128xf32>
    %192 = tpu.matmul %135, %17, %cst_61 {dimension_numbers = #tpu.dot_dimension_numbers<[1], [0], [0], [1], [0, 0, 1, 1], [], []>} : vector<1x32xf32>, vector<32x128xf32>, vector<1x128xf32> -> vector<1x128xf32>
    %193 = arith.addf %191, %192 : vector<1x128xf32>
    %194 = arith.addf %193, %18 : vector<1x128xf32>
    %195 = vector.extract_strided_slice %194 {offsets = [0, 0], sizes = [1, 32], strides = [1, 1]} : vector<1x128xf32> to vector<1x32xf32>
    %196 = arith.negf %195 : vector<1x32xf32>
    %197 = math.exp %196 : vector<1x32xf32>
    %cst_62 = arith.constant 1.000000e+00 : f32
    %198 = vector.broadcast %cst_62 : f32 to vector<1x32xf32>
    %199 = arith.addf %198, %197 : vector<1x32xf32>
    %200 = arith.divf %198, %199 : vector<1x32xf32>
    %201 = vector.extract_strided_slice %194 {offsets = [0, 32], sizes = [1, 32], strides = [1, 1]} : vector<1x128xf32> to vector<1x32xf32>
    %202 = arith.negf %201 : vector<1x32xf32>
    %203 = math.exp %202 : vector<1x32xf32>
    %cst_63 = arith.constant 1.000000e+00 : f32
    %204 = vector.broadcast %cst_63 : f32 to vector<1x32xf32>
    %205 = arith.addf %204, %203 : vector<1x32xf32>
    %206 = arith.divf %204, %205 : vector<1x32xf32>
    %207 = vector.extract_strided_slice %194 {offsets = [0, 64], sizes = [1, 32], strides = [1, 1]} : vector<1x128xf32> to vector<1x32xf32>
    %208 = math.tanh %207 : vector<1x32xf32>
    %209 = vector.extract_strided_slice %194 {offsets = [0, 96], sizes = [1, 32], strides = [1, 1]} : vector<1x128xf32> to vector<1x32xf32>
    %210 = arith.negf %209 : vector<1x32xf32>
    %211 = math.exp %210 : vector<1x32xf32>
    %cst_64 = arith.constant 1.000000e+00 : f32
    %212 = vector.broadcast %cst_64 : f32 to vector<1x32xf32>
    %213 = arith.addf %212, %211 : vector<1x32xf32>
    %214 = arith.divf %212, %213 : vector<1x32xf32>
    %215 = arith.mulf %206, %133 : vector<1x32xf32>
    %216 = arith.mulf %200, %208 : vector<1x32xf32>
    %217 = arith.addf %215, %216 : vector<1x32xf32>
    %218 = math.tanh %217 : vector<1x32xf32>
    %219 = arith.mulf %214, %218 : vector<1x32xf32>
    %cst_65 = arith.constant dense<0.000000e+00> : vector<1x32xf32>
    %220 = tpu.matmul %219, %15, %cst_65 {dimension_numbers = #tpu.dot_dimension_numbers<[1], [0], [0], [1], [0, 0, 1, 1], [], []>} : vector<1x32xf32>, vector<32x32xf32>, vector<1x32xf32> -> vector<1x32xf32>
    %221 = vector.broadcast %220 : vector<1x32xf32> to vector<8x32xf32>
    %222 = arith.addf %7, %221 : vector<8x32xf32>
    %223 = math.tanh %222 : vector<8x32xf32>
    %224 = vector.broadcast %16 : vector<1x32xf32> to vector<8x32xf32>
    %225 = arith.mulf %223, %224 : vector<8x32xf32>
    %cst_66 = arith.constant dense<0.000000e+00> : vector<8xf32>
    %226 = vector.multi_reduction <add>, %225, %cst_66 [1] : vector<8x32xf32> to vector<8xf32>
    %227 = vector.shape_cast %226 : vector<8xf32> to vector<8x1xf32>
    %cst_67 = arith.constant dense<0xFF800000> : vector<1xf32>
    %228 = vector.multi_reduction <maximumf>, %227, %cst_67 [0] : vector<8x1xf32> to vector<1xf32>
    %229 = vector.shape_cast %228 : vector<1xf32> to vector<1x1xf32>
    %230 = vector.broadcast %229 : vector<1x1xf32> to vector<8x1xf32>
    %231 = arith.subf %227, %230 : vector<8x1xf32>
    %232 = math.exp %231 : vector<8x1xf32>
    %cst_68 = arith.constant dense<0.000000e+00> : vector<1xf32>
    %233 = vector.multi_reduction <add>, %232, %cst_68 [0] : vector<8x1xf32> to vector<1xf32>
    %234 = vector.shape_cast %233 : vector<1xf32> to vector<1x1xf32>
    %235 = vector.broadcast %234 : vector<1x1xf32> to vector<8x1xf32>
    %236 = arith.divf %232, %235 : vector<8x1xf32>
    %237 = vector.broadcast %236 : vector<8x1xf32> to vector<8x32xf32>
    %238 = arith.mulf %237, %7 : vector<8x32xf32>
    %cst_69 = arith.constant dense<0.000000e+00> : vector<32xf32>
    %239 = vector.multi_reduction <add>, %238, %cst_69 [0] : vector<8x32xf32> to vector<32xf32>
    %240 = vector.shape_cast %239 : vector<32xf32> to vector<1x32xf32>
    %cst_70 = arith.constant dense<0.000000e+00> : vector<1x32xf32>
    %241 = tpu.matmul %240, %13, %cst_70 {dimension_numbers = #tpu.dot_dimension_numbers<[1], [0], [0], [1], [0, 0, 1, 1], [], []>} : vector<1x32xf32>, vector<32x32xf32>, vector<1x32xf32> -> vector<1x32xf32>
    %242 = vector.broadcast %241 : vector<1x32xf32> to vector<8x32xf32>
    %243 = arith.addf %6, %242 : vector<8x32xf32>
    %244 = math.tanh %243 : vector<8x32xf32>
    %245 = vector.broadcast %14 : vector<1x32xf32> to vector<8x32xf32>
    %246 = arith.mulf %244, %245 : vector<8x32xf32>
    %cst_71 = arith.constant dense<0.000000e+00> : vector<8xf32>
    %247 = vector.multi_reduction <add>, %246, %cst_71 [1] : vector<8x32xf32> to vector<8xf32>
    %248 = vector.shape_cast %247 : vector<8xf32> to vector<8x1xf32>
    %cst_72 = arith.constant 0.000000e+00 : f32
    %249 = vector.broadcast %cst_72 : f32 to vector<8x1xf32>
    %250 = arith.cmpf ogt, %185, %249 : vector<8x1xf32>
    %cst_73 = arith.constant -9.99999984E+17 : f32
    %251 = vector.broadcast %cst_73 : f32 to vector<8x1xf32>
    %252 = arith.select %250, %251, %248 : vector<8x1xi1>, vector<8x1xf32>
    %cst_74 = arith.constant dense<0xFF800000> : vector<1xf32>
    %253 = vector.multi_reduction <maximumf>, %252, %cst_74 [0] : vector<8x1xf32> to vector<1xf32>
    %254 = vector.shape_cast %253 : vector<1xf32> to vector<1x1xf32>
    %255 = vector.broadcast %254 : vector<1x1xf32> to vector<8x1xf32>
    %256 = arith.cmpf oge, %252, %255 : vector<8x1xf32>
    %c8_i32_75 = arith.constant 8 : i32
    %257 = vector.broadcast %c8_i32_75 : i32 to vector<8x1xi32>
    %258 = arith.select %256, %11, %257 : vector<8x1xi1>, vector<8x1xi32>
    %cst_76 = arith.constant dense<2147483647> : vector<1xi32>
    %259 = vector.multi_reduction <minsi>, %258, %cst_76 [0] : vector<8x1xi32> to vector<1xi32>
    %260 = vector.shape_cast %259 : vector<1xi32> to vector<1x1xi32>
    %261 = vector.broadcast %260 : vector<1x1xi32> to vector<8x1xi32>
    %262 = arith.cmpi eq, %11, %261 : vector<8x1xi32>
    %c2_i32 = arith.constant 2 : i32
    %263 = vector.broadcast %c2_i32 : i32 to vector<1x4xi32>
    %264 = arith.cmpi eq, %12, %263 : vector<1x4xi32>
    %265 = vector.shape_cast %260 : vector<1x1xi32> to vector<1x1xi32>
    %266 = vector.broadcast %265 : vector<1x1xi32> to vector<1x4xi32>
    %267 = arith.select %264, %266, %183 : vector<1x4xi1>, vector<1x4xi32>
    %cst_77 = arith.constant 1.000000e+00 : f32
    %268 = vector.broadcast %cst_77 : f32 to vector<8x1xf32>
    %269 = arith.select %262, %268, %185 : vector<8x1xi1>, vector<8x1xf32>
    %cst_78 = arith.constant 0.000000e+00 : f32
    %270 = vector.shape_cast %262 : vector<8x1xi1> to vector<8x1xi1>
    %271 = vector.broadcast %270 : vector<8x1xi1> to vector<8x128xi1>
    %272 = vector.broadcast %cst_78 : f32 to vector<8x128xf32>
    %273 = arith.select %271, %4, %272 : vector<8x128xi1>, vector<8x128xf32>
    %cst_79 = arith.constant dense<0.000000e+00> : vector<128xf32>
    %274 = vector.multi_reduction <add>, %273, %cst_79 [0] : vector<8x128xf32> to vector<128xf32>
    %275 = vector.shape_cast %274 : vector<128xf32> to vector<1x128xf32>
    %cst_80 = arith.constant dense<0.000000e+00> : vector<1x128xf32>
    %276 = tpu.matmul %219, %17, %cst_80 {dimension_numbers = #tpu.dot_dimension_numbers<[1], [0], [0], [1], [0, 0, 1, 1], [], []>} : vector<1x32xf32>, vector<32x128xf32>, vector<1x128xf32> -> vector<1x128xf32>
    %277 = arith.addf %275, %276 : vector<1x128xf32>
    %278 = arith.addf %277, %18 : vector<1x128xf32>
    %279 = vector.extract_strided_slice %278 {offsets = [0, 0], sizes = [1, 32], strides = [1, 1]} : vector<1x128xf32> to vector<1x32xf32>
    %280 = arith.negf %279 : vector<1x32xf32>
    %281 = math.exp %280 : vector<1x32xf32>
    %cst_81 = arith.constant 1.000000e+00 : f32
    %282 = vector.broadcast %cst_81 : f32 to vector<1x32xf32>
    %283 = arith.addf %282, %281 : vector<1x32xf32>
    %284 = arith.divf %282, %283 : vector<1x32xf32>
    %285 = vector.extract_strided_slice %278 {offsets = [0, 32], sizes = [1, 32], strides = [1, 1]} : vector<1x128xf32> to vector<1x32xf32>
    %286 = arith.negf %285 : vector<1x32xf32>
    %287 = math.exp %286 : vector<1x32xf32>
    %cst_82 = arith.constant 1.000000e+00 : f32
    %288 = vector.broadcast %cst_82 : f32 to vector<1x32xf32>
    %289 = arith.addf %288, %287 : vector<1x32xf32>
    %290 = arith.divf %288, %289 : vector<1x32xf32>
    %291 = vector.extract_strided_slice %278 {offsets = [0, 64], sizes = [1, 32], strides = [1, 1]} : vector<1x128xf32> to vector<1x32xf32>
    %292 = math.tanh %291 : vector<1x32xf32>
    %293 = vector.extract_strided_slice %278 {offsets = [0, 96], sizes = [1, 32], strides = [1, 1]} : vector<1x128xf32> to vector<1x32xf32>
    %294 = arith.negf %293 : vector<1x32xf32>
    %295 = math.exp %294 : vector<1x32xf32>
    %cst_83 = arith.constant 1.000000e+00 : f32
    %296 = vector.broadcast %cst_83 : f32 to vector<1x32xf32>
    %297 = arith.addf %296, %295 : vector<1x32xf32>
    %298 = arith.divf %296, %297 : vector<1x32xf32>
    %299 = arith.mulf %290, %217 : vector<1x32xf32>
    %300 = arith.mulf %284, %292 : vector<1x32xf32>
    %301 = arith.addf %299, %300 : vector<1x32xf32>
    %302 = math.tanh %301 : vector<1x32xf32>
    %303 = arith.mulf %298, %302 : vector<1x32xf32>
    %cst_84 = arith.constant dense<0.000000e+00> : vector<1x32xf32>
    %304 = tpu.matmul %303, %15, %cst_84 {dimension_numbers = #tpu.dot_dimension_numbers<[1], [0], [0], [1], [0, 0, 1, 1], [], []>} : vector<1x32xf32>, vector<32x32xf32>, vector<1x32xf32> -> vector<1x32xf32>
    %305 = vector.broadcast %304 : vector<1x32xf32> to vector<8x32xf32>
    %306 = arith.addf %7, %305 : vector<8x32xf32>
    %307 = math.tanh %306 : vector<8x32xf32>
    %308 = vector.broadcast %16 : vector<1x32xf32> to vector<8x32xf32>
    %309 = arith.mulf %307, %308 : vector<8x32xf32>
    %cst_85 = arith.constant dense<0.000000e+00> : vector<8xf32>
    %310 = vector.multi_reduction <add>, %309, %cst_85 [1] : vector<8x32xf32> to vector<8xf32>
    %311 = vector.shape_cast %310 : vector<8xf32> to vector<8x1xf32>
    %cst_86 = arith.constant dense<0xFF800000> : vector<1xf32>
    %312 = vector.multi_reduction <maximumf>, %311, %cst_86 [0] : vector<8x1xf32> to vector<1xf32>
    %313 = vector.shape_cast %312 : vector<1xf32> to vector<1x1xf32>
    %314 = vector.broadcast %313 : vector<1x1xf32> to vector<8x1xf32>
    %315 = arith.subf %311, %314 : vector<8x1xf32>
    %316 = math.exp %315 : vector<8x1xf32>
    %cst_87 = arith.constant dense<0.000000e+00> : vector<1xf32>
    %317 = vector.multi_reduction <add>, %316, %cst_87 [0] : vector<8x1xf32> to vector<1xf32>
    %318 = vector.shape_cast %317 : vector<1xf32> to vector<1x1xf32>
    %319 = vector.broadcast %318 : vector<1x1xf32> to vector<8x1xf32>
    %320 = arith.divf %316, %319 : vector<8x1xf32>
    %321 = vector.broadcast %320 : vector<8x1xf32> to vector<8x32xf32>
    %322 = arith.mulf %321, %7 : vector<8x32xf32>
    %cst_88 = arith.constant dense<0.000000e+00> : vector<32xf32>
    %323 = vector.multi_reduction <add>, %322, %cst_88 [0] : vector<8x32xf32> to vector<32xf32>
    %324 = vector.shape_cast %323 : vector<32xf32> to vector<1x32xf32>
    %cst_89 = arith.constant dense<0.000000e+00> : vector<1x32xf32>
    %325 = tpu.matmul %324, %13, %cst_89 {dimension_numbers = #tpu.dot_dimension_numbers<[1], [0], [0], [1], [0, 0, 1, 1], [], []>} : vector<1x32xf32>, vector<32x32xf32>, vector<1x32xf32> -> vector<1x32xf32>
    %326 = vector.broadcast %325 : vector<1x32xf32> to vector<8x32xf32>
    %327 = arith.addf %6, %326 : vector<8x32xf32>
    %328 = math.tanh %327 : vector<8x32xf32>
    %329 = vector.broadcast %14 : vector<1x32xf32> to vector<8x32xf32>
    %330 = arith.mulf %328, %329 : vector<8x32xf32>
    %cst_90 = arith.constant dense<0.000000e+00> : vector<8xf32>
    %331 = vector.multi_reduction <add>, %330, %cst_90 [1] : vector<8x32xf32> to vector<8xf32>
    %332 = vector.shape_cast %331 : vector<8xf32> to vector<8x1xf32>
    %cst_91 = arith.constant 0.000000e+00 : f32
    %333 = vector.broadcast %cst_91 : f32 to vector<8x1xf32>
    %334 = arith.cmpf ogt, %269, %333 : vector<8x1xf32>
    %cst_92 = arith.constant -9.99999984E+17 : f32
    %335 = vector.broadcast %cst_92 : f32 to vector<8x1xf32>
    %336 = arith.select %334, %335, %332 : vector<8x1xi1>, vector<8x1xf32>
    %cst_93 = arith.constant dense<0xFF800000> : vector<1xf32>
    %337 = vector.multi_reduction <maximumf>, %336, %cst_93 [0] : vector<8x1xf32> to vector<1xf32>
    %338 = vector.shape_cast %337 : vector<1xf32> to vector<1x1xf32>
    %339 = vector.broadcast %338 : vector<1x1xf32> to vector<8x1xf32>
    %340 = arith.cmpf oge, %336, %339 : vector<8x1xf32>
    %c8_i32_94 = arith.constant 8 : i32
    %341 = vector.broadcast %c8_i32_94 : i32 to vector<8x1xi32>
    %342 = arith.select %340, %11, %341 : vector<8x1xi1>, vector<8x1xi32>
    %cst_95 = arith.constant dense<2147483647> : vector<1xi32>
    %343 = vector.multi_reduction <minsi>, %342, %cst_95 [0] : vector<8x1xi32> to vector<1xi32>
    %344 = vector.shape_cast %343 : vector<1xi32> to vector<1x1xi32>
    %c3_i32 = arith.constant 3 : i32
    %345 = vector.broadcast %c3_i32 : i32 to vector<1x4xi32>
    %346 = arith.cmpi eq, %12, %345 : vector<1x4xi32>
    %347 = vector.shape_cast %344 : vector<1x1xi32> to vector<1x1xi32>
    %348 = vector.broadcast %347 : vector<1x1xi32> to vector<1x4xi32>
    %349 = arith.select %346, %348, %267 : vector<1x4xi1>, vector<1x4xi32>
    %c0_96 = arith.constant 0 : index
    %c0_97 = arith.constant 0 : index
    %c0_98 = arith.constant 0 : index
    %350 = vector.load %arg20[%c0_96, %c0_97, %c0_98] : memref<1x1x4xi32, #tpu.memory_space<vmem>>, vector<1x1x4xi32>
    %351 = vector.shape_cast %350 : vector<1x1x4xi32> to vector<1x4xi32>
    %352 = vector.shape_cast %349 : vector<1x4xi32> to vector<1x1x4xi32>
    tpu.vector_store %arg20[%c0_96, %c0_97, %c0_98], %352 {strides = array<i32>} : memref<1x1x4xi32, #tpu.memory_space<vmem>>, vector<1x1x4xi32>,
    %c0_99 = arith.constant 0 : index
    %c0_100 = arith.constant 0 : index
    %353 = vector.load %arg12[%c0_99, %c0_100] : memref<32x32xf32, #tpu.memory_space<vmem>>, vector<32x32xf32>
    %c0_101 = arith.constant 0 : index
    %c0_102 = arith.constant 0 : index
    %354 = vector.load %arg13[%c0_101, %c0_102] : memref<1x32xf32, #tpu.memory_space<vmem>>, vector<1x32xf32>
    %c0_103 = arith.constant 0 : index
    %c0_104 = arith.constant 0 : index
    %355 = vector.load %arg14[%c0_103, %c0_104] : memref<32x32xf32, #tpu.memory_space<vmem>>, vector<32x32xf32>
    %c0_105 = arith.constant 0 : index
    %c0_106 = arith.constant 0 : index
    %356 = vector.load %arg15[%c0_105, %c0_106] : memref<1x32xf32, #tpu.memory_space<vmem>>, vector<1x32xf32>
    %c0_107 = arith.constant 0 : index
    %c0_108 = arith.constant 0 : index
    %357 = vector.load %arg16[%c0_107, %c0_108] : memref<1x128xf32, #tpu.memory_space<vmem>>, vector<1x128xf32>
    %c0_109 = arith.constant 0 : index
    %c0_110 = arith.constant 0 : index
    %358 = vector.load %arg18[%c0_109, %c0_110] : memref<1x32xf32, #tpu.memory_space<vmem>>, vector<1x32xf32>
    %c0_111 = arith.constant 0 : index
    %c0_112 = arith.constant 0 : index
    %359 = vector.load %arg17[%c0_111, %c0_112] : memref<1x128xf32, #tpu.memory_space<vmem>>, vector<1x128xf32>
    %c0_113 = arith.constant 0 : index
    %c0_114 = arith.constant 0 : index
    %360 = vector.load %arg19[%c0_113, %c0_114] : memref<1x1xf32, #tpu.memory_space<vmem>>, vector<1x1xf32>
    %cst_115 = arith.constant 0.000000e+00 : f32
    %361 = vector.broadcast %cst_115 : f32 to vector<1x4xf32>
    %362 = arith.addf %359, %357 : vector<1x128xf32>
    %363 = vector.extract_strided_slice %362 {offsets = [0, 0], sizes = [1, 32], strides = [1, 1]} : vector<1x128xf32> to vector<1x32xf32>
    %364 = arith.negf %363 : vector<1x32xf32>
    %365 = math.exp %364 : vector<1x32xf32>
    %cst_116 = arith.constant 1.000000e+00 : f32
    %366 = vector.broadcast %cst_116 : f32 to vector<1x32xf32>
    %367 = arith.addf %366, %365 : vector<1x32xf32>
    %368 = arith.divf %366, %367 : vector<1x32xf32>
    %369 = vector.extract_strided_slice %362 {offsets = [0, 32], sizes = [1, 32], strides = [1, 1]} : vector<1x128xf32> to vector<1x32xf32>
    %370 = arith.negf %369 : vector<1x32xf32>
    %371 = math.exp %370 : vector<1x32xf32>
    %cst_117 = arith.constant 1.000000e+00 : f32
    %372 = vector.broadcast %cst_117 : f32 to vector<1x32xf32>
    %373 = arith.addf %372, %371 : vector<1x32xf32>
    %374 = arith.divf %372, %373 : vector<1x32xf32>
    %375 = vector.extract_strided_slice %362 {offsets = [0, 64], sizes = [1, 32], strides = [1, 1]} : vector<1x128xf32> to vector<1x32xf32>
    %376 = math.tanh %375 : vector<1x32xf32>
    %377 = vector.extract_strided_slice %362 {offsets = [0, 96], sizes = [1, 32], strides = [1, 1]} : vector<1x128xf32> to vector<1x32xf32>
    %378 = arith.negf %377 : vector<1x32xf32>
    %379 = math.exp %378 : vector<1x32xf32>
    %cst_118 = arith.constant 1.000000e+00 : f32
    %380 = vector.broadcast %cst_118 : f32 to vector<1x32xf32>
    %381 = arith.addf %380, %379 : vector<1x32xf32>
    %382 = arith.divf %380, %381 : vector<1x32xf32>
    %383 = arith.mulf %374, %358 : vector<1x32xf32>
    %384 = arith.mulf %368, %376 : vector<1x32xf32>
    %385 = arith.addf %383, %384 : vector<1x32xf32>
    %386 = math.tanh %385 : vector<1x32xf32>
    %387 = arith.mulf %382, %386 : vector<1x32xf32>
    %cst_119 = arith.constant dense<0.000000e+00> : vector<1x32xf32>
    %388 = tpu.matmul %387, %355, %cst_119 {dimension_numbers = #tpu.dot_dimension_numbers<[1], [0], [0], [1], [0, 0, 1, 1], [], []>} : vector<1x32xf32>, vector<32x32xf32>, vector<1x32xf32> -> vector<1x32xf32>
    %389 = vector.broadcast %388 : vector<1x32xf32> to vector<8x32xf32>
    %390 = arith.addf %9, %389 : vector<8x32xf32>
    %391 = math.tanh %390 : vector<8x32xf32>
    %392 = vector.broadcast %356 : vector<1x32xf32> to vector<8x32xf32>
    %393 = arith.mulf %391, %392 : vector<8x32xf32>
    %cst_120 = arith.constant dense<0.000000e+00> : vector<8xf32>
    %394 = vector.multi_reduction <add>, %393, %cst_120 [1] : vector<8x32xf32> to vector<8xf32>
    %395 = vector.shape_cast %394 : vector<8xf32> to vector<8x1xf32>
    %cst_121 = arith.constant dense<0xFF800000> : vector<1xf32>
    %396 = vector.multi_reduction <maximumf>, %395, %cst_121 [0] : vector<8x1xf32> to vector<1xf32>
    %397 = vector.shape_cast %396 : vector<1xf32> to vector<1x1xf32>
    %398 = vector.broadcast %397 : vector<1x1xf32> to vector<8x1xf32>
    %399 = arith.subf %395, %398 : vector<8x1xf32>
    %400 = math.exp %399 : vector<8x1xf32>
    %cst_122 = arith.constant dense<0.000000e+00> : vector<1xf32>
    %401 = vector.multi_reduction <add>, %400, %cst_122 [0] : vector<8x1xf32> to vector<1xf32>
    %402 = vector.shape_cast %401 : vector<1xf32> to vector<1x1xf32>
    %403 = vector.broadcast %402 : vector<1x1xf32> to vector<8x1xf32>
    %404 = arith.divf %400, %403 : vector<8x1xf32>
    %405 = vector.broadcast %404 : vector<8x1xf32> to vector<8x32xf32>
    %406 = arith.mulf %405, %9 : vector<8x32xf32>
    %cst_123 = arith.constant dense<0.000000e+00> : vector<32xf32>
    %407 = vector.multi_reduction <add>, %406, %cst_123 [0] : vector<8x32xf32> to vector<32xf32>
    %408 = vector.shape_cast %407 : vector<32xf32> to vector<1x32xf32>
    %cst_124 = arith.constant dense<0.000000e+00> : vector<1x32xf32>
    %409 = tpu.matmul %408, %353, %cst_124 {dimension_numbers = #tpu.dot_dimension_numbers<[1], [0], [0], [1], [0, 0, 1, 1], [], []>} : vector<1x32xf32>, vector<32x32xf32>, vector<1x32xf32> -> vector<1x32xf32>
    %410 = vector.broadcast %409 : vector<1x32xf32> to vector<8x32xf32>
    %411 = arith.addf %8, %410 : vector<8x32xf32>
    %412 = math.tanh %411 : vector<8x32xf32>
    %413 = vector.broadcast %354 : vector<1x32xf32> to vector<8x32xf32>
    %414 = arith.mulf %412, %413 : vector<8x32xf32>
    %cst_125 = arith.constant dense<0.000000e+00> : vector<8xf32>
    %415 = vector.multi_reduction <add>, %414, %cst_125 [1] : vector<8x32xf32> to vector<8xf32>
    %416 = vector.shape_cast %415 : vector<8xf32> to vector<8x1xf32>
    %cst_126 = arith.constant dense<0xFF800000> : vector<1xf32>
    %417 = vector.multi_reduction <maximumf>, %416, %cst_126 [0] : vector<8x1xf32> to vector<1xf32>
    %418 = vector.shape_cast %417 : vector<1xf32> to vector<1x1xf32>
    %419 = vector.broadcast %418 : vector<1x1xf32> to vector<8x1xf32>
    %420 = arith.subf %416, %419 : vector<8x1xf32>
    %421 = math.exp %420 : vector<8x1xf32>
    %cst_127 = arith.constant dense<0.000000e+00> : vector<1xf32>
    %422 = vector.multi_reduction <add>, %421, %cst_127 [0] : vector<8x1xf32> to vector<1xf32>
    %423 = vector.shape_cast %422 : vector<1xf32> to vector<1x1xf32>
    %424 = vector.broadcast %423 : vector<1x1xf32> to vector<8x1xf32>
    %425 = arith.divf %421, %424 : vector<8x1xf32>
    %426 = arith.mulf %425, %10 : vector<8x1xf32>
    %cst_128 = arith.constant dense<0.000000e+00> : vector<1xf32>
    %427 = vector.multi_reduction <add>, %426, %cst_128 [0] : vector<8x1xf32> to vector<1xf32>
    %428 = vector.shape_cast %427 : vector<1xf32> to vector<1x1xf32>
    %429 = arith.addf %428, %360 : vector<1x1xf32>
    %c0_i32_129 = arith.constant 0 : i32
    %430 = vector.broadcast %c0_i32_129 : i32 to vector<1x4xi32>
    %431 = arith.cmpi eq, %12, %430 : vector<1x4xi32>
    %432 = vector.shape_cast %429 : vector<1x1xf32> to vector<1x1xf32>
    %433 = vector.broadcast %432 : vector<1x1xf32> to vector<1x4xf32>
    %434 = arith.select %431, %433, %361 : vector<1x4xi1>, vector<1x4xf32>
    %435 = vector.broadcast %425 : vector<8x1xf32> to vector<8x128xf32>
    %436 = arith.mulf %435, %5 : vector<8x128xf32>
    %cst_130 = arith.constant dense<0.000000e+00> : vector<128xf32>
    %437 = vector.multi_reduction <add>, %436, %cst_130 [0] : vector<8x128xf32> to vector<128xf32>
    %438 = vector.shape_cast %437 : vector<128xf32> to vector<1x128xf32>
    %439 = arith.addf %438, %357 : vector<1x128xf32>
    %440 = vector.extract_strided_slice %439 {offsets = [0, 0], sizes = [1, 32], strides = [1, 1]} : vector<1x128xf32> to vector<1x32xf32>
    %441 = arith.negf %440 : vector<1x32xf32>
    %442 = math.exp %441 : vector<1x32xf32>
    %cst_131 = arith.constant 1.000000e+00 : f32
    %443 = vector.broadcast %cst_131 : f32 to vector<1x32xf32>
    %444 = arith.addf %443, %442 : vector<1x32xf32>
    %445 = arith.divf %443, %444 : vector<1x32xf32>
    %446 = vector.extract_strided_slice %439 {offsets = [0, 32], sizes = [1, 32], strides = [1, 1]} : vector<1x128xf32> to vector<1x32xf32>
    %447 = arith.negf %446 : vector<1x32xf32>
    %448 = math.exp %447 : vector<1x32xf32>
    %cst_132 = arith.constant 1.000000e+00 : f32
    %449 = vector.broadcast %cst_132 : f32 to vector<1x32xf32>
    %450 = arith.addf %449, %448 : vector<1x32xf32>
    %451 = arith.divf %449, %450 : vector<1x32xf32>
    %452 = vector.extract_strided_slice %439 {offsets = [0, 64], sizes = [1, 32], strides = [1, 1]} : vector<1x128xf32> to vector<1x32xf32>
    %453 = math.tanh %452 : vector<1x32xf32>
    %454 = vector.extract_strided_slice %439 {offsets = [0, 96], sizes = [1, 32], strides = [1, 1]} : vector<1x128xf32> to vector<1x32xf32>
    %455 = arith.negf %454 : vector<1x32xf32>
    %456 = math.exp %455 : vector<1x32xf32>
    %cst_133 = arith.constant 1.000000e+00 : f32
    %457 = vector.broadcast %cst_133 : f32 to vector<1x32xf32>
    %458 = arith.addf %457, %456 : vector<1x32xf32>
    %459 = arith.divf %457, %458 : vector<1x32xf32>
    %460 = arith.mulf %451, %358 : vector<1x32xf32>
    %461 = arith.mulf %445, %453 : vector<1x32xf32>
    %462 = arith.addf %460, %461 : vector<1x32xf32>
    %463 = math.tanh %462 : vector<1x32xf32>
    %464 = arith.mulf %459, %463 : vector<1x32xf32>
    %cst_134 = arith.constant dense<0.000000e+00> : vector<1x32xf32>
    %465 = tpu.matmul %464, %355, %cst_134 {dimension_numbers = #tpu.dot_dimension_numbers<[1], [0], [0], [1], [0, 0, 1, 1], [], []>} : vector<1x32xf32>, vector<32x32xf32>, vector<1x32xf32> -> vector<1x32xf32>
    %466 = vector.broadcast %465 : vector<1x32xf32> to vector<8x32xf32>
    %467 = arith.addf %9, %466 : vector<8x32xf32>
    %468 = math.tanh %467 : vector<8x32xf32>
    %469 = vector.broadcast %356 : vector<1x32xf32> to vector<8x32xf32>
    %470 = arith.mulf %468, %469 : vector<8x32xf32>
    %cst_135 = arith.constant dense<0.000000e+00> : vector<8xf32>
    %471 = vector.multi_reduction <add>, %470, %cst_135 [1] : vector<8x32xf32> to vector<8xf32>
    %472 = vector.shape_cast %471 : vector<8xf32> to vector<8x1xf32>
    %cst_136 = arith.constant dense<0xFF800000> : vector<1xf32>
    %473 = vector.multi_reduction <maximumf>, %472, %cst_136 [0] : vector<8x1xf32> to vector<1xf32>
    %474 = vector.shape_cast %473 : vector<1xf32> to vector<1x1xf32>
    %475 = vector.broadcast %474 : vector<1x1xf32> to vector<8x1xf32>
    %476 = arith.subf %472, %475 : vector<8x1xf32>
    %477 = math.exp %476 : vector<8x1xf32>
    %cst_137 = arith.constant dense<0.000000e+00> : vector<1xf32>
    %478 = vector.multi_reduction <add>, %477, %cst_137 [0] : vector<8x1xf32> to vector<1xf32>
    %479 = vector.shape_cast %478 : vector<1xf32> to vector<1x1xf32>
    %480 = vector.broadcast %479 : vector<1x1xf32> to vector<8x1xf32>
    %481 = arith.divf %477, %480 : vector<8x1xf32>
    %482 = vector.broadcast %481 : vector<8x1xf32> to vector<8x32xf32>
    %483 = arith.mulf %482, %9 : vector<8x32xf32>
    %cst_138 = arith.constant dense<0.000000e+00> : vector<32xf32>
    %484 = vector.multi_reduction <add>, %483, %cst_138 [0] : vector<8x32xf32> to vector<32xf32>
    %485 = vector.shape_cast %484 : vector<32xf32> to vector<1x32xf32>
    %cst_139 = arith.constant dense<0.000000e+00> : vector<1x32xf32>
    %486 = tpu.matmul %485, %353, %cst_139 {dimension_numbers = #tpu.dot_dimension_numbers<[1], [0], [0], [1], [0, 0, 1, 1], [], []>} : vector<1x32xf32>, vector<32x32xf32>, vector<1x32xf32> -> vector<1x32xf32>
    %487 = vector.broadcast %486 : vector<1x32xf32> to vector<8x32xf32>
    %488 = arith.addf %8, %487 : vector<8x32xf32>
    %489 = math.tanh %488 : vector<8x32xf32>
    %490 = vector.broadcast %354 : vector<1x32xf32> to vector<8x32xf32>
    %491 = arith.mulf %489, %490 : vector<8x32xf32>
    %cst_140 = arith.constant dense<0.000000e+00> : vector<8xf32>
    %492 = vector.multi_reduction <add>, %491, %cst_140 [1] : vector<8x32xf32> to vector<8xf32>
    %493 = vector.shape_cast %492 : vector<8xf32> to vector<8x1xf32>
    %cst_141 = arith.constant dense<0xFF800000> : vector<1xf32>
    %494 = vector.multi_reduction <maximumf>, %493, %cst_141 [0] : vector<8x1xf32> to vector<1xf32>
    %495 = vector.shape_cast %494 : vector<1xf32> to vector<1x1xf32>
    %496 = vector.broadcast %495 : vector<1x1xf32> to vector<8x1xf32>
    %497 = arith.subf %493, %496 : vector<8x1xf32>
    %498 = math.exp %497 : vector<8x1xf32>
    %cst_142 = arith.constant dense<0.000000e+00> : vector<1xf32>
    %499 = vector.multi_reduction <add>, %498, %cst_142 [0] : vector<8x1xf32> to vector<1xf32>
    %500 = vector.shape_cast %499 : vector<1xf32> to vector<1x1xf32>
    %501 = vector.broadcast %500 : vector<1x1xf32> to vector<8x1xf32>
    %502 = arith.divf %498, %501 : vector<8x1xf32>
    %503 = arith.mulf %502, %10 : vector<8x1xf32>
    %cst_143 = arith.constant dense<0.000000e+00> : vector<1xf32>
    %504 = vector.multi_reduction <add>, %503, %cst_143 [0] : vector<8x1xf32> to vector<1xf32>
    %505 = vector.shape_cast %504 : vector<1xf32> to vector<1x1xf32>
    %506 = arith.addf %505, %360 : vector<1x1xf32>
    %c1_i32_144 = arith.constant 1 : i32
    %507 = vector.broadcast %c1_i32_144 : i32 to vector<1x4xi32>
    %508 = arith.cmpi eq, %12, %507 : vector<1x4xi32>
    %509 = vector.shape_cast %506 : vector<1x1xf32> to vector<1x1xf32>
    %510 = vector.broadcast %509 : vector<1x1xf32> to vector<1x4xf32>
    %511 = arith.select %508, %510, %434 : vector<1x4xi1>, vector<1x4xf32>
    %512 = vector.broadcast %502 : vector<8x1xf32> to vector<8x128xf32>
    %513 = arith.mulf %512, %5 : vector<8x128xf32>
    %cst_145 = arith.constant dense<0.000000e+00> : vector<128xf32>
    %514 = vector.multi_reduction <add>, %513, %cst_145 [0] : vector<8x128xf32> to vector<128xf32>
    %515 = vector.shape_cast %514 : vector<128xf32> to vector<1x128xf32>
    %516 = arith.addf %515, %357 : vector<1x128xf32>
    %517 = vector.extract_strided_slice %516 {offsets = [0, 0], sizes = [1, 32], strides = [1, 1]} : vector<1x128xf32> to vector<1x32xf32>
    %518 = arith.negf %517 : vector<1x32xf32>
    %519 = math.exp %518 : vector<1x32xf32>
    %cst_146 = arith.constant 1.000000e+00 : f32
    %520 = vector.broadcast %cst_146 : f32 to vector<1x32xf32>
    %521 = arith.addf %520, %519 : vector<1x32xf32>
    %522 = arith.divf %520, %521 : vector<1x32xf32>
    %523 = vector.extract_strided_slice %516 {offsets = [0, 32], sizes = [1, 32], strides = [1, 1]} : vector<1x128xf32> to vector<1x32xf32>
    %524 = arith.negf %523 : vector<1x32xf32>
    %525 = math.exp %524 : vector<1x32xf32>
    %cst_147 = arith.constant 1.000000e+00 : f32
    %526 = vector.broadcast %cst_147 : f32 to vector<1x32xf32>
    %527 = arith.addf %526, %525 : vector<1x32xf32>
    %528 = arith.divf %526, %527 : vector<1x32xf32>
    %529 = vector.extract_strided_slice %516 {offsets = [0, 64], sizes = [1, 32], strides = [1, 1]} : vector<1x128xf32> to vector<1x32xf32>
    %530 = math.tanh %529 : vector<1x32xf32>
    %531 = vector.extract_strided_slice %516 {offsets = [0, 96], sizes = [1, 32], strides = [1, 1]} : vector<1x128xf32> to vector<1x32xf32>
    %532 = arith.negf %531 : vector<1x32xf32>
    %533 = math.exp %532 : vector<1x32xf32>
    %cst_148 = arith.constant 1.000000e+00 : f32
    %534 = vector.broadcast %cst_148 : f32 to vector<1x32xf32>
    %535 = arith.addf %534, %533 : vector<1x32xf32>
    %536 = arith.divf %534, %535 : vector<1x32xf32>
    %537 = arith.mulf %528, %358 : vector<1x32xf32>
    %538 = arith.mulf %522, %530 : vector<1x32xf32>
    %539 = arith.addf %537, %538 : vector<1x32xf32>
    %540 = math.tanh %539 : vector<1x32xf32>
    %541 = arith.mulf %536, %540 : vector<1x32xf32>
    %cst_149 = arith.constant dense<0.000000e+00> : vector<1x32xf32>
    %542 = tpu.matmul %541, %355, %cst_149 {dimension_numbers = #tpu.dot_dimension_numbers<[1], [0], [0], [1], [0, 0, 1, 1], [], []>} : vector<1x32xf32>, vector<32x32xf32>, vector<1x32xf32> -> vector<1x32xf32>
    %543 = vector.broadcast %542 : vector<1x32xf32> to vector<8x32xf32>
    %544 = arith.addf %9, %543 : vector<8x32xf32>
    %545 = math.tanh %544 : vector<8x32xf32>
    %546 = vector.broadcast %356 : vector<1x32xf32> to vector<8x32xf32>
    %547 = arith.mulf %545, %546 : vector<8x32xf32>
    %cst_150 = arith.constant dense<0.000000e+00> : vector<8xf32>
    %548 = vector.multi_reduction <add>, %547, %cst_150 [1] : vector<8x32xf32> to vector<8xf32>
    %549 = vector.shape_cast %548 : vector<8xf32> to vector<8x1xf32>
    %cst_151 = arith.constant dense<0xFF800000> : vector<1xf32>
    %550 = vector.multi_reduction <maximumf>, %549, %cst_151 [0] : vector<8x1xf32> to vector<1xf32>
    %551 = vector.shape_cast %550 : vector<1xf32> to vector<1x1xf32>
    %552 = vector.broadcast %551 : vector<1x1xf32> to vector<8x1xf32>
    %553 = arith.subf %549, %552 : vector<8x1xf32>
    %554 = math.exp %553 : vector<8x1xf32>
    %cst_152 = arith.constant dense<0.000000e+00> : vector<1xf32>
    %555 = vector.multi_reduction <add>, %554, %cst_152 [0] : vector<8x1xf32> to vector<1xf32>
    %556 = vector.shape_cast %555 : vector<1xf32> to vector<1x1xf32>
    %557 = vector.broadcast %556 : vector<1x1xf32> to vector<8x1xf32>
    %558 = arith.divf %554, %557 : vector<8x1xf32>
    %559 = vector.broadcast %558 : vector<8x1xf32> to vector<8x32xf32>
    %560 = arith.mulf %559, %9 : vector<8x32xf32>
    %cst_153 = arith.constant dense<0.000000e+00> : vector<32xf32>
    %561 = vector.multi_reduction <add>, %560, %cst_153 [0] : vector<8x32xf32> to vector<32xf32>
    %562 = vector.shape_cast %561 : vector<32xf32> to vector<1x32xf32>
    %cst_154 = arith.constant dense<0.000000e+00> : vector<1x32xf32>
    %563 = tpu.matmul %562, %353, %cst_154 {dimension_numbers = #tpu.dot_dimension_numbers<[1], [0], [0], [1], [0, 0, 1, 1], [], []>} : vector<1x32xf32>, vector<32x32xf32>, vector<1x32xf32> -> vector<1x32xf32>
    %564 = vector.broadcast %563 : vector<1x32xf32> to vector<8x32xf32>
    %565 = arith.addf %8, %564 : vector<8x32xf32>
    %566 = math.tanh %565 : vector<8x32xf32>
    %567 = vector.broadcast %354 : vector<1x32xf32> to vector<8x32xf32>
    %568 = arith.mulf %566, %567 : vector<8x32xf32>
    %cst_155 = arith.constant dense<0.000000e+00> : vector<8xf32>
    %569 = vector.multi_reduction <add>, %568, %cst_155 [1] : vector<8x32xf32> to vector<8xf32>
    %570 = vector.shape_cast %569 : vector<8xf32> to vector<8x1xf32>
    %cst_156 = arith.constant dense<0xFF800000> : vector<1xf32>
    %571 = vector.multi_reduction <maximumf>, %570, %cst_156 [0] : vector<8x1xf32> to vector<1xf32>
    %572 = vector.shape_cast %571 : vector<1xf32> to vector<1x1xf32>
    %573 = vector.broadcast %572 : vector<1x1xf32> to vector<8x1xf32>
    %574 = arith.subf %570, %573 : vector<8x1xf32>
    %575 = math.exp %574 : vector<8x1xf32>
    %cst_157 = arith.constant dense<0.000000e+00> : vector<1xf32>
    %576 = vector.multi_reduction <add>, %575, %cst_157 [0] : vector<8x1xf32> to vector<1xf32>
    %577 = vector.shape_cast %576 : vector<1xf32> to vector<1x1xf32>
    %578 = vector.broadcast %577 : vector<1x1xf32> to vector<8x1xf32>
    %579 = arith.divf %575, %578 : vector<8x1xf32>
    %580 = arith.mulf %579, %10 : vector<8x1xf32>
    %cst_158 = arith.constant dense<0.000000e+00> : vector<1xf32>
    %581 = vector.multi_reduction <add>, %580, %cst_158 [0] : vector<8x1xf32> to vector<1xf32>
    %582 = vector.shape_cast %581 : vector<1xf32> to vector<1x1xf32>
    %583 = arith.addf %582, %360 : vector<1x1xf32>
    %c2_i32_159 = arith.constant 2 : i32
    %584 = vector.broadcast %c2_i32_159 : i32 to vector<1x4xi32>
    %585 = arith.cmpi eq, %12, %584 : vector<1x4xi32>
    %586 = vector.shape_cast %583 : vector<1x1xf32> to vector<1x1xf32>
    %587 = vector.broadcast %586 : vector<1x1xf32> to vector<1x4xf32>
    %588 = arith.select %585, %587, %511 : vector<1x4xi1>, vector<1x4xf32>
    %589 = vector.broadcast %579 : vector<8x1xf32> to vector<8x128xf32>
    %590 = arith.mulf %589, %5 : vector<8x128xf32>
    %cst_160 = arith.constant dense<0.000000e+00> : vector<128xf32>
    %591 = vector.multi_reduction <add>, %590, %cst_160 [0] : vector<8x128xf32> to vector<128xf32>
    %592 = vector.shape_cast %591 : vector<128xf32> to vector<1x128xf32>
    %593 = arith.addf %592, %357 : vector<1x128xf32>
    %594 = vector.extract_strided_slice %593 {offsets = [0, 0], sizes = [1, 32], strides = [1, 1]} : vector<1x128xf32> to vector<1x32xf32>
    %595 = arith.negf %594 : vector<1x32xf32>
    %596 = math.exp %595 : vector<1x32xf32>
    %cst_161 = arith.constant 1.000000e+00 : f32
    %597 = vector.broadcast %cst_161 : f32 to vector<1x32xf32>
    %598 = arith.addf %597, %596 : vector<1x32xf32>
    %599 = arith.divf %597, %598 : vector<1x32xf32>
    %600 = vector.extract_strided_slice %593 {offsets = [0, 32], sizes = [1, 32], strides = [1, 1]} : vector<1x128xf32> to vector<1x32xf32>
    %601 = arith.negf %600 : vector<1x32xf32>
    %602 = math.exp %601 : vector<1x32xf32>
    %cst_162 = arith.constant 1.000000e+00 : f32
    %603 = vector.broadcast %cst_162 : f32 to vector<1x32xf32>
    %604 = arith.addf %603, %602 : vector<1x32xf32>
    %605 = arith.divf %603, %604 : vector<1x32xf32>
    %606 = vector.extract_strided_slice %593 {offsets = [0, 64], sizes = [1, 32], strides = [1, 1]} : vector<1x128xf32> to vector<1x32xf32>
    %607 = math.tanh %606 : vector<1x32xf32>
    %608 = vector.extract_strided_slice %593 {offsets = [0, 96], sizes = [1, 32], strides = [1, 1]} : vector<1x128xf32> to vector<1x32xf32>
    %609 = arith.negf %608 : vector<1x32xf32>
    %610 = math.exp %609 : vector<1x32xf32>
    %cst_163 = arith.constant 1.000000e+00 : f32
    %611 = vector.broadcast %cst_163 : f32 to vector<1x32xf32>
    %612 = arith.addf %611, %610 : vector<1x32xf32>
    %613 = arith.divf %611, %612 : vector<1x32xf32>
    %614 = arith.mulf %605, %358 : vector<1x32xf32>
    %615 = arith.mulf %599, %607 : vector<1x32xf32>
    %616 = arith.addf %614, %615 : vector<1x32xf32>
    %617 = math.tanh %616 : vector<1x32xf32>
    %618 = arith.mulf %613, %617 : vector<1x32xf32>
    %cst_164 = arith.constant dense<0.000000e+00> : vector<1x32xf32>
    %619 = tpu.matmul %618, %355, %cst_164 {dimension_numbers = #tpu.dot_dimension_numbers<[1], [0], [0], [1], [0, 0, 1, 1], [], []>} : vector<1x32xf32>, vector<32x32xf32>, vector<1x32xf32> -> vector<1x32xf32>
    %620 = vector.broadcast %619 : vector<1x32xf32> to vector<8x32xf32>
    %621 = arith.addf %9, %620 : vector<8x32xf32>
    %622 = math.tanh %621 : vector<8x32xf32>
    %623 = vector.broadcast %356 : vector<1x32xf32> to vector<8x32xf32>
    %624 = arith.mulf %622, %623 : vector<8x32xf32>
    %cst_165 = arith.constant dense<0.000000e+00> : vector<8xf32>
    %625 = vector.multi_reduction <add>, %624, %cst_165 [1] : vector<8x32xf32> to vector<8xf32>
    %626 = vector.shape_cast %625 : vector<8xf32> to vector<8x1xf32>
    %cst_166 = arith.constant dense<0xFF800000> : vector<1xf32>
    %627 = vector.multi_reduction <maximumf>, %626, %cst_166 [0] : vector<8x1xf32> to vector<1xf32>
    %628 = vector.shape_cast %627 : vector<1xf32> to vector<1x1xf32>
    %629 = vector.broadcast %628 : vector<1x1xf32> to vector<8x1xf32>
    %630 = arith.subf %626, %629 : vector<8x1xf32>
    %631 = math.exp %630 : vector<8x1xf32>
    %cst_167 = arith.constant dense<0.000000e+00> : vector<1xf32>
    %632 = vector.multi_reduction <add>, %631, %cst_167 [0] : vector<8x1xf32> to vector<1xf32>
    %633 = vector.shape_cast %632 : vector<1xf32> to vector<1x1xf32>
    %634 = vector.broadcast %633 : vector<1x1xf32> to vector<8x1xf32>
    %635 = arith.divf %631, %634 : vector<8x1xf32>
    %636 = vector.broadcast %635 : vector<8x1xf32> to vector<8x32xf32>
    %637 = arith.mulf %636, %9 : vector<8x32xf32>
    %cst_168 = arith.constant dense<0.000000e+00> : vector<32xf32>
    %638 = vector.multi_reduction <add>, %637, %cst_168 [0] : vector<8x32xf32> to vector<32xf32>
    %639 = vector.shape_cast %638 : vector<32xf32> to vector<1x32xf32>
    %cst_169 = arith.constant dense<0.000000e+00> : vector<1x32xf32>
    %640 = tpu.matmul %639, %353, %cst_169 {dimension_numbers = #tpu.dot_dimension_numbers<[1], [0], [0], [1], [0, 0, 1, 1], [], []>} : vector<1x32xf32>, vector<32x32xf32>, vector<1x32xf32> -> vector<1x32xf32>
    %641 = vector.broadcast %640 : vector<1x32xf32> to vector<8x32xf32>
    %642 = arith.addf %8, %641 : vector<8x32xf32>
    %643 = math.tanh %642 : vector<8x32xf32>
    %644 = vector.broadcast %354 : vector<1x32xf32> to vector<8x32xf32>
    %645 = arith.mulf %643, %644 : vector<8x32xf32>
    %cst_170 = arith.constant dense<0.000000e+00> : vector<8xf32>
    %646 = vector.multi_reduction <add>, %645, %cst_170 [1] : vector<8x32xf32> to vector<8xf32>
    %647 = vector.shape_cast %646 : vector<8xf32> to vector<8x1xf32>
    %cst_171 = arith.constant dense<0xFF800000> : vector<1xf32>
    %648 = vector.multi_reduction <maximumf>, %647, %cst_171 [0] : vector<8x1xf32> to vector<1xf32>
    %649 = vector.shape_cast %648 : vector<1xf32> to vector<1x1xf32>
    %650 = vector.broadcast %649 : vector<1x1xf32> to vector<8x1xf32>
    %651 = arith.subf %647, %650 : vector<8x1xf32>
    %652 = math.exp %651 : vector<8x1xf32>
    %cst_172 = arith.constant dense<0.000000e+00> : vector<1xf32>
    %653 = vector.multi_reduction <add>, %652, %cst_172 [0] : vector<8x1xf32> to vector<1xf32>
    %654 = vector.shape_cast %653 : vector<1xf32> to vector<1x1xf32>
    %655 = vector.broadcast %654 : vector<1x1xf32> to vector<8x1xf32>
    %656 = arith.divf %652, %655 : vector<8x1xf32>
    %657 = arith.mulf %656, %10 : vector<8x1xf32>
    %cst_173 = arith.constant dense<0.000000e+00> : vector<1xf32>
    %658 = vector.multi_reduction <add>, %657, %cst_173 [0] : vector<8x1xf32> to vector<1xf32>
    %659 = vector.shape_cast %658 : vector<1xf32> to vector<1x1xf32>
    %660 = arith.addf %659, %360 : vector<1x1xf32>
    %c3_i32_174 = arith.constant 3 : i32
    %661 = vector.broadcast %c3_i32_174 : i32 to vector<1x4xi32>
    %662 = arith.cmpi eq, %12, %661 : vector<1x4xi32>
    %663 = vector.shape_cast %660 : vector<1x1xf32> to vector<1x1xf32>
    %664 = vector.broadcast %663 : vector<1x1xf32> to vector<1x4xf32>
    %665 = arith.select %662, %664, %588 : vector<1x4xi1>, vector<1x4xf32>
    %c0_175 = arith.constant 0 : index
    %c0_176 = arith.constant 0 : index
    %c0_177 = arith.constant 0 : index
    %666 = vector.load %arg21[%c0_175, %c0_176, %c0_177] : memref<1x1x4xf32, #tpu.memory_space<vmem>>, vector<1x1x4xf32>
    %667 = vector.shape_cast %666 : vector<1x1x4xf32> to vector<1x4xf32>
    %668 = vector.shape_cast %665 : vector<1x4xf32> to vector<1x1x4xf32>
    tpu.vector_store %arg21[%c0_175, %c0_176, %c0_177], %668 {strides = array<i32>} : memref<1x1x4xf32, #tpu.memory_space<vmem>>, vector<1x1x4xf32>,
    return
  }
  func.func @transform_0(%arg0: i32) -> (i32, i32, i32) {
    %c0_i32 = arith.constant 0 : i32
    %c0_i32_0 = arith.constant 0 : i32
    %c0_i32_1 = arith.constant 0 : i32
    return %arg0, %c0_i32, %c0_i32_0 : i32, i32, i32
  }
  func.func @transform_1(%arg0: i32) -> (i32, i32) {
    %c0_i32 = arith.constant 0 : i32
    %c0_i32_0 = arith.constant 0 : i32
    %c0_i32_1 = arith.constant 0 : i32
    return %c0_i32, %c0_i32_0 : i32, i32
  }
  func.func @transform_2(%arg0: i32) -> (i32, i32) {
    %c0_i32 = arith.constant 0 : i32
    %c0_i32_0 = arith.constant 0 : i32
    %c0_i32_1 = arith.constant 0 : i32
    return %c0_i32, %c0_i32_0 : i32, i32
  }
  func.func @transform_3(%arg0: i32) -> (i32, i32) {
    %c0_i32 = arith.constant 0 : i32
    %c0_i32_0 = arith.constant 0 : i32
    %c0_i32_1 = arith.constant 0 : i32
    return %c0_i32, %c0_i32_0 : i32, i32
  }
  func.func @transform_4(%arg0: i32) -> (i32, i32) {
    %c0_i32 = arith.constant 0 : i32
    %c0_i32_0 = arith.constant 0 : i32
    %c0_i32_1 = arith.constant 0 : i32
    return %c0_i32, %c0_i32_0 : i32, i32
  }
  func.func @transform_5(%arg0: i32) -> (i32, i32) {
    %c0_i32 = arith.constant 0 : i32
    %c0_i32_0 = arith.constant 0 : i32
    %c0_i32_1 = arith.constant 0 : i32
    return %c0_i32, %c0_i32_0 : i32, i32
  }
  func.func @transform_6(%arg0: i32) -> (i32, i32) {
    %c0_i32 = arith.constant 0 : i32
    %c0_i32_0 = arith.constant 0 : i32
    %c0_i32_1 = arith.constant 0 : i32
    return %c0_i32, %c0_i32_0 : i32, i32
  }
  func.func @transform_7(%arg0: i32) -> (i32, i32) {
    %c0_i32 = arith.constant 0 : i32
    %c0_i32_0 = arith.constant 0 : i32
    %c0_i32_1 = arith.constant 0 : i32
    return %c0_i32, %c0_i32_0 : i32, i32
  }
  func.func @transform_8(%arg0: i32) -> (i32, i32) {
    %c0_i32 = arith.constant 0 : i32
    %c0_i32_0 = arith.constant 0 : i32
    %c0_i32_1 = arith.constant 0 : i32
    return %c0_i32, %c0_i32_0 : i32, i32
  }
  func.func @transform_9(%arg0: i32) -> (i32, i32) {
    %c0_i32 = arith.constant 0 : i32
    %c0_i32_0 = arith.constant 0 : i32
    %c0_i32_1 = arith.constant 0 : i32
    return %c0_i32, %c0_i32_0 : i32, i32
  }
  func.func @transform_10(%arg0: i32) -> (i32, i32) {
    %c0_i32 = arith.constant 0 : i32
    %c0_i32_0 = arith.constant 0 : i32
    %c0_i32_1 = arith.constant 0 : i32
    return %c0_i32, %c0_i32_0 : i32, i32
  }
  func.func @transform_11(%arg0: i32) -> (i32, i32) {
    %c0_i32 = arith.constant 0 : i32
    %c0_i32_0 = arith.constant 0 : i32
    %c0_i32_1 = arith.constant 0 : i32
    return %c0_i32, %c0_i32_0 : i32, i32
  }
  func.func @transform_12(%arg0: i32) -> (i32, i32) {
    %c0_i32 = arith.constant 0 : i32
    %c0_i32_0 = arith.constant 0 : i32
    %c0_i32_1 = arith.constant 0 : i32
    return %c0_i32, %c0_i32_0 : i32, i32
  }
  func.func @transform_13(%arg0: i32) -> (i32, i32) {
    %c0_i32 = arith.constant 0 : i32
    %c0_i32_0 = arith.constant 0 : i32
    %c0_i32_1 = arith.constant 0 : i32
    return %c0_i32, %c0_i32_0 : i32, i32
  }
  func.func @transform_14(%arg0: i32) -> (i32, i32) {
    %c0_i32 = arith.constant 0 : i32
    %c0_i32_0 = arith.constant 0 : i32
    %c0_i32_1 = arith.constant 0 : i32
    return %c0_i32, %c0_i32_0 : i32, i32
  }
  func.func @transform_15(%arg0: i32) -> (i32, i32) {
    %c0_i32 = arith.constant 0 : i32
    %c0_i32_0 = arith.constant 0 : i32
    %c0_i32_1 = arith.constant 0 : i32
    return %c0_i32, %c0_i32_0 : i32, i32
  }
  func.func @transform_16(%arg0: i32) -> (i32, i32) {
    %c0_i32 = arith.constant 0 : i32
    %c0_i32_0 = arith.constant 0 : i32
    %c0_i32_1 = arith.constant 0 : i32
    return %c0_i32, %c0_i32_0 : i32, i32
  }
  func.func @transform_17(%arg0: i32) -> (i32, i32) {
    %c0_i32 = arith.constant 0 : i32
    %c0_i32_0 = arith.constant 0 : i32
    %c0_i32_1 = arith.constant 0 : i32
    return %c0_i32, %c0_i32_0 : i32, i32
  }
  func.func @transform_18(%arg0: i32) -> (i32, i32) {
    %c0_i32 = arith.constant 0 : i32
    %c0_i32_0 = arith.constant 0 : i32
    %c0_i32_1 = arith.constant 0 : i32
    return %c0_i32, %c0_i32_0 : i32, i32
  }
  func.func @transform_19(%arg0: i32) -> (i32, i32, i32) {
    %c0_i32 = arith.constant 0 : i32
    %c0_i32_0 = arith.constant 0 : i32
    %c0_i32_1 = arith.constant 0 : i32
    return %arg0, %c0_i32, %c0_i32_0 : i32, i32, i32
  }
  func.func @transform_20(%arg0: i32) -> (i32, i32, i32) {
    %c0_i32 = arith.constant 0 : i32
    %c0_i32_0 = arith.constant 0 : i32
    %c0_i32_1 = arith.constant 0 : i32
    return %arg0, %c0_i32, %c0_i32_0 : i32, i32, i32
  }
}

</mosaic_0001>

<bundles_post_ra>
// kernel: actor_critic_forward.1
= control target key start
LH: loop header
LB: loop body
LE: loop exit
PB: predicated region body
PF: predicated region fallthrough
CT: control target
= control target key end

     0   :  { %s6257_s0 = inlined_call_operand.hbm [shape: f32[8,8,32], index: 0, kind: input, shape index: {}]   ;;  %s6258_s1 = inlined_call_operand.hbm [shape: f32[32,385], index: 1, kind: input, shape index: {}]   ;;  %s6259_s2 = inlined_call_operand.hbm [shape: f32[32,32], index: 2, kind: input, shape index: {}]   ;;  %s6260_s3 = inlined_call_operand.hbm [shape: f32[1,32], index: 3, kind: input, shape index: {}]   ;;  %s6261_s4 = inlined_call_operand.vmem [shape: f32[32,32], index: 4, kind: input, shape index: {}]   ;;  %s6262_s5 = inlined_call_operand.hbm [shape: f32[1,32], index: 5, kind: input, shape index: {}]   ;;  %s6263_s6 = inlined_call_operand.hbm [shape: f32[32,128], index: 6, kind: input, shape index: {}]   ;;  %s6264_s7 = inlined_call_operand.hbm [shape: f32[1,128], index: 7, kind: input, shape index: {}]   ;;  %s6265_s8 = inlined_call_operand.hbm [shape: f32[1,128], index: 8, kind: input, shape index: {}]   ;;  %s6266_s9 = inlined_call_operand.hbm [shape: f32[1,32], index: 9, kind: input, shape index: {}]   ;;  %s6267_s10 = inlined_call_operand.hbm [shape: f32[1,32], index: 10, kind: input, shape index: {}]   ;;  %s6268_s11 = inlined_call_operand.hbm [shape: f32[32,32], index: 11, kind: input, shape index: {}]   ;;  %s6269_s12 = inlined_call_operand.hbm [shape: f32[1,32], index: 12, kind: input, shape index: {}]   ;;  %s6270_s13 = inlined_call_operand.vmem [shape: f32[32,32], index: 13, kind: input, shape index: {}]   ;;  %s6271_s14 = inlined_call_operand.hbm [shape: f32[1,32], index: 14, kind: input, shape index: {}]   ;;  %s6272_s15 = inlined_call_operand.hbm [shape: f32[1,128], index: 15, kind: input, shape index: {}]   ;;  %s6273_s16 = inlined_call_operand.hbm [shape: f32[1,128], index: 16, kind: input, shape index: {}]   ;;  %s6274_s17 = inlined_call_operand.hbm [shape: f32[1,32], index: 17, kind: input, shape index: {}]   ;;  %s6275_s18 = inlined_call_operand.<no memory space> [shape: f32[1,1], index: 18, kind: input, shape index: {}]   ;;  %s6276_s19 = inlined_call_operand.vmem [shape: s32[8,1,4], index: 19, kind: output, shape index: {0}]   ;;  %s6277_s20 = inlined_call_operand.vmem [shape: f32[8,1,4], index: 20, kind: output, shape index: {1}]  }
   0x1   :  { %6293 = sst [smem:[#allocation42_spill]] %s6257_s0  ;;  %v26_v0 = vstv %s6275_s18 }
   0x2   :  { %6294 = sst [smem:[#allocation43_spill]] %s6258_s1  ;;  %27 = vst [vmem:[#allocation2] sm:$0x1] %v26_v0 }
   0x3   :  { %6295 = sst [smem:[#allocation44_spill]] %s6259_s2 }
   0x4   :  { %6296 = sst [smem:[#allocation45_spill]] %s6260_s3 }
   0x5   :  { %6297 = sst [smem:[#allocation46_spill]] %s6261_s4 }
   0x6   :  { %6298 = sst [smem:[#allocation47_spill]] %s6270_s13 }
   0x7   :  { %6299 = sst [smem:[#allocation48_spill]] %s6276_s19 }
   0x8   :  { %6300 = sst [smem:[#allocation49_spill]] %s6277_s20 }
   0x9   :  { %28 = vsyncpa [#allocation4], 0 }
   0xa   :  { %30 = vsyncpa [#allocation4 + $0x1], 0 }
   0xb   :  { %31 = vsyncpa [#allocation6], 0 }
   0xc   :  { %32 = vsyncpa [#allocation9], 0 }
   0xd   :  { %33 = vsyncpa [#allocation12], 0 }
   0xe   :  { %34 = vsyncpa [#allocation15], 0 }
   0xf   :  { %35 = vsyncpa [#allocation18], 0 }
  0x10   :  { %36 = vsyncpa [#allocation21], 0 }
  0x11   :  { %37 = vsyncpa [#allocation24], 0 }
  0x12   :  { %38 = vsyncpa [#allocation27], 0  ;;  %s5274_s23 = smov 0   ;;  %s5276_s24 = smov 0  }
  0x13   :  { %s5278_s2 = smov 0   ;;  %s5280_s25 = smov 0  }
  0x14 LB: > { %6301 = sst [smem:[#allocation37_spill]] %s5125_s23  ;;  %s5139_s18 = smov [#allocation5]   ;;  %s5137_s25 = sphi %s5280_s25, %s6349_s25   ;;  %s5133_s2 = sphi %s5278_s2, %s5627_s2   ;;  %s5129_s24 = sphi %s5276_s24, %s6348_s24   ;;  %s5125_s23 = sphi %s5274_s23, %s6347_s23  }
  0x15   : > { %6302 = sst [smem:[#allocation38_spill]] %s5129_s24  ;;  %s517_s3 = sshll.u32 %s5139_s18, 4  ;;  %s5300_s3 = int_to_ptr.vmem [resolvable:$true] %s517_s3 }
  0x16   : > { %6303 = sst [smem:[#allocation39_spill]] %s5133_s2  ;;  %s5295_s26 = sadd.s32 4294967295, %s5137_s25  }
  0x17   : > { %6304 = sst [smem:[#allocation40_spill]] %s5295_s26  ;;  %p3745_p0 = scmp.ge.s32.totalorder %s5137_s25, 1 }
  0x18   : > { %p6289_p1 = scmp.eq.s32.totalorder %s5295_s26, 0  ;;  %p505_p2 = scmp.lt.s32.totalorder %s5137_s25, 9 }
  0x19   : > { %s5140_s28 = smov [#allocation8]   ;;  %s5141_s30 = smov [#allocation11]  }
  0x1a   : > { %p5302_p3 = pnand %p3745_p0, %p505_p2  ;;  %s544_s4 = sshll.u32 %s5140_s28, 4  ;;  %s5314_s4 = int_to_ptr.vmem [resolvable:$true] %s544_s4 }
  0x1b   : > { %s5316_s0 = sshll.u32 %s5141_s30, 4  ;;  %s6308_s22 = sld [smem:[#allocation43_spill]]  ;;  %s569_s0 = int_to_ptr.vmem [resolvable:$true] %s5316_s0 }
  0x1c   : > { %s6305_s27 = scalar_select %p5302_p3, 1, 0 }
  0x1d   : > { %p4335_p4 = pneg %p5302_p3 }
  0x1e   : > { %6306 = sst [smem:[#allocation41_spill]] %s6305_s27 }
  0x1f   : > { %p5310_p5 = pnand %p4335_p4, %p6289_p1 }
  0x21   : > { %s4621_s18 = scalar_lea.hbm %s6308_s22, 2048  ;;  %p5326_p7 = pneg %p5310_p5 }
  0x22   : > { %p4622_p6 = scmp.ne.s32.totalorder %s6308_s22, %s4621_s18  ;;  %p4628_p10 = scmp.lt.u32.totalorder %s4621_s18, %s6308_s22 }
  0x24   : > { %p4624_p8 = pnand %p5326_p7, %p4622_p6 }
  0x26   : > { %p4625_p9 = pneg %p4624_p8 }
  0x28   : > { %p4630_p11 = pnand %p4628_p10, %p4625_p9 }
  0x2a   : > { %4633 = shalt.err (!%p4630_p11)
}
  0x2b   : > { %s4634_s19 = scalar_lea.vmem %s5300_s3, 2048  ;;  %p4642_p2 = scmp.lt.s32.totalorder %s5300_s3, %s5300_s3 }
  0x2c   : > { %p4635_p12 = scmp.ne.s32.totalorder %s5300_s3, %s4634_s19  ;;  %p4643_p4 = scmp.lt.s32.totalorder %s4634_s19, %s4634_s19 }
  0x2e   : > { %p4637_p13 = pnand %p4635_p12, %p5326_p7  ;;  %p4644_p6 = por %p4643_p4, %p4642_p2 }
  0x30   : > { %p4638_p0 = pneg %p4637_p13 }
  0x32   : > { %p4645_p8 = pnand %p4644_p6, %p4638_p0 }
  0x34   : > { %4648 = shalt.err (!%p4645_p8)
}
  0x35   : > { %s5142_s20 = smov 512   ;;  %s5143_s13 = smov 32  }
  0x36   : > { %4338 = dma.hbm_to_vmem [thread:$0]  (!%p5310_p5), %s6308_s22, 2048, %s5300_s3, [#allocation6], %s5142_s20, %s5142_s20, %s5143_s13  }
  0x37   : > { %s6310_s27 = sld [smem:[#allocation45_spill]] }
  0x3d   : > { %s4649_s26 = scalar_lea.hbm %s6310_s27, 16 }
  0x3e   : > { %p4650_p9 = scmp.ne.s32.totalorder %s6310_s27, %s4649_s26  ;;  %p4656_p12 = scmp.lt.u32.totalorder %s4649_s26, %s6310_s27 }
  0x40   : > { %p4652_p10 = pnand %p4650_p9, %p5326_p7 }
  0x42   : > { %p4653_p11 = pneg %p4652_p10 }
  0x44   : > { %p4658_p13 = pnand %p4656_p12, %p4653_p11 }
  0x46   : > { %4661 = shalt.err (!%p4658_p13)
}
  0x47   : > { %s4662_s3 = scalar_lea.vmem %s5314_s4, 16  ;;  %s4669_s23 = scalar_lea.vmem %s5314_s4, 32 }
  0x48   : > { %p4663_p0 = scmp.ne.s32.totalorder %s5314_s4, %s4662_s3  ;;  %p4670_p6 = scmp.lt.s32.totalorder %s5314_s4, %s5314_s4 }
  0x49   : > { %p4671_p8 = scmp.lt.s32.totalorder %s4669_s23, %s4662_s3 }
  0x4a   : > { %p4665_p2 = pnand %p4663_p0, %p5326_p7 }
  0x4b   : > { %p4672_p9 = por %p4671_p8, %p4670_p6 }
  0x4c   : > { %p4666_p4 = pneg %p4665_p2 }
  0x4e   : > { %p4673_p10 = pnand %p4672_p9, %p4666_p4 }
  0x50   : > { %4676 = shalt.err (!%p4673_p10)
}
  0x51   : > { %4344 = dma.hbm_to_vmem [thread:$0]  (!%p5310_p5), %s6310_s27, 16, %s5314_s4, [#allocation9]  }
  0x52   : > { %s4677_s13 = scalar_lea.hbm %s6263_s6, 512 }
  0x53   : > { %p4678_p11 = scmp.ne.s32.totalorder %s6263_s6, %s4677_s13  ;;  %p4684_p0 = scmp.lt.u32.totalorder %s4677_s13, %s6263_s6 }
  0x55   : > { %p4680_p12 = pnand %p4678_p11, %p5326_p7 }
  0x57   : > { %p4681_p13 = pneg %p4680_p12 }
  0x59   : > { %p4686_p2 = pnand %p4684_p0, %p4681_p13 }
  0x5b   : > { %4689 = shalt.err (!%p4686_p2)
}
  0x5c   : > { %s4690_s19 = scalar_lea.vmem %s569_s0, 512  ;;  %p4698_p9 = scmp.lt.s32.totalorder %s569_s0, %s569_s0 }
  0x5d   : > { %p4691_p4 = scmp.ne.s32.totalorder %s569_s0, %s4690_s19  ;;  %p4699_p10 = scmp.lt.s32.totalorder %s4690_s19, %s4690_s19 }
  0x5f   : > { %p4693_p6 = pnand %p4691_p4, %p5326_p7  ;;  %p4700_p1 = por %p4699_p10, %p4698_p9 }
  0x61   : > { %p4694_p8 = pneg %p4693_p6 }
  0x63   : > { %p4701_p3 = pnand %p4700_p1, %p4694_p8 }
  0x65   : > { %4704 = shalt.err (!%p4701_p3)
}
  0x66   : > { %s5144_s4 = smov 128   ;;  %s5145_s3 = smov 8  }
  0x67   : > { %4350 = dma.hbm_to_vmem [thread:$0]  (!%p5310_p5), %s6263_s6, 512, %s569_s0, [#allocation12], %s5144_s4, %s5144_s4, %s5145_s3  }
  0x68   : > { %s5146_s2 = smov [#allocation14]   ;;  %s5147_s20 = smov [#allocation17]  }
  0x69   : > { %s593_s26 = sshll.u32 %s5146_s2, 4  ;;  %s615_s13 = sshll.u32 %s5147_s20, 4  ;;  %s594_s26 = int_to_ptr.vmem [resolvable:$true] %s593_s26  ;;  %s616_s13 = int_to_ptr.vmem [resolvable:$true] %s615_s13 }
  0x6a   : > { %s4705_s18 = scalar_lea.hbm %s6265_s8, 16 }
  0x6b   : > { %p4706_p1 = scmp.ne.s32.totalorder %s6265_s8, %s4705_s18  ;;  %p4712_p12 = scmp.lt.u32.totalorder %s4705_s18, %s6265_s8 }
  0x6d   : > { %p4708_p3 = pnand %p4706_p1, %p5326_p7 }
  0x6f   : > { %p4709_p11 = pneg %p4708_p3 }
  0x71   : > { %p4714_p13 = pnand %p4712_p12, %p4709_p11 }
  0x73   : > { %4717 = shalt.err (!%p4714_p13)
}
  0x74   : > { %s4718_s0 = scalar_lea.vmem %s594_s26, 16  ;;  %s4725_s23 = scalar_lea.vmem %s594_s26, 32 }
  0x75   : > { %p4719_p0 = scmp.ne.s32.totalorder %s594_s26, %s4718_s0  ;;  %p4726_p6 = scmp.lt.s32.totalorder %s594_s26, %s594_s26 }
  0x76   : > { %p4727_p8 = scmp.lt.s32.totalorder %s4725_s23, %s4718_s0 }
  0x77   : > { %p4721_p2 = pnand %p4719_p0, %p5326_p7 }
  0x78   : > { %p4728_p9 = por %p4727_p8, %p4726_p6 }
  0x79   : > { %p4722_p4 = pneg %p4721_p2 }
  0x7b   : > { %p4729_p10 = pnand %p4728_p9, %p4722_p4 }
  0x7d   : > { %4732 = shalt.err (!%p4729_p10)
}
  0x7e   : > { %4356 = dma.hbm_to_vmem [thread:$0]  (!%p5310_p5), %s6265_s8, 16, %s594_s26, [#allocation15]  }
  0x7f   : > { %s4733_s20 = scalar_lea.hbm %s6267_s10, 16 }
  0x80   : > { %p4734_p1 = scmp.ne.s32.totalorder %s6267_s10, %s4733_s20  ;;  %p4740_p12 = scmp.lt.u32.totalorder %s4733_s20, %s6267_s10 }
  0x82   : > { %p4736_p3 = pnand %p4734_p1, %p5326_p7 }
  0x84   : > { %p4737_p11 = pneg %p4736_p3 }
  0x86   : > { %p4742_p13 = pnand %p4740_p12, %p4737_p11 }
  0x88   : > { %4745 = shalt.err (!%p4742_p13)
}
  0x89   : > { %s4746_s19 = scalar_lea.vmem %s616_s13, 16  ;;  %s4753_s26 = scalar_lea.vmem %s616_s13, 32 }
  0x8a   : > { %p4747_p0 = scmp.ne.s32.totalorder %s616_s13, %s4746_s19  ;;  %p4754_p6 = scmp.lt.s32.totalorder %s616_s13, %s616_s13 }
  0x8b   : > { %p4755_p8 = scmp.lt.s32.totalorder %s4753_s26, %s4746_s19 }
  0x8c   : > { %p4749_p2 = pnand %p4747_p0, %p5326_p7 }
  0x8d   : > { %p4756_p9 = por %p4755_p8, %p4754_p6 }
  0x8e   : > { %p4750_p4 = pneg %p4749_p2 }
  0x90   : > { %p4757_p10 = pnand %p4756_p9, %p4750_p4 }
  0x92   : > { %4760 = shalt.err (!%p4757_p10)
}
  0x93   : > { %4362 = dma.hbm_to_vmem [thread:$0]  (!%p5310_p5), %s6267_s10, 16, %s616_s13, [#allocation18]  }
  0x94   : > { %s5148_s24 = smov [#allocation20]   ;;  %s5149_s27 = smov [#allocation23]  }
  0x95   : > { %s639_s2 = sshll.u32 %s5148_s24, 4  ;;  %s664_s22 = sshll.u32 %s5149_s27, 4  ;;  %s640_s2 = int_to_ptr.vmem [resolvable:$true] %s639_s2  ;;  %s665_s22 = int_to_ptr.vmem [resolvable:$true] %s664_s22 }
  0x96   : > { %s4761_s1 = scalar_lea.hbm %s6269_s12, 16 }
  0x97   : > { %p4762_p1 = scmp.ne.s32.totalorder %s6269_s12, %s4761_s1  ;;  %p4768_p12 = scmp.lt.u32.totalorder %s4761_s1, %s6269_s12 }
  0x99   : > { %p4764_p3 = pnand %p4762_p1, %p5326_p7 }
  0x9b   : > { %p4765_p11 = pneg %p4764_p3 }
  0x9d   : > { %p4770_p13 = pnand %p4768_p12, %p4765_p11 }
  0x9f   : > { %4773 = shalt.err (!%p4770_p13)
}
  0xa0   : > { %s4774_s13 = scalar_lea.vmem %s640_s2, 16  ;;  %s4781_s0 = scalar_lea.vmem %s640_s2, 32 }
  0xa1   : > { %p4775_p0 = scmp.ne.s32.totalorder %s640_s2, %s4774_s13  ;;  %p4782_p6 = scmp.lt.s32.totalorder %s640_s2, %s640_s2 }
  0xa2   : > { %p4783_p8 = scmp.lt.s32.totalorder %s4781_s0, %s4774_s13 }
  0xa3   : > { %p4777_p2 = pnand %p4775_p0, %p5326_p7 }
  0xa4   : > { %p4784_p9 = por %p4783_p8, %p4782_p6 }
  0xa5   : > { %p4778_p4 = pneg %p4777_p2 }
  0xa7   : > { %p4785_p10 = pnand %p4784_p9, %p4778_p4 }
  0xa9   : > { %4788 = shalt.err (!%p4785_p10)
}
  0xaa   : > { %4368 = dma.hbm_to_vmem [thread:$0]  (!%p5310_p5), %s6269_s12, 16, %s640_s2, [#allocation21]  }
  0xab   : > { %s4789_s21 = scalar_lea.hbm %s6272_s15, 16 }
  0xac   : > { %p4790_p1 = scmp.ne.s32.totalorder %s6272_s15, %s4789_s21  ;;  %p4796_p12 = scmp.lt.u32.totalorder %s4789_s21, %s6272_s15 }
  0xae   : > { %p4792_p3 = pnand %p4790_p1, %p5326_p7 }
  0xb0   : > { %p4793_p11 = pneg %p4792_p3 }
  0xb2   : > { %p4798_p13 = pnand %p4796_p12, %p4793_p11 }
  0xb4   : > { %4801 = shalt.err (!%p4798_p13)
}
  0xb5   : > { %s4802_s26 = scalar_lea.vmem %s665_s22, 16  ;;  %s4809_s2 = scalar_lea.vmem %s665_s22, 32 }
  0xb6   : > { %p4803_p0 = scmp.ne.s32.totalorder %s665_s22, %s4802_s26  ;;  %p4810_p6 = scmp.lt.s32.totalorder %s665_s22, %s665_s22 }
  0xb7   : > { %p4811_p8 = scmp.lt.s32.totalorder %s4809_s2, %s4802_s26 }
  0xb8   : > { %p4805_p2 = pnand %p4803_p0, %p5326_p7 }
  0xb9   : > { %p4812_p9 = por %p4811_p8, %p4810_p6 }
  0xba   : > { %p4806_p4 = pneg %p4805_p2 }
  0xbc   : > { %p4813_p10 = pnand %p4812_p9, %p4806_p4 }
  0xbe   : > { %4816 = shalt.err (!%p4813_p10)
}
  0xbf   : > { %4374 = dma.hbm_to_vmem [thread:$0]  (!%p5310_p5), %s6272_s15, 16, %s665_s22, [#allocation24]  }
  0xc0   : > { %s5150_s23 = smov [#allocation7]   ;;  %s5151_s27 = smov [#allocation10]  }
  0xc1   : > { %s530_s24 = sshll.u32 %s5150_s23, 4  ;;  %s558_s20 = sshll.u32 %s5151_s27, 4  ;;  %s531_s24 = int_to_ptr.vmem [resolvable:$true] %s530_s24  ;;  %s559_s20 = int_to_ptr.vmem [resolvable:$true] %s558_s20 }
  0xc2   : > { %s6311_s18 = sld [smem:[#allocation44_spill]] }
  0xc8   : > { %s4817_s30 = scalar_lea.hbm %s6311_s18, 512 }
  0xc9   : > { %p4818_p1 = scmp.ne.s32.totalorder %s6311_s18, %s4817_s30  ;;  %p4824_p12 = scmp.lt.u32.totalorder %s4817_s30, %s6311_s18 }
  0xcb   : > { %p4820_p3 = pnand %p4818_p1, %p5326_p7 }
  0xcd   : > { %p4821_p11 = pneg %p4820_p3 }
  0xcf   : > { %p4826_p13 = pnand %p4824_p12, %p4821_p11 }
  0xd1   : > { %4829 = shalt.err (!%p4826_p13)
}
  0xd2   : > { %s4830_s22 = scalar_lea.vmem %s531_s24, 512  ;;  %p4838_p6 = scmp.lt.s32.totalorder %s531_s24, %s531_s24 }
  0xd3   : > { %p4831_p0 = scmp.ne.s32.totalorder %s531_s24, %s4830_s22  ;;  %p4839_p8 = scmp.lt.s32.totalorder %s4830_s22, %s4830_s22 }
  0xd5   : > { %p4833_p2 = pnand %p4831_p0, %p5326_p7  ;;  %p4840_p9 = por %p4839_p8, %p4838_p6 }
  0xd7   : > { %p4834_p4 = pneg %p4833_p2 }
  0xd9   : > { %p4841_p10 = pnand %p4840_p9, %p4834_p4 }
  0xdb   : > { %4844 = shalt.err (!%p4841_p10)
}
  0xdc   : > { %4341 = dma.hbm_to_vmem [thread:$0]  (!%p5310_p5), %s6311_s18, 512, %s531_s24, [#allocation6], %s5144_s4, %s5144_s4, %s5145_s3  }
  0xdd   : > { %s4845_s1 = scalar_lea.hbm %s6262_s5, 16 }
  0xde   : > { %p4846_p1 = scmp.ne.s32.totalorder %s6262_s5, %s4845_s1  ;;  %p4852_p12 = scmp.lt.u32.totalorder %s4845_s1, %s6262_s5 }
  0xe0   : > { %p4848_p3 = pnand %p4846_p1, %p5326_p7 }
  0xe2   : > { %p4849_p11 = pneg %p4848_p3 }
  0xe4   : > { %p4854_p13 = pnand %p4852_p12, %p4849_p11 }
  0xe6   : > { %4857 = shalt.err (!%p4854_p13)
}
  0xe7   : > { %s4858_s13 = scalar_lea.vmem %s559_s20, 16  ;;  %s4865_s24 = scalar_lea.vmem %s559_s20, 32 }
  0xe8   : > { %p4859_p0 = scmp.ne.s32.totalorder %s559_s20, %s4858_s13  ;;  %p4866_p6 = scmp.lt.s32.totalorder %s559_s20, %s559_s20 }
  0xe9   : > { %p4867_p8 = scmp.lt.s32.totalorder %s4865_s24, %s4858_s13 }
  0xea   : > { %p4861_p2 = pnand %p4859_p0, %p5326_p7 }
  0xeb   : > { %p4868_p9 = por %p4867_p8, %p4866_p6 }
  0xec   : > { %p4862_p4 = pneg %p4861_p2 }
  0xee   : > { %p4869_p10 = pnand %p4868_p9, %p4862_p4 }
  0xf0   : > { %4872 = shalt.err (!%p4869_p10)
}
  0xf1   : > { %4347 = dma.hbm_to_vmem [thread:$0]  (!%p5310_p5), %s6262_s5, 16, %s559_s20, [#allocation9]  }
  0xf2   : > { %s5152_s23 = smov [#allocation13]   ;;  %s5153_s21 = smov [#allocation16]  }
  0xf3   : > { %s582_s27 = sshll.u32 %s5152_s23, 4  ;;  %s604_s1 = sshll.u32 %s5153_s21, 4  ;;  %s583_s27 = int_to_ptr.vmem [resolvable:$true] %s582_s27  ;;  %s605_s1 = int_to_ptr.vmem [resolvable:$true] %s604_s1 }
  0xf4   : > { %s4873_s26 = scalar_lea.hbm %s6264_s7, 16 }
  0xf5   : > { %p4874_p1 = scmp.ne.s32.totalorder %s6264_s7, %s4873_s26  ;;  %p4880_p12 = scmp.lt.u32.totalorder %s4873_s26, %s6264_s7 }
  0xf7   : > { %p4876_p3 = pnand %p4874_p1, %p5326_p7 }
  0xf9   : > { %p4877_p11 = pneg %p4876_p3 }
  0xfb   : > { %p4882_p13 = pnand %p4880_p12, %p4877_p11 }
  0xfd   : > { %4885 = shalt.err (!%p4882_p13)
}
  0xfe   : > { %s4886_s20 = scalar_lea.vmem %s583_s27, 16  ;;  %s4893_s0 = scalar_lea.vmem %s583_s27, 32 }
  0xff   : > { %p4887_p0 = scmp.ne.s32.totalorder %s583_s27, %s4886_s20  ;;  %p4894_p6 = scmp.lt.s32.totalorder %s583_s27, %s583_s27 }
 0x100   : > { %p4895_p8 = scmp.lt.s32.totalorder %s4893_s0, %s4886_s20 }
 0x101   : > { %p4889_p2 = pnand %p4887_p0, %p5326_p7 }
 0x102   : > { %p4896_p9 = por %p4895_p8, %p4894_p6 }
 0x103   : > { %p4890_p4 = pneg %p4889_p2 }
 0x105   : > { %p4897_p10 = pnand %p4896_p9, %p4890_p4 }
 0x107   : > { %4900 = shalt.err (!%p4897_p10)
}
 0x108   : > { %4353 = dma.hbm_to_vmem [thread:$0]  (!%p5310_p5), %s6264_s7, 16, %s583_s27, [#allocation12]  }
 0x109   : > { %s4901_s26 = scalar_lea.hbm %s6266_s9, 16 }
 0x10a   : > { %p4902_p1 = scmp.ne.s32.totalorder %s6266_s9, %s4901_s26  ;;  %p4908_p12 = scmp.lt.u32.totalorder %s4901_s26, %s6266_s9 }
 0x10c   : > { %p4904_p3 = pnand %p4902_p1, %p5326_p7 }
 0x10e   : > { %p4905_p11 = pneg %p4904_p3 }
 0x110   : > { %p4910_p13 = pnand %p4908_p12, %p4905_p11 }
 0x112   : > { %4913 = shalt.err (!%p4910_p13)
}
 0x113   : > { %s4914_s20 = scalar_lea.vmem %s605_s1, 16  ;;  %s4921_s27 = scalar_lea.vmem %s605_s1, 32 }
 0x114   : > { %p4915_p0 = scmp.ne.s32.totalorder %s605_s1, %s4914_s20  ;;  %p4922_p6 = scmp.lt.s32.totalorder %s605_s1, %s605_s1 }
 0x115   : > { %p4923_p8 = scmp.lt.s32.totalorder %s4921_s27, %s4914_s20 }
 0x116   : > { %p4917_p2 = pnand %p4915_p0, %p5326_p7 }
 0x117   : > { %p4924_p9 = por %p4923_p8, %p4922_p6 }
 0x118   : > { %p4918_p4 = pneg %p4917_p2 }
 0x11a   : > { %p4925_p10 = pnand %p4924_p9, %p4918_p4 }
 0x11c   : > { %4928 = shalt.err (!%p4925_p10)
}
 0x11d   : > { %4359 = dma.hbm_to_vmem [thread:$0]  (!%p5310_p5), %s6266_s9, 16, %s605_s1, [#allocation15]  }
 0x11e   : > { %s5154_s21 = smov [#allocation19]   ;;  %s5155_s19 = smov [#allocation22]  }
 0x11f   : > { %s625_s30 = sshll.u32 %s5154_s21, 4  ;;  %s653_s26 = sshll.u32 %s5155_s19, 4  ;;  %s626_s30 = int_to_ptr.vmem [resolvable:$true] %s625_s30  ;;  %s654_s26 = int_to_ptr.vmem [resolvable:$true] %s653_s26 }
 0x120   : > { %s4929_s24 = scalar_lea.hbm %s6268_s11, 512 }
 0x121   : > { %p4930_p1 = scmp.ne.s32.totalorder %s6268_s11, %s4929_s24  ;;  %p4936_p12 = scmp.lt.u32.totalorder %s4929_s24, %s6268_s11 }
 0x123   : > { %p4932_p3 = pnand %p4930_p1, %p5326_p7 }
 0x125   : > { %p4933_p11 = pneg %p4932_p3 }
 0x127   : > { %p4938_p13 = pnand %p4936_p12, %p4933_p11 }
 0x129   : > { %4941 = shalt.err (!%p4938_p13)
}
 0x12a   : > { %s4942_s1 = scalar_lea.vmem %s626_s30, 512  ;;  %p4950_p6 = scmp.lt.s32.totalorder %s626_s30, %s626_s30 }
 0x12b   : > { %p4943_p0 = scmp.ne.s32.totalorder %s626_s30, %s4942_s1  ;;  %p4951_p8 = scmp.lt.s32.totalorder %s4942_s1, %s4942_s1 }
 0x12d   : > { %p4945_p2 = pnand %p4943_p0, %p5326_p7  ;;  %p4952_p9 = por %p4951_p8, %p4950_p6 }
 0x12f   : > { %p4946_p4 = pneg %p4945_p2 }
 0x131   : > { %p4953_p10 = pnand %p4952_p9, %p4946_p4 }
 0x133   : > { %4956 = shalt.err (!%p4953_p10)
}
 0x134   : > { %4365 = dma.hbm_to_vmem [thread:$0]  (!%p5310_p5), %s6268_s11, 512, %s626_s30, [#allocation18], %s5144_s4, %s5144_s4, %s5145_s3  }
 0x135   : > { %s4957_s13 = scalar_lea.hbm %s6271_s14, 16 }
 0x136   : > { %p4958_p1 = scmp.ne.s32.totalorder %s6271_s14, %s4957_s13  ;;  %p4964_p12 = scmp.lt.u32.totalorder %s4957_s13, %s6271_s14 }
 0x138   : > { %p4960_p3 = pnand %p4958_p1, %p5326_p7 }
 0x13a   : > { %p4961_p11 = pneg %p4960_p3 }
 0x13c   : > { %p4966_p13 = pnand %p4964_p12, %p4961_p11 }
 0x13e   : > { %4969 = shalt.err (!%p4966_p13)
}
 0x13f   : > { %s4970_s0 = scalar_lea.vmem %s654_s26, 16  ;;  %s4977_s4 = scalar_lea.vmem %s654_s26, 32 }
 0x140   : > { %p4971_p0 = scmp.ne.s32.totalorder %s654_s26, %s4970_s0  ;;  %p4978_p6 = scmp.lt.s32.totalorder %s654_s26, %s654_s26 }
 0x141   : > { %p4979_p8 = scmp.lt.s32.totalorder %s4977_s4, %s4970_s0 }
 0x142   : > { %p4973_p2 = pnand %p4971_p0, %p5326_p7 }
 0x143   : > { %p4980_p9 = por %p4979_p8, %p4978_p6 }
 0x144   : > { %p4974_p4 = pneg %p4973_p2 }
 0x146   : > { %p4981_p10 = pnand %p4980_p9, %p4974_p4 }
 0x148   : > { %4984 = shalt.err (!%p4981_p10)
}
 0x149   : > { %4371 = dma.hbm_to_vmem [thread:$0]  (!%p5310_p5), %s6271_s14, 16, %s654_s26, [#allocation21]  }
 0x14a   : > { %s5156_s1 = smov [#allocation25]   ;;  %s5157_s21 = smov [#allocation26]  }
 0x14b   : > { %s675_s23 = sshll.u32 %s5156_s1, 4  ;;  %s686_s19 = sshll.u32 %s5157_s21, 4  ;;  %s676_s23 = int_to_ptr.vmem [resolvable:$true] %s675_s23  ;;  %s687_s19 = int_to_ptr.vmem [resolvable:$true] %s686_s19 }
 0x14c   : > { %s4985_s24 = scalar_lea.hbm %s6273_s16, 16 }
 0x14d   : > { %p4986_p1 = scmp.ne.s32.totalorder %s6273_s16, %s4985_s24  ;;  %p4992_p12 = scmp.lt.u32.totalorder %s4985_s24, %s6273_s16 }
 0x14f   : > { %p4988_p3 = pnand %p4986_p1, %p5326_p7 }
 0x151   : > { %p4989_p11 = pneg %p4988_p3 }
 0x153   : > { %p4994_p13 = pnand %p4992_p12, %p4989_p11 }
 0x155   : > { %4997 = shalt.err (!%p4994_p13)
}
 0x156   : > { %s4998_s26 = scalar_lea.vmem %s676_s23, 16  ;;  %s5005_s4 = scalar_lea.vmem %s676_s23, 32 }
 0x157   : > { %p4999_p0 = scmp.ne.s32.totalorder %s676_s23, %s4998_s26  ;;  %p5006_p6 = scmp.lt.s32.totalorder %s676_s23, %s676_s23 }
 0x158   : > { %p5007_p8 = scmp.lt.s32.totalorder %s5005_s4, %s4998_s26 }
 0x159   : > { %p5001_p2 = pnand %p4999_p0, %p5326_p7 }
 0x15a   : > { %p5008_p9 = por %p5007_p8, %p5006_p6 }
 0x15b   : > { %p5002_p4 = pneg %p5001_p2 }
 0x15d   : > { %p5009_p10 = pnand %p5008_p9, %p5002_p4 }
 0x15f   : > { %5012 = shalt.err (!%p5009_p10)
}
 0x160   : > { %4377 = dma.hbm_to_vmem [thread:$0]  (!%p5310_p5), %s6273_s16, 16, %s676_s23, [#allocation24]  }
 0x161   : > { %s5013_s2 = scalar_lea.hbm %s6274_s17, 16 }
 0x162   : > { %p5014_p1 = scmp.ne.s32.totalorder %s6274_s17, %s5013_s2  ;;  %p5020_p12 = scmp.lt.u32.totalorder %s5013_s2, %s6274_s17 }
 0x164   : > { %p5016_p3 = pnand %p5014_p1, %p5326_p7 }
 0x166   : > { %p5017_p11 = pneg %p5016_p3 }
 0x168   : > { %p5022_p13 = pnand %p5020_p12, %p5017_p11 }
 0x16a   : > { %5025 = shalt.err (!%p5022_p13)
}
 0x16b   : > { %s5026_s27 = scalar_lea.vmem %s687_s19, 16  ;;  %s5033_s23 = scalar_lea.vmem %s687_s19, 32 }
 0x16c   : > { %p5027_p0 = scmp.ne.s32.totalorder %s687_s19, %s5026_s27  ;;  %p5034_p6 = scmp.lt.s32.totalorder %s687_s19, %s687_s19 }
 0x16d   : > { %p5035_p8 = scmp.lt.s32.totalorder %s5033_s23, %s5026_s27 }
 0x16e   : > { %p5029_p2 = pnand %p5027_p0, %p5326_p7 }
 0x16f   : > { %p5036_p9 = por %p5035_p8, %p5034_p6 }
 0x170   : > { %p5030_p4 = pneg %p5029_p2 }
 0x172   : > { %p5037_p10 = pnand %p5036_p9, %p5030_p4 }
 0x174   : > { %5040 = shalt.err (!%p5037_p10)
}
 0x175   : > { %s6312_s4 = sld [smem:[#allocation39_spill]]  ;;  %s6313_s3 = sld [smem:[#allocation38_spill]] }
 0x176   : > { %s6314_s28 = sld [smem:[#allocation37_spill]]  ;;  %s6315_s30 = sld [smem:[#allocation40_spill]] }
 0x177   : > { %4380 = dma.hbm_to_vmem [thread:$0]  (!%p5310_p5), %s6274_s17, 16, %s687_s19, [#allocation27]  }
 0x178   : > { %s5616_s1 = sadd.s32 1, %s5137_s25   ;;  %p59_p3 = scmp.eq.s32.totalorder %s5137_s25, 0 }
 0x179   : > { %s48_s29 = ssub.s32 %s5137_s25, %s5616_s1  ;;  %p4400_p2 = scmp.lt.s32.totalorder %s5137_s25, 8 }
 0x17a   : > { %p49_p7 = scmp.eq.s32.totalorder %s48_s29, 0  ;;  %s3763_s22 = sshll.u32 %s5137_s25, 7 }
 0x17b   : > { %s51_s21 = sadd.s32 1, %s6312_s4  ;;  %p58_p1 = scmp.ne.s32.totalorder %s6312_s4, %s6313_s3 }
 0x17c   : > { %p64_p11 = scmp.ne.s32.totalorder %s6313_s3, %s6314_s28  ;;  %p6316_p13 = scmp.eq.s32.totalorder %s6315_s30, 0 }
 0x17d   : > { %s5627_s2 = scalar_select %p49_p7, %s6312_s4, %s51_s21  }
 0x17e   : > { %p60_p12 = por %p59_p3, %p58_p1  ;;  %p5631_p0 = por %p6316_p13, %p64_p11 }
 0x17f   : > { %s700_s24 = sand.u32 1, %s6312_s4   ;;  %s6318_s23 = sld [smem:[#allocation42_spill]] }
 0x180   : > { %s3762_s19 = sshll.u32 %s700_s24, 3  ;;  %p5645_p5 = pnand %p4400_p2, %p60_p12 }
 0x181   : > { %s704_s3 = scalar_lea.vmem [#allocation3], %s3762_s19  ;;  %s701_s25 = scalar_lea.sflag [#allocation4], %s700_s24 }
 0x182   : > { %s711_s28 = sshll.u32 %s704_s3, 4  ;;  %p5043_p6 = pneg %p5645_p5  ;;  %s5643_s28 = int_to_ptr.vmem [resolvable:$true] %s711_s28 }
 0x185   : > { %s6319_s0 = smov %s6318_s23  ;;  %s5641_s26 = scalar_lea.hbm %s6318_s23, %s3763_s22 }
 0x186   : > { %s5041_s4 = scalar_lea.hbm %s5641_s26, 128  ;;  %s5046_s19 = scalar_lea.hbm %s6319_s0, 1024 }
 0x187   : > { %p5042_p4 = scmp.ne.s32.totalorder %s5641_s26, %s5041_s4  ;;  %p5047_p10 = scmp.lt.u32.totalorder %s5641_s26, %s6319_s0 }
 0x188   : > { %p5048_p7 = scmp.lt.u32.totalorder %s5046_s19, %s5041_s4  ;;  %p5050_p3 = scmp.lt.u32.totalorder %s5041_s4, %s5641_s26 }
 0x189   : > { %p5044_p8 = pnand %p5043_p6, %p5042_p4 }
 0x18a   : > { %p5049_p1 = por %p5048_p7, %p5047_p10 }
 0x18b   : > { %p5045_p9 = pneg %p5044_p8 }
 0x18c   : > { %p5051_p11 = por %p5050_p3, %p5049_p1 }
 0x18e   : > { %p5052_p12 = pnand %p5051_p11, %p5045_p9 }
 0x190   : > { %5055 = shalt.err (!%p5052_p12)
}
 0x191   : > { %s5056_s24 = scalar_lea.vmem %s5643_s28, 128  ;;  %s5158_s27 = smov [#allocation3]  }
 0x192   : > { %p5057_p13 = scmp.ne.s32.totalorder %s5643_s28, %s5056_s24  ;;  %s5061_s23 = sshll.u32 %s5158_s27, 4  ;;  %s5062_s23 = int_to_ptr.vmem [resolvable:$false] %s5061_s23 }
 0x193   : > { %s5063_s3 = scalar_lea.vmem %s5062_s23, 256  ;;  %p5064_p8 = scmp.lt.s32.totalorder %s5643_s28, %s5062_s23 }
 0x194   : > { %p5059_p2 = pnand %p5057_p13, %p5043_p6  ;;  %p5065_p10 = scmp.lt.s32.totalorder %s5063_s3, %s5056_s24 }
 0x196   : > { %p5060_p4 = pneg %p5059_p2  ;;  %p5066_p7 = por %p5065_p10, %p5064_p8 }
 0x198   : > { %p5067_p1 = pnand %p5066_p7, %p5060_p4 }
 0x19a   : > { %5070 = shalt.err (!%p5067_p1)
}
 0x19b   : > { %4384 = dma.hbm_to_vmem [thread:$0]  (!%p5645_p5), %s5641_s26, 128, %s5643_s28, %s701_s25  }
 0x19c   : > { %s6321_s4 = sld [smem:[#allocation41_spill]] }
 0x1a2   : > { %p6322_p9 = scmp.ne.s32.totalorder %s6321_s4, 0 }
 0x1a3   : > { %s6323_s29 = sld [smem:[#allocation38_spill]] (!%p6322_p9) }
 0x1a4   : > { %720 = sbr.rel (%p6322_p9) target bundleno = 13671 (0x3567), region = 96 }
 0x1a9   : > { %s722_s21 = sand.u32 (!%p6322_p9), 1, %s6323_s29  }
 0x1aa   : > { %s5677_s19 = sshll.u32 (!%p6322_p9), %s722_s21, 3  ;;  %s723_s22 = scalar_lea.sflag (!%p6322_p9), [#allocation4], %s722_s21 }
 0x1ab   : > { %s726_s20 = scalar_lea.vmem [#allocation3], %s5677_s19 }
 0x1ac   : > { %5088 = dma.done.wait (%p5631_p0), %s723_s22, 128  }
 0x1ad   : > { %5090 = vsyncadd (%p5631_p0), %s723_s22, 4294967168  ;;  %s6324_s30 = sld [smem:[#allocation40_spill]] }
 0x1b3   : > { %p6325_p6 = scmp.eq.s32.totalorder %s6324_s30, 0 }
 0x1b5   : > { %5092 = dma.done.wait (%p6325_p6), [#allocation6], 2560   ;;  %p6326_p5 = pmov %p6325_p6 }
 0x1b7   : > { %5094 = vsyncadd (%p6326_p5), [#allocation6], 4294964736  ;;  %p6327_p3 = pmov %p6326_p5 }
 0x1b9   : > { %5096 = dma.done.wait (%p6327_p3), [#allocation9], 32   ;;  %p6328_p11 = pmov %p6327_p3 }
 0x1ba   : > { %p6329_p12 = pmov %p6327_p3 }
 0x1bb   : > { %5098 = vsyncadd (%p6328_p11), [#allocation9], 4294967264 }
 0x1bc   : > { %5100 = dma.done.wait (%p6329_p12), [#allocation12], 528   ;;  %p6330_p13 = pmov %p6327_p3 }
 0x1bd   : > { %p6331_p0 = pmov %p6327_p3 }
 0x1be   : > { %5102 = vsyncadd (%p6330_p13), [#allocation12], 4294966768 }
 0x1bf   : > { %5104 = dma.done.wait (%p6331_p0), [#allocation15], 32   ;;  %p6332_p2 = pmov %p6331_p0 }
 0x1c0   : > { %p6333_p4 = pmov %p6331_p0 }
 0x1c1   : > { %5106 = vsyncadd (%p6332_p2), [#allocation15], 4294967264 }
 0x1c2   : > { %5108 = dma.done.wait (%p6333_p4), [#allocation18], 528   ;;  %p6334_p8 = pmov %p6331_p0 }
 0x1c3   : > { %p6335_p10 = pmov %p6331_p0 }
 0x1c4   : > { %5110 = vsyncadd (%p6334_p8), [#allocation18], 4294966768 }
 0x1c5   : > { %5112 = dma.done.wait (%p6335_p10), [#allocation21], 32   ;;  %p6336_p7 = pmov %p6331_p0 }
 0x1c6   : > { %p6337_p1 = pmov %p6331_p0 }
 0x1c7   : > { %5114 = vsyncadd (%p6336_p7), [#allocation21], 4294967264 }
 0x1c8   : > { %5116 = dma.done.wait (%p6337_p1), [#allocation24], 32   ;;  %p6338_p9 = pmov %p6331_p0 }
 0x1c9   : > { %p6339_p6 = pmov %p6331_p0 }
 0x1ca   : > { %5118 = vsyncadd (%p6338_p9), [#allocation24], 4294967264 }
 0x1cb   : > { %5120 = dma.done.wait (%p6339_p6), [#allocation27], 16   ;;  %p6340_p5 = pmov %p6331_p0 }
 0x1cc   : > { %v5159_v1 = vmov 0.0   ;;  %v852_v2 = vld [vmem:[#allocation5 + $0x8] sm:$0xff]  ;;  %v851_v4 = vld [vmem:[#allocation5] sm:$0xff]  ;;  %v5720_v16 = vld [vmem:[%s726_s20] sm:$0xff]  ;;  %vm867_vm0 = vcmask 261120   ;;  %v5160_v18 = vmov 0.0|0.0   ;;  %v1013_v62 = vlaneseq }
 0x1cd   : > { %5122 = vsyncadd (%p6340_p5), [#allocation27], 4294967280  ;;  %935 = vmatprep.mubr.f32.mxu0 %v5159_v1  ;;  %1006 = vmatprep.mubr.f32.mxu1 %v5159_v1  ;;  %v856_v3 = vld [vmem:[#allocation5 + $0x28] sm:$0xff]  ;;  %v855_v6 = vld [vmem:[#allocation5 + $0x20] sm:$0xff]  ;;  %vm5161_vm1 = vmmov 0   ;;  %s5162_s13 = smov 64  }
 0x1ce   : > { %v4137_v5 = vpack.c.bf16 %v856_v3, %v852_v2  ;;  %v860_v7 = vld [vmem:[#allocation5 + $0x48] sm:$0xff]  ;;  %v4139_v9 = vpack.c.bf16 %v855_v6, %v851_v4  ;;  %v859_v11 = vld [vmem:[#allocation5 + $0x40] sm:$0xff]  ;;  %v1029_v19 = vld [vmem:[#allocation11 + $0x10] sm:$0xff]  ;;  %s5163_s26 = smov 32   ;;  %s6341_s24 = sld [smem:[#allocation46_spill]]  ;;  %v5778_v63 = vshrl.u32 %v1013_v62, 7 }
 0x1cf   : > { %v864_v8 = vld [vmem:[#allocation5 + $0x68] sm:$0xff]  ;;  %v863_v12 = vld [vmem:[#allocation5 + $0x60] sm:$0xff]  ;;  %v854_v43 = vld [vmem:[#allocation5 + $0x18] sm:$0xff]  ;;  %s5164_s22 = smov 96   ;;  %vm1261_vm2 = vcmask 523520   ;;  %s6343_s25 = sld [smem:[#allocation47_spill]] }
 0x1d0   : > { %v4141_v10 = vpack.c.bf16 %v864_v8, %v860_v7  ;;  %4138 = vmatprep.subr.bf16.mxu0 %v4137_v5  ;;  %v4143_v13 = vpack.c.bf16 %v863_v12, %v859_v11  ;;  %v1027_v14 = vld [vmem:[#allocation11] sm:$0xff]  ;;  %v1028_v15 = vld [vmem:[#allocation11 + $0x8] sm:$0xff]  ;;  %v1030_v20 = vld [vmem:[#allocation11 + $0x18] sm:$0xff]  ;;  %v5781_v0 = vsub.s32 0, %v5778_v63  ;;  %p844_p3 = scmp.lt.s32.totalorder %s6324_s30, 7  ;;  %s6345_s28 = sld [smem:[#allocation48_spill]] }
 0x1d1   : > { %4140 = vmatpush1.bf16.msra.mxu0 %v4139_v9  ;;  %v5722_v17 = vpack.c.bf16 %v1028_v15, %v1027_v14  ;;  %v5728_v21 = vpack.c.bf16 %v1030_v20, %v1029_v19  ;;  %v1032_v22 = vld [vmem:[#allocation16] sm:$0x1]  ;;  %v1034_v25 = vld [vmem:[#allocation14] sm:$0x1]  ;;  %v5742_v26 = vld [vmem:[#allocation13] sm:$0x1] }
 0x1d2   : > { %4142 = vmatprep.subr.bf16.mxu0 %v4141_v10  ;;  %v1033_v32 = vld [vmem:[#allocation17] sm:$0x1]  ;;  %v858_v44 = vld [vmem:[#allocation5 + $0x38] sm:$0xff]  ;;  %v853_v45 = vld [vmem:[#allocation5 + $0x10] sm:$0xff]  ;;  %s6351_s30 = smov (!%p844_p3, %s6324_s30), 7 }
 0x1d3   : > { %v4145_v46 = vpack.c.bf16 %v858_v44, %v854_v43  ;;  %v857_v47 = vld [vmem:[#allocation5 + $0x30] sm:$0xff]  ;;  %v862_v48 = vld [vmem:[#allocation5 + $0x58] sm:$0xff]  ;;  %v3786_v8 = vld [vmem:[#allocation10] ss:$0 sm:$0xff] }
 0x1d4   : > { %v866_v49 = vld [vmem:[#allocation5 + $0x78] sm:$0xff]  ;;  %v4147_v50 = vpack.c.bf16 %v857_v47, %v853_v45  ;;  %v861_v52 = vld [vmem:[#allocation5 + $0x50] sm:$0xff]  ;;  %s6342_s27 = smov %s6341_s24 }
 0x1d5   : > { %4144 = vmatpush1.bf16.msra.mxu0 %v4143_v13  ;;  %v4149_v51 = vpack.c.bf16 %v866_v49, %v862_v48  ;;  %v865_v53 = vld [vmem:[#allocation5 + $0x70] sm:$0xff]  ;;  %4146 = vmatprep.subr.bf16.mxu1 %v4145_v46  ;;  %v1024_v59 = vld [vmem:[%s6342_s27 + $0x10] sm:$0xff]  ;;  %v1025_v60 = vld [vmem:[%s6342_s27 + $0x18] sm:$0xff]  ;;  %s6344_s3 = smov %s6343_s25 }
 0x1d6   : > { %4153 = vmatprep.subr.bf16.mxu0 %v5160_v18  ;;  %4148 = vmatpush1.bf16.msra.mxu1 %v4147_v50  ;;  %v4151_v54 = vpack.c.bf16 %v865_v53, %v861_v52  ;;  %v1022_v55 = vld [vmem:[%s6341_s24] sm:$0xff]  ;;  %v1023_v56 = vld [vmem:[%s6342_s27 + $0x8] sm:$0xff]  ;;  %v5770_v61 = vpack.c.bf16 %v1025_v60, %v1024_v59  ;;  %s6346_s24 = sld [smem:[#allocation49_spill]] }
 0x1d7   : > { %4150 = vmatprep.subr.bf16.mxu1 %v4149_v51  ;;  %v5757_v58 = vpack.c.bf16 %v1023_v56, %v1022_v55 }
 0x1d8   : > { %3781 = vmatmul.mubr.msk.f32.vlgmr.msra.gmra.mrb[0].mxu0 %vm867_vm0, %v5720_v16 }
 0x1d9   : > { %4155 = vmatpush3.bf16.msra.mxu0 %v5722_v17  ;;  %3925 = vmatprep.mubr.msk.f32.mxu0 %vm5161_vm1, %v5159_v1 }
 0x1da   : > { %4156 = vmatprep.subr.bf16.mxu0 %v5160_v18  ;;  %4152 = vmatpush1.bf16.msra.mxu1 %v4151_v54 }
 0x1db   : > { %4159 = vmatprep.subr.bf16.mxu1 %v5160_v18 }
 0x1dc   : > { %s849_s23 = scalar_lea.vmem %s6346_s24, %s6351_s30 }
 0x1dd   : > { %4158 = vmatpush3.bf16.msra.mxu0 %v5728_v21  ;;  %3782 = vmatmul.mubr.msk.f32.vlgmr.msra.gmra.mrb[0].mxu1 %vm867_vm0, %v5720_v16 }
 0x1de   : > { %4165 = vmatprep.subr.bf16.mxu0 %v5160_v18  ;;  %4161 = vmatpush3.bf16.msra.mxu1 %v5757_v58 }
 0x1df   : > { %3936 = vmatprep.mubr.msk.f32.mxu1 %vm5161_vm1, %v5159_v1  ;;  %4162 = vmatprep.subr.bf16.mxu1 %v5160_v18 }
 0x1e0   : > { %3926 = vmatmul.mubr.msk.f32.vlgmr.msra.gmra.mrb[2].mxu0 %vm867_vm0, %v1032_v22 }
 0x1e1   : > { %3947 = vmatprep.mubr.msk.f32.mxu0 %vm5161_vm1, %v5159_v1 }
 0x1e2   : > { %4164 = vmatpush3.bf16.msra.mxu1 %v5770_v61 }
 0x1e3   : > { %4171 = vmatprep.subr.bf16.mxu1 %v5160_v18 }
 0x2ab   : > { %v5738_v23 = vpop.f32.mrb[0].mxu0 }
 0x2ac   : > { %v5740_v24 = vpop.f32.mrb[1].mxu0 }
 0x2b0   : > { %v5785_v5 = vpop.f32.mrb[0].mxu1 }
 0x2b1   : > { %v5787_v6 = vpop.f32.mrb[1].mxu1 }
 0x2b3   : > { %v1104_v27 = vpop.f32.mrb[2].mxu0 }
 0x2b4   : > { %v1108_v28 = vadd.f32 %v1104_v27, %v1034_v25  ;;  %v3927_v29 = vpop.f32.mrb[3].mxu0  ;;  %v1017_v27 = vld [vmem:[#allocation7] sm:$0xff] }
 0x2b5   : > { %v1019_v29 = vld [vmem:[#allocation7 + $0x10] sm:$0xff] }
 0x2b6   : > { %v1109_v30 = vadd.f32 %v1108_v28, %v5742_v26  ;;  %v1018_v28 = vld [vmem:[#allocation7 + $0x8] sm:$0xff] }
 0x2b8   : > { %4476 = vtanh.f32 %v1109_v30  ;;  %v3784_v33 = vmul.f32 -1.442695, %v1109_v30  ;;  %v5810_v30 = vpack.c.bf16 %v1018_v28, %v1017_v27 }
 0x2ba   : > { %4478 = vpow2.f32 %v3784_v33  ;;  %4167 = vmatpush3.bf16.msra.mxu0 %v5810_v30 }
 0x2bb   : > { %4168 = vmatprep.subr.bf16.mxu0 %v5160_v18 }
 0x2c2   : > { %v4477_v31 = vpop.eup %4476 }
 0x2c3   : > { %1123 = vrot.lane.b32.xlu0 %v4477_v31, %s5162_s13  ;;  %v1020_v31 = vld [vmem:[#allocation7 + $0x18] sm:$0xff] }
 0x2c4   : > { %v4479_v34 = vpop.eup %4478 }
 0x2c5   : > { %v1113_v35 = vadd.f32 1.0, %v4479_v34 }
 0x2c7   : > { %1118 = vrot.lane.b32.xlu0 %v1033_v32, %s5163_s26  ;;  %4480 = vrcp.f32 %v1113_v35  ;;  %v5813_v32 = vpack.c.bf16 %v1020_v31, %v1019_v29 }
 0x2c9   : > { %4170 = vmatpush3.bf16.msra.mxu0 %v5813_v32 }
 0x2ca   : > { %4177 = vmatprep.subr.bf16.mxu0 %v5160_v18 }
 0x2d1   : > { %v4481_v36 = vpop.eup %4480 }
 0x335   : > { %v1124_v37 = vpop.permute.xlu0 %1123 }
 0x336   : > { %v1126_v38 = vmul.f32 %v4481_v36, %v1124_v37 }
 0x338   : > { %1128 = vrot.lane.b32.xlu1 %v1126_v38, %s5163_s26 }
 0x339   : > { %v1119_v39 = vpop.permute.xlu0 %1118 }
 0x33a   : > { %v1121_v40 = vmul.f32 %v4481_v36, %v1119_v39 }
 0x3aa   : > { %v1129_v41 = vpop.permute.xlu1 %1128 }
 0x3ab   : > { %v5748_v42 = vadd.f32 %v1129_v41, %v1121_v40 }
 0x3ad   : > { %4482 = vtanh.f32 %v5748_v42 }
 0x3b7   : > { %v4483_v57 = vpop.eup %4482 }
 0x3b8   : > { %1134 = vrot.lane.b32.xlu1 %v4483_v57, %s5162_s13 }
 0x42a   : > { %v1135_v2 = vpop.permute.xlu1 %1134 }
 0x42b   : > { %v1137_v3 = vmul.f32 %v4481_v36, %v1135_v2 }
 0x42d   : > { %v1142_v4 = vrot.slane %v1137_v3, %v5781_v0 }
 0x42f   : > { %1143 = vrot.lane.b32.xlu0 %v1142_v4, %s5163_s26 }
 0x433   : > { %1232 = vrot.lane.b32.xlu0 %v3786_v8, %s5163_s26 }
 0x4a1   : > { %v1144_v7 = vpop.permute.xlu0 %1143 }
 0x4a2   : > { %3937 = vmatmul.mubr.msk.f32.vlgmr.msra.gmra.mrb[2].mxu1 %vm867_vm0, %v1144_v7 }
 0x4a3   : > { %4173 = vmatpush3.bf16.msra.mxu1 %v5722_v17  ;;  %3958 = vmatprep.mubr.msk.f32.mxu1 %vm5161_vm1, %v5159_v1 }
 0x4a4   : > { %4174 = vmatprep.subr.bf16.mxu1 %v5160_v18 }
 0x4a5   : > { %v5805_v16 = vpop.permute.xlu0 %1232 }
 0x4a7   : > { %4176 = vmatpush3.bf16.msra.mxu1 %v5728_v21 }
 0x4a8   : > { %4183 = vmatprep.subr.bf16.mxu1 %v5160_v18 }
 0x4aa   : > { %3959 = vmatmul.mubr.msk.f32.vlgmr.msra.gmra.mrb[4].mxu1 %vm867_vm0, %v1144_v7 }
 0x4ab   : > { %3980 = vmatprep.mubr.msk.f32.mxu1 %vm5161_vm1, %v5159_v1  ;;  %4185 = vmatpush3.bf16.msra.mxu1 %v5810_v30 }
 0x4ac   : > { %4186 = vmatprep.subr.bf16.mxu1 %v5160_v18 }
 0x4af   : > { %4188 = vmatpush3.bf16.msra.mxu1 %v5813_v32 }
 0x4b0   : > { %4195 = vmatprep.subr.bf16.mxu1 %v5160_v18 }
 0x575   : > { %v1213_v9 = vpop.f32.mrb[2].mxu1 }
 0x576   : > { %v1220_v10 = vrot.slane %v1213_v9, %v5781_v0  ;;  %v3938_v11 = vpop.f32.mrb[3].mxu1  ;;  %v5834_v9 = vld [vmem:[#allocation8] ss:$0 sm:$0xff] }
 0x578   : > { %1222 = vrot.lane.b32.xlu1 %v1220_v10, %s5163_s26 }
 0x57d   : > { %v5802_v12 = vpop.f32.mrb[4].mxu1 }
 0x57e   : > { %v3960_v13 = vpop.f32.mrb[5].mxu1 }
 0x5ea   : > { %v1223_v14 = vpop.permute.xlu1 %1222 }
 0x5eb   : > { %v1225_v15 = vadd.f32 %v1223_v14, %v5785_v5 }
 0x5ed   : > { %4484 = vtanh.f32 %v1225_v15 }
 0x5f7   : > { %v4485_v19 = vpop.eup %4484 }
 0x5f8   : > { %v1235_v20 = vmul.f32 %v4485_v19, %v5805_v16 }
 0x5fa   : > { %1237 = vrot.lane.b32.xlu1 %v1235_v20, %s5164_s22 }
 0x66c   : > { %v1238_v22 = vpop.permute.xlu1 %1237 }
 0x66d   : > { %v1240_v25 = vsel %vm867_vm0, %v1238_v22, 0.0 }
 0x66e   : > { %1241 = vadd.xlane.f32.xlu0 %v1240_v25 }
 0x6fb   : > { %v1242_v33 = vpop.xlane.xlu0 %1241 }
 0x6fc   : > { %v1243_v34 = vrot.slane %v1242_v33, 4 }
 0x6fe   : > { %v1244_v35 = vmax.f32 %v1242_v33, %v1243_v34 }
 0x700   : > { %v1245_v36 = vrot.slane %v1244_v35, 2 }
 0x702   : > { %v1246_v37 = vmax.f32 %v1244_v35, %v1245_v36 }
 0x704   : > { %v1247_v38 = vrot.slane %v1246_v37, 1 }
 0x706   : > { %v1248_v39 = vmax.f32 %v1246_v37, %v1247_v38 }
 0x708   : > { %v1249_v40 = vsub.f32 %v1242_v33, %v1248_v39 }
 0x70a   : > { %v1250_v41 = vmul.f32 1.442695, %v1249_v40 }
 0x70c   : > { %4486 = vpow2.f32 %v1250_v41 }
 0x716   : > { %v4487_v43 = vpop.eup %4486 }
 0x717   : > { %v1252_v44 = vrot.slane %v4487_v43, 4 }
 0x719   : > { %v1253_v45 = vadd.f32 %v4487_v43, %v1252_v44 }
 0x71b   : > { %v1254_v46 = vrot.slane %v1253_v45, 2 }
 0x71d   : > { %v1255_v47 = vadd.f32 %v1254_v46, %v1253_v45 }
 0x71f   : > { %v1256_v48 = vrot.slane %v1255_v47, 1 }
 0x721   : > { %v1257_v49 = vadd.f32 %v1256_v48, %v1255_v47 }
 0x723   : > { %4488 = vrcp.f32 %v1257_v49 }
 0x72d   : > { %v4489_v50 = vpop.eup %4488 }
 0x72e   : > { %v1259_v51 = vmul.f32 %v4489_v50, %v4487_v43 }
 0x730   : > { %v1260_v52 = vmul.f32 %v1259_v51, %v5785_v5 }
 0x732   : > { %v1262_v53 = vsel %vm1261_vm2, %v1260_v52, 0.0 }
 0x733   : > { %v1263_v54 = vrot.slane %v1262_v53, 4 }
 0x735   : > { %v1264_v55 = vadd.f32 %v1263_v54, %v1262_v53 }
 0x737   : > { %v1265_v56 = vrot.slane %v1264_v55, 2 }
 0x739   : > { %v1266_v57 = vadd.f32 %v1265_v56, %v1264_v55 }
 0x73b   : > { %v1267_v59 = vrot.slane %v1266_v57, 1 }
 0x73d   : > { %v1268_v60 = vadd.f32 %v1267_v59, %v1266_v57 }
 0x73f   : > { %1270 = vrot.lane.b32.xlu1 %v1268_v60, %s5164_s22 }
 0x7b1   : > { %v1271_v2 = vpop.permute.xlu1 %1270 }
 0x7b2   : > { %3948 = vmatmul.mubr.msk.f32.vlgmr.msra.gmra.mrb[4].mxu0 %vm867_vm0, %v1271_v2 }
 0x7b3   : > { %4179 = vmatpush3.bf16.msra.mxu0 %v5757_v58  ;;  %3969 = vmatprep.mubr.msk.f32.mxu0 %vm5161_vm1, %v5159_v1 }
 0x7b4   : > { %4180 = vmatprep.subr.bf16.mxu0 %v5160_v18 }
 0x7b7   : > { %4182 = vmatpush3.bf16.msra.mxu0 %v5770_v61 }
 0x7b8   : > { %4189 = vmatprep.subr.bf16.mxu0 %v5160_v18 }
 0x885   : > { %v1340_v3 = vpop.f32.mrb[4].mxu0 }
 0x886   : > { %v1347_v4 = vrot.slane %v1340_v3, %v5781_v0  ;;  %v3949_v7 = vpop.f32.mrb[5].mxu0 }
 0x888   : > { %v1348_v8 = vadd.f32 %v1347_v4, %v5785_v5 }
 0x88a   : > { %4490 = vtanh.f32 %v1348_v8 }
 0x894   : > { %v4491_v10 = vpop.eup %4490 }
 0x895   : > { %v1356_v11 = vmul.f32 %v4491_v10, %v5834_v9 }
 0x897   : > { %v1357_v13 = vsel %vm867_vm0, %v1356_v11, 0.0 }
 0x898   : > { %1358 = vadd.xlane.f32.xlu1 %v1357_v13 }
 0x925   : > { %v1359_v14 = vpop.xlane.xlu1 %1358 }
 0x926   : > { %v1362_v15 = vrot.slane %v1359_v14, 4 }
 0x928   : > { %v1363_v19 = vmax.f32 %v1359_v14, %v1362_v15 }
 0x92a   : > { %v1364_v20 = vrot.slane %v1363_v19, 2 }
 0x92c   : > { %v1365_v22 = vmax.f32 %v1363_v19, %v1364_v20 }
 0x92e   : > { %v1366_v25 = vrot.slane %v1365_v22, 1 }
 0x930   : > { %v1367_v27 = vmax.f32 %v1365_v22, %v1366_v25 }
 0x932   : > { %vm1368_vm3 = vcmp.ge.f32.partialorder %v1359_v14, %v1367_v27 }
 0x933   : > { %v1369_v28 = vsel %vm1368_vm3, %v5778_v63, 8 }
 0x934   : > { %v1370_v29 = vrot.slane %v1369_v28, 4 }
 0x936   : > { %vm1371_vm4 = vcmp.lt.s32.totalorder %v1369_v28, %v1370_v29 }
 0x937   : > { %v1372_v31 = vsel %vm1371_vm4, %v1369_v28, %v1370_v29 }
 0x938   : > { %v1373_v33 = vrot.slane %v1372_v31, 2 }
 0x93a   : > { %vm1374_vm5 = vcmp.lt.s32.totalorder %v1372_v31, %v1373_v33 }
 0x93b   : > { %v1375_v34 = vsel %vm1374_vm5, %v1372_v31, %v1373_v33 }
 0x93c   : > { %v1376_v35 = vrot.slane %v1375_v34, 1 }
 0x93e   : > { %vm1377_vm6 = vcmp.lt.s32.totalorder %v1375_v34, %v1376_v35 }
 0x93f   : > { %v5839_v36 = vsel %vm1377_vm6, %v1375_v34, %v1376_v35 }
 0x940   : > { %vm1379_vm7 = vcmp.eq.s32.totalorder %v5778_v63, %v5839_v36 }
 0x941   : > { %v1385_v37 = vsel %vm1379_vm7, %v5738_v23, 0.0 }
 0x942   : > { %v1386_v38 = vrot.slane %v1385_v37, 4 }
 0x944   : > { %v1387_v39 = vadd.f32 %v1386_v38, %v1385_v37 }
 0x946   : > { %v1388_v40 = vrot.slane %v1387_v39, 2 }
 0x948   : > { %v1389_v41 = vadd.f32 %v1388_v40, %v1387_v39 }
 0x94a   : > { %v1390_v43 = vrot.slane %v1389_v41, 1 }
 0x94c   : > { %v1391_v44 = vadd.f32 %v1390_v43, %v1389_v41 }
 0x94e   : > { %v1462_v45 = vadd.f32 %v5802_v12, %v1391_v44 }
 0x950   : > { %v1463_v46 = vadd.f32 %v1462_v45, %v5742_v26 }
 0x952   : > { %4492 = vtanh.f32 %v1463_v46  ;;  %v3790_v48 = vmul.f32 -1.442695, %v1463_v46 }
 0x954   : > { %4494 = vpow2.f32 %v3790_v48 }
 0x95c   : > { %v4493_v47 = vpop.eup %4492 }
 0x95d   : > { %1473 = vrot.lane.b32.xlu0 %v4493_v47, %s5162_s13 }
 0x95e   : > { %v4495_v49 = vpop.eup %4494 }
 0x95f   : > { %v1467_v50 = vadd.f32 1.0, %v4495_v49 }
 0x961   : > { %4496 = vrcp.f32 %v1467_v50 }
 0x96b   : > { %v4497_v51 = vpop.eup %4496 }
 0x96c   : > { %v1471_v54 = vmul.f32 %v4497_v51, %v5748_v42 }
 0x9cf   : > { %v1474_v52 = vpop.permute.xlu0 %1473 }
 0x9d0   : > { %v1476_v53 = vmul.f32 %v4497_v51, %v1474_v52 }
 0x9d2   : > { %1478 = vrot.lane.b32.xlu1 %v1476_v53, %s5163_s26 }
 0xa44   : > { %v1479_v55 = vpop.permute.xlu1 %1478 }
 0xa45   : > { %v5852_v12 = vadd.f32 %v1479_v55, %v1471_v54 }
 0xa47   : > { %4498 = vtanh.f32 %v5852_v12 }
 0xa51   : > { %v4499_v56 = vpop.eup %4498 }
 0xa52   : > { %1484 = vrot.lane.b32.xlu0 %v4499_v56, %s5162_s13 }
 0xac4   : > { %v1485_v57 = vpop.permute.xlu0 %1484 }
 0xac5   : > { %v1487_v59 = vmul.f32 %v4497_v51, %v1485_v57 }
 0xac7   : > { %1489 = vrot.lane.b32.xlu0 %v1487_v59, %s5163_s26 }
 0xb39   : > { %v1490_v60 = vpop.permute.xlu0 %1489 }
 0xb3a   : > { %3970 = vmatmul.mubr.msk.f32.vlgmr.msra.gmra.mrb[6].mxu0 %vm867_vm0, %v1490_v60 }
 0xb3b   : > { %4191 = vmatpush3.bf16.msra.mxu0 %v5722_v17  ;;  %3991 = vmatprep.mubr.msk.f32.mxu0 %vm5161_vm1, %v5159_v1 }
 0xb3c   : > { %4192 = vmatprep.subr.bf16.mxu0 %v5160_v18 }
 0xb3f   : > { %4194 = vmatpush3.bf16.msra.mxu0 %v5728_v21 }
 0xb40   : > { %4201 = vmatprep.subr.bf16.mxu0 %v5160_v18 }
 0xb42   : > { %3992 = vmatmul.mubr.msk.f32.vlgmr.msra.gmra.mrb[8].mxu0 %vm867_vm0, %v1490_v60 }
 0xb43   : > { %4203 = vmatpush3.bf16.msra.mxu0 %v5810_v30  ;;  %4013 = vmatprep.mubr.msk.f32.mxu0 %vm5161_vm1, %v5159_v1 }
 0xb44   : > { %4204 = vmatprep.subr.bf16.mxu0 %v5160_v18 }
 0xb47   : > { %4206 = vmatpush3.bf16.msra.mxu0 %v5813_v32 }
 0xb48   : > { %4213 = vmatprep.subr.bf16.mxu0 %v5160_v18 }
 0xc0d   : > { %v1559_v42 = vpop.f32.mrb[6].mxu0 }
 0xc0e   : > { %v1566_v2 = vrot.slane %v1559_v42, %v5781_v0  ;;  %v3971_v3 = vpop.f32.mrb[7].mxu0 }
 0xc10   : > { %1568 = vrot.lane.b32.xlu1 %v1566_v2, %s5163_s26  ;;  %v5897_v2 = vsel %vm1379_vm7, 1.0, %v5159_v1 }
 0xc11   : > { %vm1691_vm8 = vcmp.gt.f32.partialorder %v5897_v2, 0.0 }
 0xc15   : > { %v5873_v4 = vpop.f32.mrb[8].mxu0 }
 0xc16   : > { %v3993_v7 = vpop.f32.mrb[9].mxu0 }
 0xc82   : > { %v1569_v8 = vpop.permute.xlu1 %1568 }
 0xc83   : > { %v1571_v10 = vadd.f32 %v1569_v8, %v5785_v5 }
 0xc85   : > { %4500 = vtanh.f32 %v1571_v10 }
 0xc8f   : > { %v4501_v11 = vpop.eup %4500 }
 0xc90   : > { %v1573_v13 = vmul.f32 %v4501_v11, %v5805_v16 }
 0xc92   : > { %1575 = vrot.lane.b32.xlu0 %v1573_v13, %s5164_s22 }
 0xd04   : > { %v1576_v14 = vpop.permute.xlu0 %1575 }
 0xd05   : > { %v1578_v15 = vsel %vm867_vm0, %v1576_v14, 0.0 }
 0xd06   : > { %1579 = vadd.xlane.f32.xlu1 %v1578_v15 }
 0xd93   : > { %v1580_v19 = vpop.xlane.xlu1 %1579 }
 0xd94   : > { %v1581_v20 = vrot.slane %v1580_v19, 4 }
 0xd96   : > { %v1582_v22 = vmax.f32 %v1580_v19, %v1581_v20 }
 0xd98   : > { %v1583_v25 = vrot.slane %v1582_v22, 2 }
 0xd9a   : > { %v1584_v27 = vmax.f32 %v1582_v22, %v1583_v25 }
 0xd9c   : > { %v1585_v28 = vrot.slane %v1584_v27, 1 }
 0xd9e   : > { %v1586_v29 = vmax.f32 %v1584_v27, %v1585_v28  ;;  %v5902_v27 = vand.u32 127, %v1013_v62 }
 0xda0   : > { %v1587_v31 = vsub.f32 %v1580_v19, %v1586_v29  ;;  %vm1380_vm12 = vcmp.eq.s32.totalorder %v5902_v27, 0  ;;  %vm1711_vm13 = vcmp.eq.s32.totalorder %v5902_v27, 1  ;;  %vm2042_vm7 = vcmp.eq.s32.totalorder %v5902_v27, 2 }
 0xda2   : > { %v1588_v33 = vmul.f32 1.442695, %v1587_v31 }
 0xda4   : > { %4502 = vpow2.f32 %v1588_v33  ;;  %v1381_v33 = vsel %vm1380_vm12, %v5839_v36, 0 }
 0xdae   : > { %v4503_v34 = vpop.eup %4502 }
 0xdaf   : > { %v1590_v35 = vrot.slane %v4503_v34, 4 }
 0xdb1   : > { %v1591_v37 = vadd.f32 %v4503_v34, %v1590_v35 }
 0xdb3   : > { %v1592_v38 = vrot.slane %v1591_v37, 2 }
 0xdb5   : > { %v1593_v39 = vadd.f32 %v1592_v38, %v1591_v37 }
 0xdb7   : > { %v1594_v40 = vrot.slane %v1593_v39, 1 }
 0xdb9   : > { %v1595_v41 = vadd.f32 %v1594_v40, %v1593_v39 }
 0xdbb   : > { %4504 = vrcp.f32 %v1595_v41 }
 0xdc5   : > { %v4505_v43 = vpop.eup %4504 }
 0xdc6   : > { %v1597_v44 = vmul.f32 %v4505_v43, %v4503_v34 }
 0xdc8   : > { %v1598_v45 = vmul.f32 %v1597_v44, %v5785_v5 }
 0xdca   : > { %v1599_v46 = vsel %vm1261_vm2, %v1598_v45, 0.0 }
 0xdcb   : > { %v1600_v47 = vrot.slane %v1599_v46, 4 }
 0xdcd   : > { %v1601_v48 = vadd.f32 %v1600_v47, %v1599_v46 }
 0xdcf   : > { %v1602_v49 = vrot.slane %v1601_v48, 2 }
 0xdd1   : > { %v1603_v50 = vadd.f32 %v1602_v49, %v1601_v48 }
 0xdd3   : > { %v1604_v51 = vrot.slane %v1603_v50, 1 }
 0xdd5   : > { %v1605_v52 = vadd.f32 %v1604_v51, %v1603_v50 }
 0xdd7   : > { %1607 = vrot.lane.b32.xlu0 %v1605_v52, %s5164_s22 }
 0xe49   : > { %v1608_v53 = vpop.permute.xlu0 %1607 }
 0xe4a   : > { %3981 = vmatmul.mubr.msk.f32.vlgmr.msra.gmra.mrb[6].mxu1 %vm867_vm0, %v1608_v53 }
 0xe4b   : > { %4197 = vmatpush3.bf16.msra.mxu1 %v5757_v58  ;;  %4002 = vmatprep.mubr.msk.f32.mxu1 %vm5161_vm1, %v5159_v1 }
 0xe4c   : > { %4198 = vmatprep.subr.bf16.mxu1 %v5160_v18 }
 0xe4f   : > { %4200 = vmatpush3.bf16.msra.mxu1 %v5770_v61 }
 0xe50   : > { %4207 = vmatprep.subr.bf16.mxu1 %v5160_v18 }
 0xf1d   : > { %v1677_v54 = vpop.f32.mrb[6].mxu1 }
 0xf1e   : > { %v1684_v55 = vrot.slane %v1677_v54, %v5781_v0  ;;  %v3982_v56 = vpop.f32.mrb[7].mxu1 }
 0xf20   : > { %v1685_v57 = vadd.f32 %v1684_v55, %v5785_v5 }
 0xf22   : > { %4506 = vtanh.f32 %v1685_v57 }
 0xf2c   : > { %v4507_v59 = vpop.eup %4506 }
 0xf2d   : > { %v1687_v60 = vmul.f32 %v4507_v59, %v5834_v9 }
 0xf2f   : > { %v1688_v42 = vsel %vm867_vm0, %v1687_v60, 0.0 }
 0xf30   : > { %1689 = vadd.xlane.f32.xlu0 %v1688_v42 }
 0xfbd   : > { %v1690_v3 = vpop.xlane.xlu0 %1689 }
 0xfbe   : > { %v1692_v7 = vsel %vm1691_vm8, -1e+18, %v1690_v3 }
 0xfbf   : > { %v1693_v8 = vrot.slane %v1692_v7, 4 }
 0xfc1   : > { %v1694_v10 = vmax.f32 %v1692_v7, %v1693_v8 }
 0xfc3   : > { %v1695_v11 = vrot.slane %v1694_v10, 2 }
 0xfc5   : > { %v1696_v13 = vmax.f32 %v1694_v10, %v1695_v11 }
 0xfc7   : > { %v1697_v14 = vrot.slane %v1696_v13, 1 }
 0xfc9   : > { %v1698_v15 = vmax.f32 %v1696_v13, %v1697_v14 }
 0xfcb   : > { %vm1699_vm9 = vcmp.ge.f32.partialorder %v1692_v7, %v1698_v15 }
 0xfcc   : > { %v1700_v19 = vsel %vm1699_vm9, %v5778_v63, 8 }
 0xfcd   : > { %v1701_v20 = vrot.slane %v1700_v19, 4 }
 0xfcf   : > { %vm1702_vm10 = vcmp.lt.s32.totalorder %v1700_v19, %v1701_v20 }
 0xfd0   : > { %v1703_v22 = vsel %vm1702_vm10, %v1700_v19, %v1701_v20  ;;  %vm2542_vm10 = vcmask 1048320  }
 0xfd1   : > { %v1704_v25 = vrot.slane %v1703_v22, 2 }
 0xfd3   : > { %vm1705_vm11 = vcmp.lt.s32.totalorder %v1703_v22, %v1704_v25 }
 0xfd4   : > { %v1706_v28 = vsel %vm1705_vm11, %v1703_v22, %v1704_v25 }
 0xfd5   : > { %v1707_v29 = vrot.slane %v1706_v28, 1 }
 0xfd7   : > { %vm1708_vm14 = vcmp.lt.s32.totalorder %v1706_v28, %v1707_v29 }
 0xfd8   : > { %v5906_v31 = vsel %vm1708_vm14, %v1706_v28, %v1707_v29 }
 0xfd9   : > { %vm1710_vm15 = vcmp.eq.s32.totalorder %v5778_v63, %v5906_v31  ;;  %v5916_v62 = vsel %vm1711_vm13, %v5906_v31, %v1381_v33 }
 0xfda   : > { %v1716_v34 = vsel %vm1710_vm15, %v5738_v23, 0.0 }
 0xfdb   : > { %v1717_v35 = vrot.slane %v1716_v34, 4 }
 0xfdd   : > { %v1718_v37 = vadd.f32 %v1717_v35, %v1716_v34 }
 0xfdf   : > { %v1719_v38 = vrot.slane %v1718_v37, 2 }
 0xfe1   : > { %v1720_v39 = vadd.f32 %v1719_v38, %v1718_v37 }
 0xfe3   : > { %v1721_v40 = vrot.slane %v1720_v39, 1 }
 0xfe5   : > { %v1722_v41 = vadd.f32 %v1721_v40, %v1720_v39 }
 0xfe7   : > { %v1793_v36 = vadd.f32 %v5873_v4, %v1722_v41 }
 0xfe9   : > { %v1794_v43 = vadd.f32 %v1793_v36, %v5742_v26 }
 0xfeb   : > { %4508 = vtanh.f32 %v1794_v43  ;;  %v3794_v45 = vmul.f32 -1.442695, %v1794_v43 }
 0xfed   : > { %4510 = vpow2.f32 %v3794_v45 }
 0xff5   : > { %v4509_v44 = vpop.eup %4508 }
 0xff6   : > { %1804 = vrot.lane.b32.xlu1 %v4509_v44, %s5162_s13 }
 0xff7   : > { %v4511_v46 = vpop.eup %4510 }
 0xff8   : > { %v1798_v47 = vadd.f32 1.0, %v4511_v46 }
 0xffa   : > { %4512 = vrcp.f32 %v1798_v47 }
0x1004   : > { %v4513_v48 = vpop.eup %4512 }
0x1005   : > { %v1802_v51 = vmul.f32 %v4513_v48, %v5852_v12 }
0x1068   : > { %v1805_v49 = vpop.permute.xlu1 %1804 }
0x1069   : > { %v1807_v50 = vmul.f32 %v4513_v48, %v1805_v49 }
0x106b   : > { %1809 = vrot.lane.b32.xlu0 %v1807_v50, %s5163_s26 }
0x10dd   : > { %v1810_v52 = vpop.permute.xlu0 %1809 }
0x10de   : > { %v5927_v4 = vadd.f32 %v1810_v52, %v1802_v51 }
0x10e0   : > { %4514 = vtanh.f32 %v5927_v4 }
0x10ea   : > { %v4515_v53 = vpop.eup %4514 }
0x10eb   : > { %1815 = vrot.lane.b32.xlu1 %v4515_v53, %s5162_s13 }
0x115d   : > { %v1816_v54 = vpop.permute.xlu1 %1815 }
0x115e   : > { %v1818_v55 = vmul.f32 %v4513_v48, %v1816_v54 }
0x1160   : > { %1820 = vrot.lane.b32.xlu1 %v1818_v55, %s5163_s26  ;;  %v5968_v55 = vld [vmem:[#allocation23] sm:$0x1] }
0x11d2   : > { %v1821_v56 = vpop.permute.xlu1 %1820 }
0x11d3   : > { %4003 = vmatmul.mubr.msk.f32.vlgmr.msra.gmra.mrb[8].mxu1 %vm867_vm0, %v1821_v56 }
0x11d4   : > { %4209 = vmatpush3.bf16.msra.mxu1 %v5722_v17  ;;  %4024 = vmatprep.mubr.msk.f32.mxu1 %vm5161_vm1, %v5159_v1 }
0x11d5   : > { %4210 = vmatprep.subr.bf16.mxu1 %v5160_v18 }
0x11d8   : > { %4212 = vmatpush3.bf16.msra.mxu1 %v5728_v21 }
0x11d9   : > { %4219 = vmatprep.subr.bf16.mxu1 %v5160_v18 }
0x11db   : > { %4025 = vmatmul.mubr.msk.f32.vlgmr.msra.gmra.mrb[10].mxu1 %vm867_vm0, %v1821_v56  ;;  %v2388_v56 = vld [vmem:[#allocation25] sm:$0x1] }
0x11dc   : > { %4221 = vmatpush3.bf16.msra.mxu1 %v5810_v30  ;;  %4046 = vmatprep.mubr.msk.f32.mxu1 %vm5161_vm1, %v5159_v1 }
0x11dd   : > { %4222 = vmatprep.subr.bf16.mxu1 %v5160_v18 }
0x11e0   : > { %4224 = vmatpush3.bf16.msra.mxu1 %v5813_v32 }
0x11e1   : > { %4231 = vmatprep.subr.bf16.mxu1 %v5160_v18 }
0x12a6   : > { %v1890_v17 = vpop.f32.mrb[8].mxu1 }
0x12a7   : > { %v1897_v12 = vrot.slane %v1890_v17, %v5781_v0  ;;  %v4004_v57 = vpop.f32.mrb[9].mxu1 }
0x12a9   : > { %1899 = vrot.lane.b32.xlu0 %v1897_v12, %s5163_s26  ;;  %v5976_v12 = vsel %vm1710_vm15, 1.0, %v5897_v2 }
0x12aa   : > { %vm2022_vm3 = vcmp.gt.f32.partialorder %v5976_v12, 0.0 }
0x12ae   : > { %v5948_v21 = vpop.f32.mrb[10].mxu1 }
0x12af   : > { %v4026_v59 = vpop.f32.mrb[11].mxu1 }
0x131b   : > { %v1900_v60 = vpop.permute.xlu0 %1899 }
0x131c   : > { %v1902_v30 = vadd.f32 %v1900_v60, %v5785_v5 }
0x131e   : > { %4516 = vtanh.f32 %v1902_v30 }
0x1328   : > { %v4517_v42 = vpop.eup %4516 }
0x1329   : > { %v1904_v3 = vmul.f32 %v4517_v42, %v5805_v16 }
0x132b   : > { %1906 = vrot.lane.b32.xlu1 %v1904_v3, %s5164_s22 }
0x139d   : > { %v1907_v32 = vpop.permute.xlu1 %1906 }
0x139e   : > { %v1909_v7 = vsel %vm867_vm0, %v1907_v32, 0.0 }
0x139f   : > { %1910 = vadd.xlane.f32.xlu0 %v1909_v7 }
0x142c   : > { %v1911_v8 = vpop.xlane.xlu0 %1910 }
0x142d   : > { %v1912_v10 = vrot.slane %v1911_v8, 4 }
0x142f   : > { %v1913_v11 = vmax.f32 %v1911_v8, %v1912_v10 }
0x1431   : > { %v1914_v13 = vrot.slane %v1913_v11, 2 }
0x1433   : > { %v1915_v14 = vmax.f32 %v1913_v11, %v1914_v13 }
0x1435   : > { %v1916_v15 = vrot.slane %v1915_v14, 1 }
0x1437   : > { %v1917_v19 = vmax.f32 %v1915_v14, %v1916_v15 }
0x1439   : > { %v1918_v20 = vsub.f32 %v1911_v8, %v1917_v19 }
0x143b   : > { %v1919_v22 = vmul.f32 1.442695, %v1918_v20 }
0x143d   : > { %4518 = vpow2.f32 %v1919_v22 }
0x1447   : > { %v4519_v25 = vpop.eup %4518 }
0x1448   : > { %v1921_v28 = vrot.slane %v4519_v25, 4 }
0x144a   : > { %v1922_v29 = vadd.f32 %v4519_v25, %v1921_v28 }
0x144c   : > { %v1923_v33 = vrot.slane %v1922_v29, 2 }
0x144e   : > { %v1924_v34 = vadd.f32 %v1923_v33, %v1922_v29 }
0x1450   : > { %v1925_v35 = vrot.slane %v1924_v34, 1 }
0x1452   : > { %v1926_v37 = vadd.f32 %v1925_v35, %v1924_v34 }
0x1454   : > { %4520 = vrcp.f32 %v1926_v37 }
0x145e   : > { %v4521_v38 = vpop.eup %4520 }
0x145f   : > { %v1928_v39 = vmul.f32 %v4521_v38, %v4519_v25 }
0x1461   : > { %v1929_v40 = vmul.f32 %v1928_v39, %v5785_v5 }
0x1463   : > { %v1930_v41 = vsel %vm1261_vm2, %v1929_v40, 0.0 }
0x1464   : > { %v1931_v36 = vrot.slane %v1930_v41, 4 }
0x1466   : > { %v1932_v43 = vadd.f32 %v1931_v36, %v1930_v41 }
0x1468   : > { %v1933_v44 = vrot.slane %v1932_v43, 2 }
0x146a   : > { %v1934_v45 = vadd.f32 %v1933_v44, %v1932_v43 }
0x146c   : > { %v1935_v46 = vrot.slane %v1934_v45, 1 }
0x146e   : > { %v1936_v47 = vadd.f32 %v1935_v46, %v1934_v45 }
0x1470   : > { %1938 = vrot.lane.b32.xlu1 %v1936_v47, %s5164_s22 }
0x14e2   : > { %v1939_v48 = vpop.permute.xlu1 %1938 }
0x14e3   : > { %4014 = vmatmul.mubr.msk.f32.vlgmr.msra.gmra.mrb[10].mxu0 %vm867_vm0, %v1939_v48 }
0x14e4   : > { %4215 = vmatpush3.bf16.msra.mxu0 %v5757_v58  ;;  %4035 = vmatprep.mubr.msk.f32.mxu0 %vm5161_vm1, %v5159_v1 }
0x14e5   : > { %4216 = vmatprep.subr.bf16.mxu0 %v5160_v18 }
0x14e8   : > { %4218 = vmatpush3.bf16.msra.mxu0 %v5770_v61  ;;  %v2390_v61 = vadd.f32 %v2388_v56, %v5968_v55 }
0x14e9   : > { %4225 = vmatprep.subr.bf16.mxu0 %v5160_v18 }
0x14ea   : > { %v3801_v31 = vmul.f32 -1.442695, %v2390_v61 }
0x15b6   : > { %v2008_v49 = vpop.f32.mrb[10].mxu0 }
0x15b7   : > { %v2015_v50 = vrot.slane %v2008_v49, %v5781_v0  ;;  %v4015_v51 = vpop.f32.mrb[11].mxu0 }
0x15b9   : > { %v2016_v52 = vadd.f32 %v2015_v50, %v5785_v5 }
0x15bb   : > { %4522 = vtanh.f32 %v2016_v52 }
0x15bc   : > { %4524 = vtanh.f32 %v2390_v61 }
0x15bd   : > { %4526 = vpow2.f32 %v3801_v31 }
0x15c5   : > { %v4523_v53 = vpop.eup %4522 }
0x15c6   : > { %v2018_v54 = vmul.f32 %v4523_v53, %v5834_v9  ;;  %v4525_v17 = vpop.eup %4524 }
0x15c7   : > { %v4527_v29 = vpop.eup %4526 }
0x15c8   : > { %v2019_v58 = vsel %vm867_vm0, %v2018_v54, 0.0  ;;  %v2394_v34 = vadd.f32 1.0, %v4527_v29 }
0x15c9   : > { %2020 = vadd.xlane.f32.xlu1 %v2019_v58 }
0x15ca   : > { %4528 = vrcp.f32 %v2394_v34 }
0x15da   : > { %2404 = vrot.lane.b32.xlu1 %v4525_v17, %s5162_s13 }
0x1656   : > { %v2021_v9 = vpop.xlane.xlu1 %2020 }
0x1657   : > { %v2023_v57 = vsel %vm2022_vm3, -1e+18, %v2021_v9  ;;  %v2381_v9 = vld [vmem:[%s6343_s25] sm:$0xff]  ;;  %vm2372_vm3 = vcmp.eq.s32.totalorder %v5902_v27, 3  ;;  %s846_s25 = scalar_lea.vmem %s6345_s28, %s6351_s30 }
0x1658   : > { %v2024_v59 = vrot.slane %v2023_v57, 4 }
0x165a   : > { %v2025_v60 = vmax.f32 %v2023_v57, %v2024_v59  ;;  %v2405_v39 = vpop.permute.xlu1 %2404 }
0x165c   : > { %v2026_v30 = vrot.slane %v2025_v60, 2 }
0x165e   : > { %v2027_v42 = vmax.f32 %v2025_v60, %v2026_v30  ;;  %v2383_v60 = vld [vmem:[%s6344_s3 + $0x10] sm:$0xff]  ;;  %v2384_v30 = vld [vmem:[%s6344_s3 + $0x18] sm:$0xff] }
0x1660   : > { %v2028_v3 = vrot.slane %v2027_v42, 1 }
0x1662   : > { %v2029_v32 = vmax.f32 %v2027_v42, %v2028_v3  ;;  %v6026_v3 = vpack.c.bf16 %v2384_v30, %v2383_v60 }
0x1664   : > { %vm2030_vm4 = vcmp.ge.f32.partialorder %v2023_v57, %v2029_v32  ;;  %v2382_v57 = vld [vmem:[%s6344_s3 + $0x8] sm:$0xff] }
0x1665   : > { %v2031_v7 = vsel %vm2030_vm4, %v5778_v63, 8  ;;  %v6016_v59 = vpack.c.bf16 %v2382_v57, %v2381_v9 }
0x1666   : > { %v2032_v8 = vrot.slane %v2031_v7, 4 }
0x1668   : > { %vm2033_vm5 = vcmp.lt.s32.totalorder %v2031_v7, %v2032_v8 }
0x1669   : > { %v2034_v10 = vsel %vm2033_vm5, %v2031_v7, %v2032_v8  ;;  %vm2374_vm5 = vcmask 24576  }
0x166a   : > { %v2035_v11 = vrot.slane %v2034_v10, 2 }
0x166c   : > { %vm2036_vm6 = vcmp.lt.s32.totalorder %v2034_v10, %v2035_v11 }
0x166d   : > { %v2037_v2 = vsel %vm2036_vm6, %v2034_v10, %v2035_v11  ;;  %v3803_v11 = vld [vmem:[#allocation22] ss:$0 sm:$0xff] }
0x166e   : > { %v2038_v13 = vrot.slane %v2037_v2, 1 }
0x1670   : > { %vm2039_vm8 = vcmp.lt.s32.totalorder %v2037_v2, %v2038_v13 }
0x1671   : > { %v5981_v14 = vsel %vm2039_vm8, %v2037_v2, %v2038_v13 }
0x1672   : > { %vm2041_vm9 = vcmp.eq.s32.totalorder %v5778_v63, %v5981_v14  ;;  %v5989_v15 = vsel %vm2042_vm7, %v5981_v14, %v5916_v62  ;;  %v4529_v62 = vpop.eup %4528 }
0x1673   : > { %v2047_v19 = vsel %vm2041_vm9, %v5738_v23, 0.0  ;;  %v2407_v40 = vmul.f32 %v4529_v62, %v2405_v39 }
0x1674   : > { %v2048_v20 = vrot.slane %v2047_v19, 4 }
0x1675   : > { %2409 = vrot.lane.b32.xlu1 %v2407_v40, %s5163_s26 }
0x1676   : > { %v2049_v22 = vadd.f32 %v2048_v20, %v2047_v19 }
0x1678   : > { %v2050_v25 = vrot.slane %v2049_v22, 2 }
0x167a   : > { %v2051_v28 = vadd.f32 %v2050_v25, %v2049_v22 }
0x167c   : > { %v2052_v33 = vrot.slane %v2051_v28, 1 }
0x167e   : > { %v2053_v35 = vadd.f32 %v2052_v33, %v2051_v28 }
0x1680   : > { %v2124_v37 = vadd.f32 %v5948_v21, %v2053_v35 }
0x1682   : > { %v2125_v38 = vadd.f32 %v2124_v37, %v5742_v26  ;;  %v6000_v26 = vld [vmem:[#allocation26] sm:$0x1] }
0x1684   : > { %4530 = vtanh.f32 %v2125_v38  ;;  %v3798_v41 = vmul.f32 -1.442695, %v2125_v38 }
0x1686   : > { %4532 = vpow2.f32 %v3798_v41 }
0x168e   : > { %v4531_v23 = vpop.eup %4530 }
0x168f   : > { %2135 = vrot.lane.b32.xlu0 %v4531_v23, %s5162_s13 }
0x1690   : > { %v4533_v36 = vpop.eup %4532 }
0x1691   : > { %v2129_v43 = vadd.f32 1.0, %v4533_v36 }
0x1693   : > { %4534 = vrcp.f32 %v2129_v43 }
0x169d   : > { %v4535_v44 = vpop.eup %4534 }
0x169e   : > { %v2133_v21 = vmul.f32 %v4535_v44, %v5927_v4 }
0x16e7   : > { %v2410_v50 = vpop.permute.xlu1 %2409 }
0x1701   : > { %v2136_v45 = vpop.permute.xlu0 %2135 }
0x1702   : > { %v2138_v46 = vmul.f32 %v4535_v44, %v2136_v45 }
0x1704   : > { %2140 = vrot.lane.b32.xlu0 %v2138_v46, %s5163_s26 }
0x1708   : > { %2399 = vrot.lane.b32.xlu0 %v6000_v26, %s5163_s26 }
0x1776   : > { %v2141_v47 = vpop.permute.xlu0 %2140 }
0x1777   : > { %v2143_v48 = vadd.f32 %v2141_v47, %v2133_v21 }
0x1779   : > { %4536 = vtanh.f32 %v2143_v48 }
0x177a   : > { %v2400_v49 = vpop.permute.xlu0 %2399 }
0x177b   : > { %v2402_v51 = vmul.f32 %v4529_v62, %v2400_v49 }
0x177d   : > { %v2412_v52 = vadd.f32 %v2410_v50, %v2402_v51 }
0x177f   : > { %4538 = vtanh.f32 %v2412_v52 }
0x1783   : > { %v4537_v53 = vpop.eup %4536 }
0x1784   : > { %2146 = vrot.lane.b32.xlu0 %v4537_v53, %s5162_s13 }
0x1789   : > { %v4539_v54 = vpop.eup %4538 }
0x178a   : > { %2415 = vrot.lane.b32.xlu1 %v4539_v54, %s5162_s13 }
0x17f6   : > { %v2147_v58 = vpop.permute.xlu0 %2146 }
0x17f7   : > { %v2149_v56 = vmul.f32 %v4535_v44, %v2147_v58 }
0x17f9   : > { %2151 = vrot.lane.b32.xlu0 %v2149_v56, %s5163_s26 }
0x17fc   : > { %v2416_v61 = vpop.permute.xlu1 %2415 }
0x17fd   : > { %v2418_v4 = vmul.f32 %v4529_v62, %v2416_v61 }
0x17ff   : > { %v2423_v17 = vrot.slane %v2418_v4, %v5781_v0 }
0x1801   : > { %2424 = vrot.lane.b32.xlu1 %v2423_v17, %s5163_s26 }
0x186b   : > { %v2152_v42 = vpop.permute.xlu0 %2151 }
0x186c   : > { %4036 = vmatmul.mubr.msk.f32.vlgmr.msra.gmra.mrb[12].mxu0 %vm867_vm0, %v2152_v42 }
0x186d   : > { %4227 = vmatpush3.bf16.msra.mxu0 %v6016_v59  ;;  %4057 = vmatprep.mubr.msk.f32.mxu0 %vm5161_vm1, %v5159_v1 }
0x186e   : > { %4228 = vmatprep.subr.bf16.mxu0 %v5160_v18 }
0x1871   : > { %4230 = vmatpush3.bf16.msra.mxu0 %v6026_v3 }
0x1872   : > { %4237 = vmatprep.subr.bf16.mxu0 %v5160_v18 }
0x1873   : > { %v2425_v32 = vpop.permute.xlu1 %2424 }
0x1874   : > { %4058 = vmatmul.mubr.msk.f32.vlgmr.msra.gmra.mrb[14].mxu0 %vm867_vm0, %v2425_v32 }
0x1875   : > { %4239 = vmatpush3.bf16.msra.mxu0 %v6016_v59  ;;  %4079 = vmatprep.mubr.msk.f32.mxu0 %vm5161_vm1, %v5159_v1 }
0x1876   : > { %4240 = vmatprep.subr.bf16.mxu0 %v5160_v18 }
0x1879   : > { %4242 = vmatpush3.bf16.msra.mxu0 %v6026_v3 }
0x187a   : > { %4249 = vmatprep.subr.bf16.mxu0 %v5160_v18 }
0x193f   : > { %v2221_v7 = vpop.f32.mrb[12].mxu0 }
0x1940   : > { %v2228_v8 = vrot.slane %v2221_v7, %v5781_v0  ;;  %v4037_v10 = vpop.f32.mrb[13].mxu0 }
0x1942   : > { %2230 = vrot.lane.b32.xlu0 %v2228_v8, %s5163_s26 }
0x1946   : > { %2513 = vrot.lane.b32.xlu0 %v3803_v11, %s5164_s22 }
0x1947   : > { %v2494_v2 = vpop.f32.mrb[14].mxu0 }
0x1948   : > { %v2501_v31 = vrot.slane %v2494_v2, %v5781_v0  ;;  %v4059_v13 = vpop.f32.mrb[15].mxu0 }
0x194a   : > { %2503 = vrot.lane.b32.xlu1 %v2501_v31, %s5164_s22 }
0x19b4   : > { %v2231_v19 = vpop.permute.xlu0 %2230 }
0x19b5   : > { %v2233_v20 = vadd.f32 %v2231_v19, %v5785_v5 }
0x19b7   : > { %4540 = vtanh.f32 %v2233_v20 }
0x19b8   : > { %v6049_v33 = vpop.permute.xlu0 %2513 }
0x19bc   : > { %v2504_v22 = vpop.permute.xlu1 %2503 }
0x19bd   : > { %v2506_v25 = vadd.f32 %v2504_v22, %v5785_v5 }
0x19bf   : > { %4542 = vtanh.f32 %v2506_v25 }
0x19c1   : > { %v4541_v28 = vpop.eup %4540 }
0x19c2   : > { %v2235_v29 = vmul.f32 %v4541_v28, %v5805_v16 }
0x19c4   : > { %2237 = vrot.lane.b32.xlu1 %v2235_v29, %s5164_s22 }
0x19c9   : > { %v4543_v34 = vpop.eup %4542 }
0x19ca   : > { %v2516_v35 = vmul.f32 %v4543_v34, %v6049_v33 }
0x19cc   : > { %2518 = vrot.lane.b32.xlu0 %v2516_v35, %s5163_s26 }
0x1a36   : > { %v2238_v37 = vpop.permute.xlu1 %2237 }
0x1a37   : > { %v2240_v38 = vsel %vm867_vm0, %v2238_v37, 0.0 }
0x1a38   : > { %2241 = vadd.xlane.f32.xlu1 %v2240_v38 }
0x1a3e   : > { %v2519_v62 = vpop.permute.xlu0 %2518 }
0x1a3f   : > { %v2521_v39 = vsel %vm867_vm0, %v2519_v62, 0.0 }
0x1a40   : > { %2522 = vadd.xlane.f32.xlu0 %v2521_v39 }
0x1ac5   : > { %v2242_v40 = vpop.xlane.xlu1 %2241 }
0x1ac6   : > { %v2243_v23 = vrot.slane %v2242_v40, 4 }
0x1ac8   : > { %v2244_v16 = vmax.f32 %v2242_v40, %v2243_v23 }
0x1aca   : > { %v2245_v41 = vrot.slane %v2244_v16, 2 }
0x1acc   : > { %v2246_v36 = vmax.f32 %v2244_v16, %v2245_v41 }
0x1acd   : > { %v2523_v43 = vpop.xlane.xlu0 %2522 }
0x1ace   : > { %v2247_v44 = vrot.slane %v2246_v36, 1  ;;  %v2524_v45 = vrot.slane %v2523_v43, 4 }
0x1ad0   : > { %v2248_v46 = vmax.f32 %v2246_v36, %v2247_v44  ;;  %v2525_v21 = vmax.f32 %v2523_v43, %v2524_v45  ;;  %v2376_v36 = vld [vmem:[#allocation19] sm:$0xff]  ;;  %v2378_v45 = vld [vmem:[#allocation19 + $0x10] sm:$0xff] }
0x1ad2   : > { %v2249_v47 = vsub.f32 %v2242_v40, %v2248_v46  ;;  %v2526_v48 = vrot.slane %v2525_v21, 2  ;;  %v2379_v46 = vld [vmem:[#allocation19 + $0x18] sm:$0xff] }
0x1ad4   : > { %v2250_v49 = vmul.f32 1.442695, %v2249_v47  ;;  %v2527_v50 = vmax.f32 %v2525_v21, %v2526_v48  ;;  %v6065_v47 = vpack.c.bf16 %v2379_v46, %v2378_v45  ;;  %v2702_v46 = vrot.slane %v6000_v26, %v5781_v0 }
0x1ad6   : > { %4544 = vpow2.f32 %v2250_v49  ;;  %v2528_v51 = vrot.slane %v2527_v50, 1  ;;  %v3805_v49 = vld [vmem:[#allocation20] ss:$0 sm:$0xff] }
0x1ad8   : > { %v2529_v52 = vmax.f32 %v2527_v50, %v2528_v51 }
0x1ada   : > { %v2530_v53 = vsub.f32 %v2523_v43, %v2529_v52  ;;  %v2377_v43 = vld [vmem:[#allocation19 + $0x8] sm:$0xff] }
0x1adb   : > { %v6061_v44 = vpack.c.bf16 %v2377_v43, %v2376_v36 }
0x1adc   : > { %v2531_v54 = vmul.f32 1.442695, %v2530_v53 }
0x1ade   : > { %4546 = vpow2.f32 %v2531_v54 }
0x1ae0   : > { %v4545_v58 = vpop.eup %4544 }
0x1ae1   : > { %v2252_v56 = vrot.slane %v4545_v58, 4 }
0x1ae3   : > { %v2253_v61 = vadd.f32 %v4545_v58, %v2252_v56 }
0x1ae5   : > { %v2254_v4 = vrot.slane %v2253_v61, 2 }
0x1ae7   : > { %v2255_v17 = vadd.f32 %v2254_v4, %v2253_v61 }
0x1ae8   : > { %v4547_v9 = vpop.eup %4546 }
0x1ae9   : > { %v2533_v57 = vrot.slane %v4547_v9, 4  ;;  %v2256_v60 = vrot.slane %v2255_v17, 1 }
0x1aeb   : > { %v2257_v30 = vadd.f32 %v2256_v60, %v2255_v17  ;;  %v2534_v42 = vadd.f32 %v4547_v9, %v2533_v57 }
0x1aed   : > { %4548 = vrcp.f32 %v2257_v30  ;;  %v2535_v32 = vrot.slane %v2534_v42, 2 }
0x1aef   : > { %v2536_v7 = vadd.f32 %v2535_v32, %v2534_v42 }
0x1af1   : > { %v2537_v8 = vrot.slane %v2536_v7, 1 }
0x1af3   : > { %v2538_v10 = vadd.f32 %v2537_v8, %v2536_v7 }
0x1af5   : > { %4550 = vrcp.f32 %v2538_v10 }
0x1af7   : > { %v4549_v11 = vpop.eup %4548 }
0x1af8   : > { %v2259_v2 = vmul.f32 %v4549_v11, %v4545_v58 }
0x1afa   : > { %v2260_v31 = vmul.f32 %v2259_v2, %v5785_v5 }
0x1afc   : > { %v2261_v13 = vsel %vm1261_vm2, %v2260_v31, 0.0 }
0x1afd   : > { %v2262_v19 = vrot.slane %v2261_v13, 4 }
0x1aff   : > { %v4551_v20 = vpop.eup %4550  ;;  %v2263_v22 = vadd.f32 %v2262_v19, %v2261_v13 }
0x1b00   : > { %v2540_v25 = vmul.f32 %v4551_v20, %v4547_v9 }
0x1b01   : > { %v2264_v28 = vrot.slane %v2263_v22, 2 }
0x1b02   : > { %v2541_v29 = vmul.f32 %v2540_v25, %v5785_v5 }
0x1b03   : > { %v2265_v34 = vadd.f32 %v2264_v28, %v2263_v22 }
0x1b04   : > { %v2543_v35 = vsel %vm2542_vm10, %v2541_v29, 0.0 }
0x1b05   : > { %v2266_v37 = vrot.slane %v2265_v34, 1  ;;  %v2544_v38 = vrot.slane %v2543_v35, 4 }
0x1b07   : > { %v2267_v62 = vadd.f32 %v2266_v37, %v2265_v34  ;;  %v2545_v39 = vadd.f32 %v2544_v38, %v2543_v35 }
0x1b09   : > { %2269 = vrot.lane.b32.xlu0 %v2267_v62, %s5164_s22  ;;  %v2546_v40 = vrot.slane %v2545_v39, 2 }
0x1b0b   : > { %v2547_v23 = vadd.f32 %v2546_v40, %v2545_v39 }
0x1b0d   : > { %v2548_v16 = vrot.slane %v2547_v23, 1  ;;  %2640 = vrot.lane.b32.xlu0 %v3805_v49, %s5162_s13 }
0x1b0f   : > { %v2549_v41 = vadd.f32 %v2548_v16, %v2547_v23 }
0x1b11   : > { %2551 = vrot.lane.b32.xlu1 %v2549_v41, %s5163_s26 }
0x1b7b   : > { %v2270_v21 = vpop.permute.xlu0 %2269 }
0x1b7c   : > { %4047 = vmatmul.mubr.msk.f32.vlgmr.msra.gmra.mrb[12].mxu1 %vm867_vm0, %v2270_v21 }
0x1b7d   : > { %4233 = vmatpush3.bf16.msra.mxu1 %v6061_v44  ;;  %4068 = vmatprep.mubr.msk.f32.mxu1 %vm5161_vm1, %v5159_v1 }
0x1b7e   : > { %4234 = vmatprep.subr.bf16.mxu1 %v5160_v18 }
0x1b7f   : > { %v6087_v17 = vpop.permute.xlu0 %2640 }
0x1b81   : > { %4236 = vmatpush3.bf16.msra.mxu1 %v6065_v47 }
0x1b82   : > { %4243 = vmatprep.subr.bf16.mxu1 %v5160_v18 }
0x1b83   : > { %v2552_v48 = vpop.permute.xlu1 %2551 }
0x1b84   : > { %4069 = vmatmul.mubr.msk.f32.vlgmr.msra.gmra.mrb[14].mxu1 %vm867_vm0, %v2552_v48 }
0x1b85   : > { %4245 = vmatpush3.bf16.msra.mxu1 %v6061_v44  ;;  %4090 = vmatprep.mubr.msk.f32.mxu1 %vm5161_vm1, %v5159_v1 }
0x1b86   : > { %4246 = vmatprep.subr.bf16.mxu1 %v5160_v18 }
0x1b89   : > { %4248 = vmatpush3.bf16.msra.mxu1 %v6065_v47 }
0x1b8a   : > { %4255 = vmatprep.subr.bf16.mxu1 %v5160_v18 }
0x1c4f   : > { %v2339_v50 = vpop.f32.mrb[12].mxu1 }
0x1c50   : > { %v2346_v51 = vrot.slane %v2339_v50, %v5781_v0  ;;  %v4048_v52 = vpop.f32.mrb[13].mxu1 }
0x1c52   : > { %v6082_v53 = vadd.f32 %v2346_v51, %v5785_v5 }
0x1c57   : > { %v2621_v54 = vpop.f32.mrb[14].mxu1 }
0x1c58   : > { %v2628_v58 = vrot.slane %v2621_v54, %v5781_v0  ;;  %v4070_v56 = vpop.f32.mrb[15].mxu1 }
0x1c5a   : > { %2630 = vrot.lane.b32.xlu1 %v2628_v58, %s5162_s13 }
0x1ccc   : > { %v2631_v61 = vpop.permute.xlu1 %2630 }
0x1ccd   : > { %v2633_v4 = vadd.f32 %v2631_v61, %v5785_v5 }
0x1ccf   : > { %4552 = vtanh.f32 %v2633_v4 }
0x1cd9   : > { %v4553_v9 = vpop.eup %4552 }
0x1cda   : > { %v2643_v57 = vmul.f32 %v4553_v9, %v6087_v17 }
0x1cdc   : > { %2645 = vrot.lane.b32.xlu1 %v2643_v57, %s5162_s13 }
0x1d4e   : > { %v2646_v60 = vpop.permute.xlu1 %2645 }
0x1d4f   : > { %v2648_v30 = vsel %vm867_vm0, %v2646_v60, 0.0 }
0x1d50   : > { %2649 = vadd.xlane.f32.xlu0 %v2648_v30 }
0x1ddd   : > { %v2650_v42 = vpop.xlane.xlu0 %2649 }
0x1dde   : > { %v2651_v32 = vrot.slane %v2650_v42, 4 }
0x1de0   : > { %v2652_v7 = vmax.f32 %v2650_v42, %v2651_v32 }
0x1de2   : > { %v2653_v8 = vrot.slane %v2652_v7, 2 }
0x1de4   : > { %v2654_v10 = vmax.f32 %v2652_v7, %v2653_v8 }
0x1de6   : > { %v2655_v11 = vrot.slane %v2654_v10, 1 }
0x1de8   : > { %v2656_v2 = vmax.f32 %v2654_v10, %v2655_v11 }
0x1dea   : > { %v2657_v31 = vsub.f32 %v2650_v42, %v2656_v2 }
0x1dec   : > { %v2658_v13 = vmul.f32 1.442695, %v2657_v31 }
0x1dee   : > { %4554 = vpow2.f32 %v2658_v13 }
0x1df8   : > { %v4555_v19 = vpop.eup %4554 }
0x1df9   : > { %v2660_v20 = vrot.slane %v4555_v19, 4 }
0x1dfb   : > { %v2661_v22 = vadd.f32 %v4555_v19, %v2660_v20 }
0x1dfd   : > { %v2662_v25 = vrot.slane %v2661_v22, 2 }
0x1dff   : > { %v2663_v28 = vadd.f32 %v2662_v25, %v2661_v22 }
0x1e01   : > { %v2664_v29 = vrot.slane %v2663_v28, 1 }
0x1e03   : > { %v2665_v34 = vadd.f32 %v2664_v29, %v2663_v28 }
0x1e05   : > { %4556 = vrcp.f32 %v2665_v34 }
0x1e0f   : > { %v4557_v35 = vpop.eup %4556 }
0x1e10   : > { %v2667_v37 = vmul.f32 %v4557_v35, %v4555_v19 }
0x1e12   : > { %v2684_v38 = vmul.f32 %v2667_v37, %v5740_v24  ;;  %v6094_v62 = vmul.f32 %v2667_v37, %v5787_v6 }
0x1e14   : > { %v2685_v39 = vrot.slane %v2684_v38, 4 }
0x1e16   : > { %v2686_v40 = vadd.f32 %v2685_v39, %v2684_v38 }
0x1e18   : > { %v2687_v23 = vrot.slane %v2686_v40, 2 }
0x1e1a   : > { %v2688_v16 = vadd.f32 %v2687_v23, %v2686_v40 }
0x1e1c   : > { %v2689_v41 = vrot.slane %v2688_v16, 1 }
0x1e1e   : > { %v2690_v36 = vadd.f32 %v2689_v41, %v2688_v16 }
0x1e20   : > { %v2691_v43 = vadd.f32 %v2690_v36, %v5968_v55 }
0x1e22   : > { %4558 = vtanh.f32 %v2691_v43  ;;  %v3806_v21 = vmul.f32 -1.442695, %v2691_v43 }
0x1e24   : > { %4560 = vpow2.f32 %v3806_v21 }
0x1e2c   : > { %v4559_v45 = vpop.eup %4558 }
0x1e2d   : > { %2708 = vrot.lane.b32.xlu1 %v4559_v45, %s5162_s13 }
0x1e2e   : > { %v4561_v48 = vpop.eup %4560 }
0x1e2f   : > { %v2695_v49 = vadd.f32 1.0, %v4561_v48 }
0x1e31   : > { %2703 = vrot.lane.b32.xlu1 %v2702_v46, %s5163_s26  ;;  %4562 = vrcp.f32 %v2695_v49 }
0x1e3b   : > { %v4563_v50 = vpop.eup %4562 }
0x1e9f   : > { %v2709_v51 = vpop.permute.xlu1 %2708 }
0x1ea0   : > { %v2711_v52 = vmul.f32 %v4563_v50, %v2709_v51 }
0x1ea2   : > { %2713 = vrot.lane.b32.xlu1 %v2711_v52, %s5163_s26 }
0x1ea3   : > { %v6102_v54 = vpop.permute.xlu1 %2703 }
0x1ea4   : > { %v2706_v58 = vmul.f32 %v4563_v50, %v6102_v54 }
0x1f14   : > { %v2714_v56 = vpop.permute.xlu1 %2713 }
0x1f15   : > { %v2716_v26 = vadd.f32 %v2714_v56, %v2706_v58 }
0x1f17   : > { %4564 = vtanh.f32 %v2716_v26 }
0x1f21   : > { %v4565_v61 = vpop.eup %4564 }
0x1f22   : > { %2719 = vrot.lane.b32.xlu1 %v4565_v61, %s5162_s13 }
0x1f94   : > { %v2720_v4 = vpop.permute.xlu1 %2719 }
0x1f95   : > { %v2722_v9 = vmul.f32 %v4563_v50, %v2720_v4 }
0x1f97   : > { %2724 = vrot.lane.b32.xlu1 %v2722_v9, %s5163_s26 }
0x2009   : > { %v2725_v57 = vpop.permute.xlu1 %2724 }
0x200a   : > { %4080 = vmatmul.mubr.msk.f32.vlgmr.msra.gmra.mrb[16].mxu0 %vm867_vm0, %v2725_v57 }
0x200b   : > { %4251 = vmatpush3.bf16.msra.mxu0 %v6016_v59  ;;  %4101 = vmatprep.mubr.msk.f32.mxu0 %vm5161_vm1, %v5159_v1 }
0x200c   : > { %4252 = vmatprep.subr.bf16.mxu0 %v5160_v18 }
0x200f   : > { %4254 = vmatpush3.bf16.msra.mxu0 %v6026_v3 }
0x2010   : > { %4261 = vmatprep.subr.bf16.mxu0 %v5160_v18 }
0x20dd   : > { %v2794_v60 = vpop.f32.mrb[16].mxu0 }
0x20de   : > { %v2801_v30 = vrot.slane %v2794_v60, %v5781_v0  ;;  %v4081_v42 = vpop.f32.mrb[17].mxu0 }
0x20e0   : > { %2803 = vrot.lane.b32.xlu1 %v2801_v30, %s5164_s22 }
0x2152   : > { %v2804_v32 = vpop.permute.xlu1 %2803 }
0x2153   : > { %v2806_v7 = vadd.f32 %v2804_v32, %v5785_v5 }
0x2155   : > { %4566 = vtanh.f32 %v2806_v7 }
0x215f   : > { %v4567_v8 = vpop.eup %4566 }
0x2160   : > { %v2808_v10 = vmul.f32 %v4567_v8, %v6049_v33 }
0x2162   : > { %2810 = vrot.lane.b32.xlu1 %v2808_v10, %s5163_s26 }
0x21d4   : > { %v2811_v11 = vpop.permute.xlu1 %2810 }
0x21d5   : > { %v2813_v2 = vsel %vm867_vm0, %v2811_v11, 0.0 }
0x21d6   : > { %2814 = vadd.xlane.f32.xlu1 %v2813_v2 }
0x2263   : > { %v2815_v31 = vpop.xlane.xlu1 %2814 }
0x2264   : > { %v2816_v13 = vrot.slane %v2815_v31, 4 }
0x2266   : > { %v2817_v19 = vmax.f32 %v2815_v31, %v2816_v13 }
0x2268   : > { %v2818_v20 = vrot.slane %v2817_v19, 2 }
0x226a   : > { %v2819_v22 = vmax.f32 %v2817_v19, %v2818_v20 }
0x226c   : > { %v2820_v25 = vrot.slane %v2819_v22, 1 }
0x226e   : > { %v2821_v28 = vmax.f32 %v2819_v22, %v2820_v25 }
0x2270   : > { %v2822_v29 = vsub.f32 %v2815_v31, %v2821_v28 }
0x2272   : > { %v2823_v34 = vmul.f32 1.442695, %v2822_v29 }
0x2274   : > { %4568 = vpow2.f32 %v2823_v34 }
0x227e   : > { %v4569_v35 = vpop.eup %4568 }
0x227f   : > { %v2825_v37 = vrot.slane %v4569_v35, 4 }
0x2281   : > { %v2826_v38 = vadd.f32 %v4569_v35, %v2825_v37 }
0x2283   : > { %v2827_v39 = vrot.slane %v2826_v38, 2 }
0x2285   : > { %v2828_v40 = vadd.f32 %v2827_v39, %v2826_v38 }
0x2287   : > { %v2829_v23 = vrot.slane %v2828_v40, 1 }
0x2289   : > { %v2830_v16 = vadd.f32 %v2829_v23, %v2828_v40 }
0x228b   : > { %4570 = vrcp.f32 %v2830_v16 }
0x2295   : > { %v4571_v41 = vpop.eup %4570 }
0x2296   : > { %v2832_v36 = vmul.f32 %v4571_v41, %v4569_v35 }
0x2298   : > { %v2833_v43 = vmul.f32 %v2832_v36, %v5785_v5 }
0x229a   : > { %v2834_v45 = vsel %vm2542_vm10, %v2833_v43, 0.0 }
0x229b   : > { %v2835_v46 = vrot.slane %v2834_v45, 4 }
0x229d   : > { %v2836_v21 = vadd.f32 %v2835_v46, %v2834_v45 }
0x229f   : > { %v2837_v48 = vrot.slane %v2836_v21, 2 }
0x22a1   : > { %v2838_v49 = vadd.f32 %v2837_v48, %v2836_v21 }
0x22a3   : > { %v2839_v50 = vrot.slane %v2838_v49, 1 }
0x22a5   : > { %v2840_v51 = vadd.f32 %v2839_v50, %v2838_v49 }
0x22a7   : > { %2842 = vrot.lane.b32.xlu0 %v2840_v51, %s5163_s26 }
0x2319   : > { %v2843_v52 = vpop.permute.xlu0 %2842 }
0x231a   : > { %4091 = vmatmul.mubr.msk.f32.vlgmr.msra.gmra.mrb[16].mxu1 %vm867_vm0, %v2843_v52 }
0x231b   : > { %4257 = vmatpush3.bf16.msra.mxu1 %v6061_v44  ;;  %4112 = vmatprep.mubr.msk.f32.mxu1 %vm5161_vm1, %v5159_v1 }
0x231c   : > { %4258 = vmatprep.subr.bf16.mxu1 %v5160_v18 }
0x231f   : > { %4260 = vmatpush3.bf16.msra.mxu1 %v6065_v47 }
0x2320   : > { %4267 = vmatprep.subr.bf16.mxu1 %v5160_v18 }
0x23ed   : > { %v2912_v58 = vpop.f32.mrb[16].mxu1 }
0x23ee   : > { %v2919_v56 = vrot.slane %v2912_v58, %v5781_v0  ;;  %v4092_v26 = vpop.f32.mrb[17].mxu1 }
0x23f0   : > { %2921 = vrot.lane.b32.xlu0 %v2919_v56, %s5162_s13 }
0x2462   : > { %v2922_v61 = vpop.permute.xlu0 %2921 }
0x2463   : > { %v2924_v4 = vadd.f32 %v2922_v61, %v5785_v5 }
0x2465   : > { %4572 = vtanh.f32 %v2924_v4 }
0x246f   : > { %v4573_v9 = vpop.eup %4572 }
0x2470   : > { %v2926_v57 = vmul.f32 %v4573_v9, %v6087_v17 }
0x2472   : > { %2928 = vrot.lane.b32.xlu0 %v2926_v57, %s5162_s13 }
0x24e4   : > { %v2929_v60 = vpop.permute.xlu0 %2928 }
0x24e5   : > { %v2931_v30 = vsel %vm867_vm0, %v2929_v60, 0.0 }
0x24e6   : > { %2932 = vadd.xlane.f32.xlu0 %v2931_v30 }
0x2573   : > { %v2933_v42 = vpop.xlane.xlu0 %2932 }
0x2574   : > { %v2934_v32 = vrot.slane %v2933_v42, 4 }
0x2576   : > { %v2935_v7 = vmax.f32 %v2933_v42, %v2934_v32 }
0x2578   : > { %v2936_v8 = vrot.slane %v2935_v7, 2 }
0x257a   : > { %v2937_v10 = vmax.f32 %v2935_v7, %v2936_v8 }
0x257c   : > { %v2938_v11 = vrot.slane %v2937_v10, 1 }
0x257e   : > { %v2939_v2 = vmax.f32 %v2937_v10, %v2938_v11 }
0x2580   : > { %v2940_v31 = vsub.f32 %v2933_v42, %v2939_v2 }
0x2582   : > { %v2941_v13 = vmul.f32 1.442695, %v2940_v31 }
0x2584   : > { %4574 = vpow2.f32 %v2941_v13 }
0x258e   : > { %v4575_v19 = vpop.eup %4574 }
0x258f   : > { %v2943_v20 = vrot.slane %v4575_v19, 4 }
0x2591   : > { %v2944_v22 = vadd.f32 %v4575_v19, %v2943_v20 }
0x2593   : > { %v2945_v25 = vrot.slane %v2944_v22, 2 }
0x2595   : > { %v2946_v28 = vadd.f32 %v2945_v25, %v2944_v22 }
0x2597   : > { %v2947_v29 = vrot.slane %v2946_v28, 1 }
0x2599   : > { %v2948_v34 = vadd.f32 %v2947_v29, %v2946_v28 }
0x259b   : > { %4576 = vrcp.f32 %v2948_v34 }
0x25a5   : > { %v4577_v35 = vpop.eup %4576 }
0x25a6   : > { %v2950_v37 = vmul.f32 %v4577_v35, %v4575_v19 }
0x25a8   : > { %v2966_v38 = vmul.f32 %v2950_v37, %v5740_v24  ;;  %v6138_v39 = vmul.f32 %v2950_v37, %v5787_v6 }
0x25aa   : > { %v2967_v40 = vrot.slane %v2966_v38, 4 }
0x25ac   : > { %v2968_v23 = vadd.f32 %v2967_v40, %v2966_v38 }
0x25ae   : > { %v2969_v16 = vrot.slane %v2968_v23, 2 }
0x25b0   : > { %v2970_v41 = vadd.f32 %v2969_v16, %v2968_v23 }
0x25b2   : > { %v2971_v36 = vrot.slane %v2970_v41, 1 }
0x25b4   : > { %v2972_v43 = vadd.f32 %v2971_v36, %v2970_v41 }
0x25b6   : > { %v2973_v45 = vadd.f32 %v2972_v43, %v5968_v55 }
0x25b8   : > { %4578 = vtanh.f32 %v2973_v45  ;;  %v3809_v21 = vmul.f32 -1.442695, %v2973_v45 }
0x25ba   : > { %4580 = vpow2.f32 %v3809_v21 }
0x25c2   : > { %v4579_v46 = vpop.eup %4578 }
0x25c3   : > { %2983 = vrot.lane.b32.xlu1 %v4579_v46, %s5162_s13 }
0x25c4   : > { %v4581_v48 = vpop.eup %4580 }
0x25c5   : > { %v2977_v49 = vadd.f32 1.0, %v4581_v48 }
0x25c7   : > { %4582 = vrcp.f32 %v2977_v49 }
0x25d1   : > { %v4583_v50 = vpop.eup %4582 }
0x25d2   : > { %v2981_v58 = vmul.f32 %v4583_v50, %v6102_v54 }
0x2635   : > { %v2984_v51 = vpop.permute.xlu1 %2983 }
0x2636   : > { %v2986_v52 = vmul.f32 %v4583_v50, %v2984_v51 }
0x2638   : > { %2988 = vrot.lane.b32.xlu1 %v2986_v52, %s5163_s26 }
0x26aa   : > { %v2989_v56 = vpop.permute.xlu1 %2988 }
0x26ab   : > { %v2991_v26 = vadd.f32 %v2989_v56, %v2981_v58 }
0x26ad   : > { %4584 = vtanh.f32 %v2991_v26 }
0x26b7   : > { %v4585_v61 = vpop.eup %4584 }
0x26b8   : > { %2994 = vrot.lane.b32.xlu1 %v4585_v61, %s5162_s13 }
0x272a   : > { %v2995_v4 = vpop.permute.xlu1 %2994 }
0x272b   : > { %v2997_v9 = vmul.f32 %v4583_v50, %v2995_v4 }
0x272d   : > { %2999 = vrot.lane.b32.xlu1 %v2997_v9, %s5163_s26 }
0x279f   : > { %v3000_v57 = vpop.permute.xlu1 %2999 }
0x27a0   : > { %4102 = vmatmul.mubr.msk.f32.vlgmr.msra.gmra.mrb[18].mxu0 %vm867_vm0, %v3000_v57 }
0x27a1   : > { %4263 = vmatpush3.bf16.msra.mxu0 %v6016_v59  ;;  %4123 = vmatprep.mubr.msk.f32.mxu0 %vm5161_vm1, %v5159_v1 }
0x27a2   : > { %4264 = vmatprep.subr.bf16.mxu0 %v5160_v18 }
0x27a5   : > { %4266 = vmatpush3.bf16.msra.mxu0 %v6026_v3 }
0x2873   : > { %v3069_v60 = vpop.f32.mrb[18].mxu0 }
0x2874   : > { %v3076_v30 = vrot.slane %v3069_v60, %v5781_v0  ;;  %v4103_v42 = vpop.f32.mrb[19].mxu0 }
0x2876   : > { %3078 = vrot.lane.b32.xlu0 %v3076_v30, %s5164_s22 }
0x28e8   : > { %v3079_v32 = vpop.permute.xlu0 %3078 }
0x28e9   : > { %v3081_v7 = vadd.f32 %v3079_v32, %v5785_v5 }
0x28eb   : > { %4586 = vtanh.f32 %v3081_v7 }
0x28f5   : > { %v4587_v8 = vpop.eup %4586 }
0x28f6   : > { %v3083_v59 = vmul.f32 %v4587_v8, %v6049_v33 }
0x28f8   : > { %3085 = vrot.lane.b32.xlu1 %v3083_v59, %s5163_s26 }
0x296a   : > { %v3086_v10 = vpop.permute.xlu1 %3085 }
0x296b   : > { %v3088_v11 = vsel %vm867_vm0, %v3086_v10, 0.0 }
0x296c   : > { %3089 = vadd.xlane.f32.xlu1 %v3088_v11 }
0x29f9   : > { %v3090_v3 = vpop.xlane.xlu1 %3089 }
0x29fa   : > { %v3091_v2 = vrot.slane %v3090_v3, 4 }
0x29fc   : > { %v3092_v31 = vmax.f32 %v3090_v3, %v3091_v2 }
0x29fe   : > { %v3093_v13 = vrot.slane %v3092_v31, 2 }
0x2a00   : > { %v3094_v19 = vmax.f32 %v3092_v31, %v3093_v13 }
0x2a02   : > { %v3095_v20 = vrot.slane %v3094_v19, 1 }
0x2a04   : > { %v3096_v22 = vmax.f32 %v3094_v19, %v3095_v20 }
0x2a06   : > { %v3097_v25 = vsub.f32 %v3090_v3, %v3096_v22 }
0x2a08   : > { %v3098_v28 = vmul.f32 1.442695, %v3097_v25 }
0x2a0a   : > { %4588 = vpow2.f32 %v3098_v28 }
0x2a14   : > { %v4589_v29 = vpop.eup %4588 }
0x2a15   : > { %v3100_v34 = vrot.slane %v4589_v29, 4 }
0x2a17   : > { %v3101_v35 = vadd.f32 %v4589_v29, %v3100_v34 }
0x2a19   : > { %v3102_v37 = vrot.slane %v3101_v35, 2 }
0x2a1b   : > { %v3103_v38 = vadd.f32 %v3102_v37, %v3101_v35 }
0x2a1d   : > { %v3104_v40 = vrot.slane %v3103_v38, 1 }
0x2a1f   : > { %v3105_v23 = vadd.f32 %v3104_v40, %v3103_v38 }
0x2a21   : > { %4590 = vrcp.f32 %v3105_v23 }
0x2a2b   : > { %v4591_v16 = vpop.eup %4590 }
0x2a2c   : > { %v3107_v41 = vmul.f32 %v4591_v16, %v4589_v29 }
0x2a2e   : > { %v3108_v36 = vmul.f32 %v3107_v41, %v5785_v5 }
0x2a30   : > { %v3109_v43 = vsel %vm2542_vm10, %v3108_v36, 0.0 }
0x2a31   : > { %v3110_v45 = vrot.slane %v3109_v43, 4 }
0x2a33   : > { %v3111_v46 = vadd.f32 %v3110_v45, %v3109_v43 }
0x2a35   : > { %v3112_v21 = vrot.slane %v3111_v46, 2 }
0x2a37   : > { %v3113_v48 = vadd.f32 %v3112_v21, %v3111_v46 }
0x2a39   : > { %v3114_v49 = vrot.slane %v3113_v48, 1 }
0x2a3b   : > { %v3115_v50 = vadd.f32 %v3114_v49, %v3113_v48 }
0x2a3d   : > { %3117 = vrot.lane.b32.xlu0 %v3115_v50, %s5163_s26 }
0x2aaf   : > { %v3118_v51 = vpop.permute.xlu0 %3117 }
0x2ab0   : > { %4113 = vmatmul.mubr.msk.f32.vlgmr.msra.gmra.mrb[18].mxu1 %vm867_vm0, %v3118_v51 }
0x2ab1   : > { %4269 = vmatpush3.bf16.msra.mxu1 %v6061_v44  ;;  %4134 = vmatprep.mubr.msk.f32.mxu1 %vm5161_vm1, %v5159_v1  ;;  %vm2669_vm1 = vcmask 7168  }
0x2ab2   : > { %4270 = vmatprep.subr.bf16.mxu1 %v5160_v18 }
0x2ab5   : > { %4272 = vmatpush3.bf16.msra.mxu1 %v6065_v47 }
0x2b83   : > { %v3187_v52 = vpop.f32.mrb[18].mxu1 }
0x2b84   : > { %v3194_v58 = vrot.slane %v3187_v52, %v5781_v0  ;;  %v4114_v56 = vpop.f32.mrb[19].mxu1 }
0x2b86   : > { %3196 = vrot.lane.b32.xlu0 %v3194_v58, %s5162_s13 }
0x2bf8   : > { %v3197_v26 = vpop.permute.xlu0 %3196 }
0x2bf9   : > { %v3199_v61 = vadd.f32 %v3197_v26, %v5785_v5 }
0x2bfb   : > { %4592 = vtanh.f32 %v3199_v61  ;;  %v5165_v61 = vmov 0  }
0x2bfc   : > { %4474 = vset.pattern.permute.xlu1 %v5165_v61  ;;  %4475 = vset.pattern.permute.xlu0 %v5165_v61 }
0x2c05   : > { %v4593_v4 = vpop.eup %4592 }
0x2c06   : > { %v3201_v44 = vmul.f32 %v4593_v4, %v6087_v17 }
0x2c08   : > { %3203 = vrot.lane.b32.xlu0 %v3201_v44, %s5162_s13 }
0x2c7a   : > { %v3204_v1 = vpop.permute.xlu0 %3203 }
0x2c7b   : > { %v3206_v18 = vsel %vm867_vm0, %v3204_v1, 0.0  ;;  %v2670_v1 = vsel %vm2669_vm1, %v6094_v62, 0.0 }
0x2c7c   : > { %3207 = vadd.xlane.f32.xlu0 %v3206_v18  ;;  %v2671_v18 = vrot.slane %v2670_v1, 4 }
0x2d09   : > { %v3208_v47 = vpop.xlane.xlu0 %3207 }
0x2d0a   : > { %v3209_v9 = vrot.slane %v3208_v47, 4 }
0x2d0c   : > { %v3210_v57 = vmax.f32 %v3208_v47, %v3209_v9 }
0x2d0e   : > { %v3211_v60 = vrot.slane %v3210_v57, 2 }
0x2d10   : > { %v3212_v30 = vmax.f32 %v3210_v57, %v3211_v60 }
0x2d12   : > { %v3213_v42 = vrot.slane %v3212_v30, 1 }
0x2d14   : > { %v3214_v32 = vmax.f32 %v3212_v30, %v3213_v42  ;;  %v4620_v30 = vld [vmem:[#allocation8] ss:$0 sm:$0xff] }
0x2d16   : > { %v3215_v7 = vsub.f32 %v3208_v47, %v3214_v32  ;;  %v2672_v32 = vadd.f32 %v2671_v18, %v2670_v1 }
0x2d18   : > { %v3216_v8 = vmul.f32 1.442695, %v3215_v7 }
0x2d1a   : > { %4594 = vpow2.f32 %v3216_v8  ;;  %v2673_v8 = vrot.slane %v2672_v32, 2 }
0x2d24   : > { %v4595_v59 = vpop.eup %4594 }
0x2d25   : > { %v3218_v10 = vrot.slane %v4595_v59, 4 }
0x2d27   : > { %v3219_v11 = vadd.f32 %v4595_v59, %v3218_v10 }
0x2d29   : > { %v3220_v3 = vrot.slane %v3219_v11, 2 }
0x2d2b   : > { %v3221_v2 = vadd.f32 %v3220_v3, %v3219_v11 }
0x2d2d   : > { %v3222_v31 = vrot.slane %v3221_v2, 1 }
0x2d2f   : > { %v3223_v13 = vadd.f32 %v3222_v31, %v3221_v2  ;;  %v6193_v31 = vld [vmem:[#allocation2] sm:$0x1] }
0x2d31   : > { %4596 = vrcp.f32 %v3223_v13 }
0x2d3b   : > { %v4597_v19 = vpop.eup %4596 }
0x2d3c   : > { %v3225_v20 = vmul.f32 %v4597_v19, %v4595_v59  ;;  %v2674_v59 = vadd.f32 %v2673_v8, %v2672_v32 }
0x2d3e   : > { %v3241_v22 = vmul.f32 %v3225_v20, %v5740_v24  ;;  %v3226_v25 = vmul.f32 %v3225_v20, %v5787_v6  ;;  %v2675_v62 = vrot.slane %v2674_v59, 1 }
0x2d40   : > { %v3242_v28 = vrot.slane %v3241_v22, 4  ;;  %v3227_v9 = vsel %vm2669_vm1, %v3226_v25, 0.0  ;;  %v2676_v3 = vadd.f32 %v2675_v62, %v2674_v59 }
0x2d41   : > { %v3228_v7 = vrot.slane %v3227_v9, 4 }
0x2d42   : > { %v3243_v29 = vadd.f32 %v3242_v28, %v3241_v22  ;;  %v2677_v13 = vadd.f32 %v2676_v3, %v6193_v31  ;;  %v2044_v28 = vsel %vm2041_vm9, 1.0, %v5976_v12 }
0x2d43   : > { %vm2353_vm2 = vcmp.gt.f32.partialorder %v2044_v28, 0.0 }
0x2d44   : > { %v3244_v34 = vrot.slane %v3243_v29, 2 }
0x2d46   : > { %v3245_v35 = vadd.f32 %v3244_v34, %v3243_v29 }
0x2d48   : > { %v3246_v37 = vrot.slane %v3245_v35, 1 }
0x2d4a   : > { %v3247_v38 = vadd.f32 %v3246_v37, %v3245_v35 }
0x2d4c   : > { %v3248_v40 = vadd.f32 %v3247_v38, %v5968_v55 }
0x2d4e   : > { %4598 = vtanh.f32 %v3248_v40  ;;  %v3812_v16 = vmul.f32 -1.442695, %v3248_v40 }
0x2d50   : > { %4600 = vpow2.f32 %v3812_v16 }
0x2d58   : > { %v4599_v23 = vpop.eup %4598 }
0x2d59   : > { %3258 = vrot.lane.b32.xlu1 %v4599_v23, %s5162_s13 }
0x2d5a   : > { %v4601_v41 = vpop.eup %4600 }
0x2d5b   : > { %v3252_v36 = vadd.f32 1.0, %v4601_v41 }
0x2d5d   : > { %4602 = vrcp.f32 %v3252_v36 }
0x2d67   : > { %v4603_v24 = vpop.eup %4602 }
0x2d68   : > { %v3256_v46 = vmul.f32 %v4603_v24, %v6102_v54 }
0x2dcb   : > { %v3259_v43 = vpop.permute.xlu1 %3258 }
0x2dcc   : > { %v3261_v45 = vmul.f32 %v4603_v24, %v3259_v43 }
0x2dce   : > { %3263 = vrot.lane.b32.xlu1 %v3261_v45, %s5163_s26 }
0x2e40   : > { %v3264_v21 = vpop.permute.xlu1 %3263 }
0x2e41   : > { %v3266_v48 = vadd.f32 %v3264_v21, %v3256_v46 }
0x2e43   : > { %4604 = vtanh.f32 %v3266_v48 }
0x2e4d   : > { %v4605_v55 = vpop.eup %4604 }
0x2e4e   : > { %3269 = vrot.lane.b32.xlu1 %v4605_v55, %s5162_s13 }
0x2ec0   : > { %v3270_v49 = vpop.permute.xlu1 %3269 }
0x2ec1   : > { %v3272_v50 = vmul.f32 %v4603_v24, %v3270_v49 }
0x2ec3   : > { %3274 = vrot.lane.b32.xlu0 %v3272_v50, %s5163_s26 }
0x2f35   : > { %v3275_v51 = vpop.permute.xlu0 %3274 }
0x2f36   : > { %4124 = vmatmul.mubr.msk.f32.vlgmr.msra.gmra.mrb[20].mxu0 %vm867_vm0, %v3275_v51 }
0x3009   : > { %v3344_v52 = vpop.f32.mrb[20].mxu0 }
0x300a   : > { %v3351_v58 = vrot.slane %v3344_v52, %v5781_v0  ;;  %v4125_v56 = vpop.f32.mrb[21].mxu0 }
0x300c   : > { %3353 = vrot.lane.b32.xlu1 %v3351_v58, %s5164_s22 }
0x307e   : > { %v3354_v54 = vpop.permute.xlu1 %3353 }
0x307f   : > { %v3356_v26 = vadd.f32 %v3354_v54, %v5785_v5 }
0x3081   : > { %4606 = vtanh.f32 %v3356_v26 }
0x3082   : > { %4608 = vtanh.f32 %v6082_v53  ;;  %v3229_v53 = vadd.f32 %v3228_v7, %v3227_v9 }
0x3084   : > { %v3230_v10 = vrot.slane %v3229_v53, 2 }
0x3086   : > { %v3231_v11 = vadd.f32 %v3230_v10, %v3229_v53 }
0x3088   : > { %v3232_v2 = vrot.slane %v3231_v11, 1 }
0x308a   : > { %v3233_v19 = vadd.f32 %v3232_v2, %v3231_v11  ;;  %v2952_v11 = vsel %vm2669_vm1, %v6138_v39, 0.0 }
0x308b   : > { %v4607_v4 = vpop.eup %4606  ;;  %v2953_v3 = vrot.slane %v2952_v11, 4 }
0x308c   : > { %v3358_v44 = vmul.f32 %v4607_v4, %v6049_v33  ;;  %v4609_v47 = vpop.eup %4608  ;;  %v3234_v20 = vadd.f32 %v3233_v19, %v6193_v31 }
0x308d   : > { %v2349_v42 = vmul.f32 %v4620_v30, %v4609_v47 }
0x308e   : > { %3360 = vrot.lane.b32.xlu1 %v3358_v44, %s5163_s26 }
0x308f   : > { %v2350_v33 = vsel %vm867_vm0, %v2349_v42, 0.0 }
0x3100   : > { %v3361_v57 = vpop.permute.xlu1 %3360 }
0x3101   : > { %v3363_v60 = vsel %vm867_vm0, %v3361_v57, 0.0 }
0x3102   : > { %3364 = vadd.xlane.f32.xlu1 %v3363_v60 }
0x3106   : > { %2351 = vadd.xlane.f32.xlu1 %v2350_v33 }
0x3117   : > { %2680 = vperm.xlu1 %4474, %v2677_v13  }
0x311b   : > { %3237 = vperm.xlu1 %4474, %v3234_v20  }
0x318f   : > { %v3365_v22 = vpop.xlane.xlu1 %3364 }
0x3190   : > { %v3366_v25 = vrot.slane %v3365_v22, 4 }
0x3192   : > { %v3367_v29 = vmax.f32 %v3365_v22, %v3366_v25 }
0x3193   : > { %v2352_v34 = vpop.xlane.xlu1 %2351 }
0x3194   : > { %v3368_v35 = vrot.slane %v3367_v29, 2  ;;  %v2354_v37 = vsel %vm2353_vm2, -1e+18, %v2352_v34 }
0x3195   : > { %v2355_v38 = vrot.slane %v2354_v37, 4 }
0x3196   : > { %v3369_v40 = vmax.f32 %v3367_v29, %v3368_v35 }
0x3197   : > { %v2356_v23 = vmax.f32 %v2354_v37, %v2355_v38 }
0x3198   : > { %v3370_v16 = vrot.slane %v3369_v40, 1 }
0x3199   : > { %v2357_v41 = vrot.slane %v2356_v23, 2 }
0x319a   : > { %v3371_v36 = vmax.f32 %v3369_v40, %v3370_v16 }
0x319b   : > { %v2358_v24 = vmax.f32 %v2356_v23, %v2357_v41 }
0x319c   : > { %v3372_v43 = vsub.f32 %v3365_v22, %v3371_v36 }
0x319d   : > { %v2359_v45 = vrot.slane %v2358_v24, 1 }
0x319e   : > { %v3373_v46 = vmul.f32 1.442695, %v3372_v43 }
0x319f   : > { %v2360_v21 = vmax.f32 %v2358_v24, %v2359_v45 }
0x31a0   : > { %4610 = vpow2.f32 %v3373_v46 }
0x31a1   : > { %vm2361_vm11 = vcmp.ge.f32.partialorder %v2354_v37, %v2360_v21 }
0x31a2   : > { %v2362_v12 = vsel %vm2361_vm11, %v5778_v63, 8 }
0x31a3   : > { %v2363_v14 = vrot.slane %v2362_v12, 4 }
0x31a5   : > { %vm2364_vm14 = vcmp.lt.s32.totalorder %v2362_v12, %v2363_v14 }
0x31a6   : > { %v2365_v48 = vsel %vm2364_vm14, %v2362_v12, %v2363_v14 }
0x31a7   : > { %v2366_v55 = vrot.slane %v2365_v48, 2 }
0x31a9   : > { %vm2367_vm15 = vcmp.lt.s32.totalorder %v2365_v48, %v2366_v55 }
0x31aa   : > { %v4611_v49 = vpop.eup %4610  ;;  %v2368_v50 = vsel %vm2367_vm15, %v2365_v48, %v2366_v55 }
0x31ab   : > { %v3375_v51 = vrot.slane %v4611_v49, 4  ;;  %v2369_v52 = vrot.slane %v2368_v50, 1 }
0x31ad   : > { %vm2370_vm4 = vcmp.lt.s32.totalorder %v2368_v50, %v2369_v52  ;;  %v3376_v58 = vadd.f32 %v4611_v49, %v3375_v51 }
0x31ae   : > { %v2371_v63 = vsel %vm2370_vm4, %v2368_v50, %v2369_v52 }
0x31af   : > { %v3377_v56 = vrot.slane %v3376_v58, 2  ;;  %v2373_v54 = vsel %vm2372_vm3, %v2371_v63, %v5989_v15  ;;  %v2681_v63 = vpop.permute.xlu1 %2680 }
0x31b0   : > { %2375 = vst.msk [vmem:[%s846_s25] sm:$0x1] %vm2374_vm5, %v2373_v54  ;;  %v2683_v54 = vsel %vm1380_vm12, %v2681_v63, 0.0 }
0x31b1   : > { %v3378_v26 = vadd.f32 %v3377_v56, %v3376_v58 }
0x31b3   : > { %v3379_v61 = vrot.slane %v3378_v26, 1 }
0x31b5   : > { %v3380_v4 = vadd.f32 %v3379_v61, %v3378_v26  ;;  %v3238_v26 = vpop.permute.xlu1 %3237 }
0x31b7   : > { %4612 = vrcp.f32 %v3380_v4 }
0x31c1   : > { %v4613_v44 = vpop.eup %4612 }
0x31c2   : > { %v3382_v1 = vmul.f32 %v4613_v44, %v4611_v49 }
0x31c4   : > { %v3383_v18 = vmul.f32 %v3382_v1, %v5785_v5 }
0x31c6   : > { %v3384_v47 = vsel %vm2542_vm10, %v3383_v18, 0.0 }
0x31c7   : > { %v3385_v9 = vrot.slane %v3384_v47, 4 }
0x31c9   : > { %v3386_v57 = vadd.f32 %v3385_v9, %v3384_v47 }
0x31cb   : > { %v3387_v60 = vrot.slane %v3386_v57, 2 }
0x31cd   : > { %v3388_v30 = vadd.f32 %v3387_v60, %v3386_v57 }
0x31cf   : > { %v3389_v42 = vrot.slane %v3388_v30, 1 }
0x31d1   : > { %v3390_v32 = vadd.f32 %v3389_v42, %v3388_v30 }
0x31d3   : > { %3392 = vrot.lane.b32.xlu0 %v3390_v32, %s5163_s26 }
0x3245   : > { %v3393_v15 = vpop.permute.xlu0 %3392 }
0x3246   : > { %4135 = vmatmul.mubr.msk.f32.vlgmr.msra.gmra.mrb[20].mxu1 %vm867_vm0, %v3393_v15 }
0x3319   : > { %v3462_v7 = vpop.f32.mrb[20].mxu1 }
0x331a   : > { %v3469_v33 = vrot.slane %v3462_v7, %v5781_v0  ;;  %v4136_v8 = vpop.f32.mrb[21].mxu1  ;;  %v2954_v0 = vadd.f32 %v2953_v3, %v2952_v11 }
0x331c   : > { %3471 = vrot.lane.b32.xlu0 %v3469_v33, %s5162_s13  ;;  %v2955_v19 = vrot.slane %v2954_v0, 2 }
0x331e   : > { %v2956_v20 = vadd.f32 %v2955_v19, %v2954_v0 }
0x3320   : > { %v2957_v22 = vrot.slane %v2956_v20, 1 }
0x3322   : > { %v2958_v25 = vadd.f32 %v2957_v22, %v2956_v20 }
0x338e   : > { %v3472_v53 = vpop.permute.xlu0 %3471 }
0x338f   : > { %v3474_v59 = vadd.f32 %v3472_v53, %v5785_v5  ;;  %v2959_v5 = vadd.f32 %v2958_v25, %v6193_v31 }
0x3391   : > { %4614 = vtanh.f32 %v3474_v59 }
0x339b   : > { %v4615_v10 = vpop.eup %4614 }
0x339c   : > { %v3476_v62 = vmul.f32 %v4615_v10, %v6087_v17 }
0x339e   : > { %3478 = vrot.lane.b32.xlu0 %v3476_v62, %s5162_s13 }
0x3410   : > { %v3479_v2 = vpop.permute.xlu0 %3478 }
0x3411   : > { %v3481_v13 = vsel %vm867_vm0, %v3479_v2, 0.0 }
0x3412   : > { %3482 = vadd.xlane.f32.xlu0 %v3481_v13 }
0x3428   : > { %2962 = vperm.xlu0 %4475, %v2959_v5  }
0x349f   : > { %v3483_v28 = vpop.xlane.xlu0 %3482 }
0x34a0   : > { %v3484_v17 = vrot.slane %v3483_v28, 4 }
0x34a2   : > { %v3485_v29 = vmax.f32 %v3483_v28, %v3484_v17 }
0x34a4   : > { %v3486_v34 = vrot.slane %v3485_v29, 2 }
0x34a6   : > { %v3487_v35 = vmax.f32 %v3485_v29, %v3486_v34 }
0x34a7   : > { %v2963_v56 = vpop.permute.xlu0 %2962 }
0x34a8   : > { %v3488_v37 = vrot.slane %v3487_v35, 1 }
0x34aa   : > { %v3489_v39 = vmax.f32 %v3487_v35, %v3488_v37 }
0x34ac   : > { %v3490_v38 = vsub.f32 %v3483_v28, %v3489_v39 }
0x34ae   : > { %v3491_v40 = vmul.f32 1.442695, %v3490_v38 }
0x34b0   : > { %4616 = vpow2.f32 %v3491_v40 }
0x34ba   : > { %v4617_v23 = vpop.eup %4616 }
0x34bb   : > { %v3493_v16 = vrot.slane %v4617_v23, 4 }
0x34bd   : > { %v3494_v41 = vadd.f32 %v4617_v23, %v3493_v16 }
0x34bf   : > { %v3495_v36 = vrot.slane %v3494_v41, 2 }
0x34c1   : > { %v3496_v24 = vadd.f32 %v3495_v36, %v3494_v41 }
0x34c3   : > { %v3497_v43 = vrot.slane %v3496_v24, 1 }
0x34c5   : > { %v3498_v45 = vadd.f32 %v3497_v43, %v3496_v24 }
0x34c7   : > { %4618 = vrcp.f32 %v3498_v45 }
0x34d1   : > { %v4619_v46 = vpop.eup %4618 }
0x34d2   : > { %v3500_v21 = vmul.f32 %v4619_v46, %v4617_v23 }
0x34d4   : > { %v3501_v12 = vmul.f32 %v3500_v21, %v5787_v6  ;;  %v2965_v6 = vsel %vm1711_vm13, %v2963_v56, %v2683_v54 }
0x34d5   : > { %v3240_v61 = vsel %vm2042_vm7, %v3238_v26, %v2965_v6 }
0x34d6   : > { %v3502_v14 = vsel %vm2669_vm1, %v3501_v12, 0.0 }
0x34d7   : > { %v3503_v48 = vrot.slane %v3502_v14, 4 }
0x34d9   : > { %v3504_v55 = vadd.f32 %v3503_v48, %v3502_v14 }
0x34db   : > { %v3505_v49 = vrot.slane %v3504_v55, 2 }
0x34dd   : > { %v3506_v50 = vadd.f32 %v3505_v49, %v3504_v55 }
0x34df   : > { %v3507_v51 = vrot.slane %v3506_v50, 1 }
0x34e1   : > { %v3508_v52 = vadd.f32 %v3507_v51, %v3506_v50 }
0x34e3   : > { %v3509_v58 = vadd.f32 %v3508_v52, %v6193_v31 }
0x34e5   : > { %3512 = vperm.xlu1 %4474, %v3509_v58  }
0x3564   : > { %v3513_v4 = vpop.permute.xlu1 %3512 }
0x3565   : > { %v3515_v31 = vsel %vm2372_vm3, %v3513_v4, %v3240_v61 }
0x3566   : > { %3516 = vst.msk [vmem:[%s849_s23] sm:$0x1] %vm2374_vm5, %v3515_v31 }
0x3567 PF: > { %s6347_s23 = sld [smem:[#allocation38_spill]]  ;;  %s6348_s24 = sld [smem:[#allocation39_spill]] }
0x3568   : > { %p41_p11 = scmp.ge.s32.totalorder %s5616_s1, 10   ;;  %s6349_s25 = smov %s5616_s1 }
0x356a   :  { %43 = sbr.rel (!%p41_p11) target bundleno = 20 (0x14), region = 208 }
0x3571   :  { %3546 = vsyncpa [#allocation4], 1 }
0x3572   :  { %3548 = vsyncpa [#allocation4 + $0x1], 1 }
0x3573   :  { %3549 = vsyncpa [#allocation6], 1 }
0x3574   :  { %3550 = vsyncpa [#allocation9], 1 }
0x3575   :  { %3551 = vsyncpa [#allocation12], 1 }
0x3576   :  { %3552 = vsyncpa [#allocation15], 1 }
0x3577   :  { %3553 = vsyncpa [#allocation18], 1 }
0x3578   :  { %3554 = vsyncpa [#allocation21], 1 }
0x3579   :  { %3555 = vsyncpa [#allocation24], 1 }
0x357a   :  { %3556 = vsyncpa [#allocation27], 1 }

</bundles_post_ra>
